<compile_context>
chip_gen: v6e
topology: v6e:2x2x1
jax: 0.10.0
libtpu: 0.0.40
codegen_flags: <defaults>
</compile_context>

<pallas_src>
import functools
import math

import jax
import jax.numpy as jnp
from jax.experimental import pallas as pl
from jax.experimental.pallas import tpu as pltpu

# ----------------------------- configuration --------------------------------
BATCH = 2
IMG_C, IMG_H, IMG_W = 3, 16, 16
VISION_WIDTH = 64
EMBED_DIM = 32
CTX_LEN = 8            # context_length (text sequence length)
VOCAB = 64
T_WIDTH = 32           # transformer_width
T_HEADS = 4
T_LAYERS = 2
SW_PROJ = 16           # swalip_proj_dim
SW_HID = 32            # swalip_hidden_dim
SW_PROTO = 24          # swalip_num_proto
SW_TEMP = 0.1          # swalip_temperature
CLIP_TEMP = 0.07

OUT_LANES = 256        # lane-dense packed output slab width (multiple of 128)

_VMEM = lambda: pl.BlockSpec(memory_space=pltpu.MemorySpace.VMEM)


# --------------------------- in-kernel helpers -------------------------------
def _mxu(x, w_bf16):
    """bf16 x bf16 -> f32 MXU matmul (x is f32 activations, w already bf16)."""
    return jnp.dot(x.astype(jnp.bfloat16), w_bf16,
                   preferred_element_type=jnp.float32)


def _layernorm(x, w, b):
    """f32 LayerNorm. x:[M,D], w/b:[1,D] values."""
    mean = jnp.mean(x, axis=-1, keepdims=True)
    var = jnp.mean(jnp.square(x - mean), axis=-1, keepdims=True)
    return (x - mean) * jax.lax.rsqrt(var + 1e-5) * w + b


def _swalip_head(feats, l1_w, l1_b, l2_w, l2_b, proto_w):
    """Linear -> BatchNorm1d(batch stats, w=1,b=0) -> ReLU -> Linear ->
    F.normalize -> prototypes.  Returns (h, p)."""
    h = _mxu(feats, l1_w) + l1_b
    mean = jnp.mean(h, axis=0, keepdims=True)
    var = jnp.mean(jnp.square(h - mean), axis=0, keepdims=True)
    h = jnp.maximum((h - mean) * jax.lax.rsqrt(var + 1e-5), 0.0)
    h = _mxu(h, l2_w) + l2_b
    nrm = jnp.sqrt(jnp.sum(h * h, axis=-1, keepdims=True))
    hn = h / jnp.maximum(nrm, 1e-12)                    # F.normalize semantics
    p = _mxu(hn, proto_w)
    return h, p


def _pack_row(parts, batch, out_lanes):
    """Concatenate small outputs + zero pad into one lane-dense [B, out_lanes]."""
    width = sum(a.shape[-1] for a in parts)
    pad = jnp.zeros((batch, out_lanes - width), jnp.float32)
    return jnp.concatenate(parts + [pad], axis=-1)


# ------------------------------ fused kernel ---------------------------------
def _fused_kernel(
        img_ref, vis_w_ref, vis_b_ref, improj_w_ref,
        si_l1_w_ref, si_l1_b_ref, si_l2_w_ref, si_l2_b_ref,
        text_ref, eot_ref, tok_emb_ref, pos_emb_ref,
        ln1_w_ref, ln1_b_ref, w_in_ref, b_in_ref, w_out_ref, b_out_ref,
        ln2_w_ref, ln2_b_ref, w_fc_ref, b_fc_ref, w_proj_ref, b_proj_ref,
        lnf_w_ref, lnf_b_ref, tproj_w_ref,
        st_l1_w_ref, st_l1_b_ref, st_l2_w_ref, st_l2_b_ref,
        proto_w_ref,
        out_ref,
        *, batch, seq, n_layers, n_head, out_lanes):
    f32 = jnp.float32
    branch = pl.program_id(0)

    # ---------------------------- image branch ------------------------------
    @pl.when(branch == 0)
    def _image_branch():
        feats = _mxu(img_ref[...], vis_w_ref[...]) + vis_b_ref[...]
        z = _mxu(feats, improj_w_ref[...])
        h, p = _swalip_head(feats, si_l1_w_ref[...], si_l1_b_ref[...],
                            si_l2_w_ref[...], si_l2_b_ref[...],
                            proto_w_ref[...])
        out_ref[0] = _pack_row([feats, z, h, p], batch, out_lanes)

    # ----------------------------- text branch ------------------------------
    @pl.when(branch == 1)
    def _text_branch():
        V, W = tok_emb_ref.shape
        dh = W // n_head
        rows = batch * seq
        scale = 1.0 / math.sqrt(dh)

        # token-embedding gather (exact one-hot f32 matmul) + broadcast pos add
        tok_ids = text_ref[...]                                # [rows, 1] int32
        v_iota = jax.lax.broadcasted_iota(jnp.int32, (rows, V), 1)
        onehot = (v_iota == tok_ids).astype(f32)               # [rows, V]
        x = jnp.dot(onehot, tok_emb_ref[...], preferred_element_type=f32)
        x = (x.reshape(batch, seq, W) + pos_emb_ref[...][None]).reshape(rows, W)

        # additive causal mask [1, S, S], broadcast over batch
        r_iota = jax.lax.broadcasted_iota(jnp.int32, (seq, seq), 0)
        c_iota = jax.lax.broadcasted_iota(jnp.int32, (seq, seq), 1)
        neg_mask = jnp.where(c_iota > r_iota, f32(-jnp.inf), f32(0.0))[None]

        # residual attention blocks (stacked per-layer weights, static unroll)
        for l in range(n_layers):
            # --- attention branch ---
            hln = _layernorm(x, ln1_w_ref[l], ln1_b_ref[l])
            qkv = _mxu(hln, w_in_ref[l]) + b_in_ref[l]          # [rows, 3W]
            q = qkv[:, 0 * W:1 * W].reshape(batch, seq, W)
            k = qkv[:, 1 * W:2 * W].reshape(batch, seq, W)
            v = qkv[:, 2 * W:3 * W].reshape(batch, seq, W)
            head_outs = []
            for hd in range(n_head):
                c = hd * dh
                qh = q[:, :, c:c + dh]
                kh = k[:, :, c:c + dh]
                vh = v[:, :, c:c + dh]
                s = jnp.einsum('bqd,bkd->bqk', qh.astype(jnp.bfloat16),
                               kh.astype(jnp.bfloat16),
                               preferred_element_type=f32) * scale + neg_mask
                s = s - jnp.max(s, axis=-1, keepdims=True)
                probs = jnp.exp(s)                              # f32 EUP
                inv = pl.reciprocal(jnp.sum(probs, axis=-1, keepdims=True),
                                    approx=True)
                o = jnp.einsum('bqk,bkd->bqd', probs.astype(jnp.bfloat16),
                               vh.astype(jnp.bfloat16),
                               preferred_element_type=f32) * inv
                head_outs.append(o)
            attn = jnp.concatenate(head_outs, axis=-1).reshape(rows, W)
            x = x + _mxu(attn, w_out_ref[l]) + b_out_ref[l]
            # --- MLP branch (c_fc -> QuickGELU -> c_proj) ---
            hln = _layernorm(x, ln2_w_ref[l], ln2_b_ref[l])
            m = _mxu(hln, w_fc_ref[l]) + b_fc_ref[l]
            m = m * jax.nn.sigmoid(1.702 * m)                   # QuickGELU, f32
            x = x + _mxu(m, w_proj_ref[l]) + b_proj_ref[l]

        # final LayerNorm + EOT row-select (exact one-hot f32 matmul)
        x = _layernorm(x, lnf_w_ref[...], lnf_b_ref[...])
        row_iota = jax.lax.broadcasted_iota(jnp.int32, (batch, rows), 0)
        col_iota = jax.lax.broadcasted_iota(jnp.int32, (batch, rows), 1)
        sel = (col_iota == row_iota * seq + eot_ref[...]).astype(f32)
        feats = jnp.dot(sel, x, preferred_element_type=f32)     # [batch, W]

        z = _mxu(feats, tproj_w_ref[...])
        h, p = _swalip_head(feats, st_l1_w_ref[...], st_l1_b_ref[...],
                            st_l2_w_ref[...], st_l2_b_ref[...],
                            proto_w_ref[...])
        out_ref[0] = _pack_row([feats, z, h, p], batch, out_lanes)


# --------------------------------- forward -----------------------------------
def swalip_forward(params, image, text):
    B = image.shape[0]
    S = text.shape[1]

    # injected `visual` backbone stand-in: flatten + linear -> vision_width
    img_flat = image.reshape(B, -1).astype(jnp.float32)
    text_ids = text.reshape(B * S, 1).astype(jnp.int32)      # batch-major rows
    eot = jnp.argmax(text, axis=-1).astype(jnp.int32).reshape(B, 1)

    kernel = functools.partial(_fused_kernel, batch=B, seq=S,
                               n_layers=T_LAYERS, n_head=T_HEADS,
                               out_lanes=OUT_LANES)
    packed = pl.pallas_call(
        kernel,
        grid=(2,),                                 # 0: image, 1: text
        out_shape=jax.ShapeDtypeStruct((2, B, OUT_LANES), jnp.float32),
        in_specs=[_VMEM()] * 32,
        out_specs=pl.BlockSpec((1, B, OUT_LANES), lambda i: (i, 0, 0)),
        compiler_params=pltpu.CompilerParams(
            dimension_semantics=("parallel",)),    # v7x: one branch per TC
    )(img_flat, params["visual_w"], params["visual_b"], params["image_proj_w"],
      params["si_l1_w"], params["si_l1_b"], params["si_l2_w"], params["si_l2_b"],
      text_ids, eot, params["tok_emb"], params["pos_emb"],
      params["ln1_w"], params["ln1_b"], params["w_in"], params["b_in"],
      params["w_out"], params["b_out"], params["ln2_w"], params["ln2_b"],
      params["w_fc"], params["b_fc"], params["w_proj"], params["b_proj"],
      params["ln_final_w"], params["ln_final_b"], params["text_proj_w"],
      params["st_l1_w"], params["st_l1_b"], params["st_l2_w"], params["st_l2_b"],
      params["proto_w"])

    # unpack the lane-dense slab in the XLA wrapper (cheap slices)
    img_row, txt_row = packed[0], packed[1]
    out = {}
    off = 0
    for name, width in (("feats_image", VISION_WIDTH), ("z_image", EMBED_DIM),
                        ("h_image", SW_PROJ), ("p_image", SW_PROTO)):
        out[name] = img_row[:, off:off + width]
        off += width
    off = 0
    for name, width in (("feats_text", T_WIDTH), ("z_text", EMBED_DIM),
                        ("h_text", SW_PROJ), ("p_text", SW_PROTO)):
        out[name] = txt_row[:, off:off + width]
        off += width
    out["logit_scale"] = jnp.exp(params["logit_scale"])
    out["swalip_logit_scale"] = jnp.exp(params["swalip_logit_scale"])
    return out


# ------------------------------ param init ----------------------------------
def init_params(key):
    """Same initialization distributions as the reference; weights are
    pre-transposed to [K, N] and pre-cast to bf16 ONCE here (not per call)."""
    keys = iter(jax.random.split(key, 128))
    nrm = lambda shape, std: std * jax.random.normal(next(keys), shape,
                                                     jnp.float32)
    zeros = lambda *s: jnp.zeros(s, jnp.float32)
    ones = lambda *s: jnp.ones(s, jnp.float32)
    bf16 = lambda a: a.astype(jnp.bfloat16)

    proj_std = (T_WIDTH ** -0.5) * ((2 * T_LAYERS) ** -0.5)
    attn_std = T_WIDTH ** -0.5
    fc_std = (2 * T_WIDTH) ** -0.5

    # per-layer transformer weights (PyTorch layout, then transpose), stacked
    w_in = jnp.stack([nrm((3 * T_WIDTH, T_WIDTH), attn_std).T
                      for _ in range(T_LAYERS)])              # [L, W, 3W]
    w_out = jnp.stack([nrm((T_WIDTH, T_WIDTH), proj_std).T
                       for _ in range(T_LAYERS)])             # [L, W, W]
    w_fc = jnp.stack([nrm((4 * T_WIDTH, T_WIDTH), fc_std).T
                      for _ in range(T_LAYERS)])              # [L, W, 4W]
    w_proj = jnp.stack([nrm((T_WIDTH, 4 * T_WIDTH), proj_std).T
                        for _ in range(T_LAYERS)])            # [L, 4W, W]

    # weight-normalized prototypes (g = 1 -> rows L2-normalized), shared
    proto_v = nrm((SW_PROTO, SW_PROJ), 1.0)
    proto_w = proto_v / jnp.linalg.norm(proto_v, axis=1, keepdims=True)

    img_in = IMG_C * IMG_H * IMG_W
    return dict(
        # ------- image path (pre-transposed [K, N], bf16 MXU operands) ------
        visual_w=bf16(nrm((VISION_WIDTH, img_in), img_in ** -0.5).T),
        visual_b=zeros(1, VISION_WIDTH),
        image_proj_w=bf16(nrm((EMBED_DIM, VISION_WIDTH),
                              VISION_WIDTH ** -0.5).T),
        si_l1_w=bf16(nrm((SW_HID, VISION_WIDTH), VISION_WIDTH ** -0.5).T),
        si_l1_b=zeros(1, SW_HID),
        si_l2_w=bf16(nrm((SW_PROJ, SW_HID), SW_HID ** -0.5).T),
        si_l2_b=zeros(1, SW_PROJ),
        # ------------------------------ text path ---------------------------
        tok_emb=nrm((VOCAB, T_WIDTH), 0.02),
        pos_emb=nrm((CTX_LEN, T_WIDTH), 0.01),
        ln1_w=ones(T_LAYERS, 1, T_WIDTH), ln1_b=zeros(T_LAYERS, 1, T_WIDTH),
        w_in=bf16(w_in), b_in=zeros(T_LAYERS, 1, 3 * T_WIDTH),
        w_out=bf16(w_out), b_out=zeros(T_LAYERS, 1, T_WIDTH),
        ln2_w=ones(T_LAYERS, 1, T_WIDTH), ln2_b=zeros(T_LAYERS, 1, T_WIDTH),
        w_fc=bf16(w_fc), b_fc=zeros(T_LAYERS, 1, 4 * T_WIDTH),
        w_proj=bf16(w_proj), b_proj=zeros(T_LAYERS, 1, T_WIDTH),
        ln_final_w=ones(1, T_WIDTH), ln_final_b=zeros(1, T_WIDTH),
        text_proj_w=bf16(nrm((EMBED_DIM, T_WIDTH), T_WIDTH ** -0.5).T),
        st_l1_w=bf16(nrm((SW_HID, T_WIDTH), T_WIDTH ** -0.5).T),
        st_l1_b=zeros(1, SW_HID),
        st_l2_w=bf16(nrm((SW_PROJ, SW_HID), SW_HID ** -0.5).T),
        st_l2_b=zeros(1, SW_PROJ),
        # ------------------- shared prototypes & temperatures ---------------
        proto_w=bf16(proto_w.T),                              # [P, NP]
        logit_scale=jnp.array(math.log(1.0 / CLIP_TEMP), jnp.float32),
        swalip_logit_scale=jnp.array(math.log(1.0 / SW_TEMP), jnp.float32),
    )


# --------------------------------- main --------------------------------------
if __name__ == "__main__":
    root = jax.random.PRNGKey(0)
    k_param, k_img, k_txt = jax.random.split(root, 3)

    params = init_params(k_param)
    image = jax.random.normal(k_img, (BATCH, IMG_C, IMG_H, IMG_W), jnp.float32)
    text = jax.random.randint(k_txt, (BATCH, CTX_LEN), 0, VOCAB, jnp.int32)

    fwd = jax.jit(swalip_forward)
    out = fwd(params, image, text)
    jax.block_until_ready(out)

    # sanity on output shapes (mirrors the PyTorch forward dict)
    assert out["feats_image"].shape == (BATCH, VISION_WIDTH)
    assert out["z_image"].shape == (BATCH, EMBED_DIM)
    assert out["h_image"].shape == (BATCH, SW_PROJ)
    assert out["p_image"].shape == (BATCH, SW_PROTO)
    assert out["feats_text"].shape == (BATCH, T_WIDTH)
    assert out["z_text"].shape == (BATCH, EMBED_DIM)
    assert out["h_text"].shape == (BATCH, SW_PROJ)
    assert out["p_text"].shape == (BATCH, SW_PROTO)
    assert out["logit_scale"].shape == ()
    assert out["swalip_logit_scale"].shape == ()

    print("KERNEL_OK")
</pallas_src>

<mosaic_0001>
module attributes {stable_mosaic.version = 11 : i64} {
  func.func @_fused_kernel(%arg0: i32, %arg1: memref<2x768xf32, #tpu.memory_space<vmem>>, %arg2: memref<768x64xbf16, #tpu.memory_space<vmem>>, %arg3: memref<1x64xf32, #tpu.memory_space<vmem>>, %arg4: memref<64x32xbf16, #tpu.memory_space<vmem>>, %arg5: memref<64x32xbf16, #tpu.memory_space<vmem>>, %arg6: memref<1x32xf32, #tpu.memory_space<vmem>>, %arg7: memref<32x16xbf16, #tpu.memory_space<vmem>>, %arg8: memref<1x16xf32, #tpu.memory_space<vmem>>, %arg9: memref<16x1xi32, #tpu.memory_space<vmem>>, %arg10: memref<2x1xi32, #tpu.memory_space<vmem>>, %arg11: memref<64x32xf32, #tpu.memory_space<vmem>>, %arg12: memref<8x32xf32, #tpu.memory_space<vmem>>, %arg13: memref<2x1x32xf32, #tpu.memory_space<vmem>>, %arg14: memref<2x1x32xf32, #tpu.memory_space<vmem>>, %arg15: memref<2x32x96xbf16, #tpu.memory_space<vmem>>, %arg16: memref<2x1x96xf32, #tpu.memory_space<vmem>>, %arg17: memref<2x32x32xbf16, #tpu.memory_space<vmem>>, %arg18: memref<2x1x32xf32, #tpu.memory_space<vmem>>, %arg19: memref<2x1x32xf32, #tpu.memory_space<vmem>>, %arg20: memref<2x1x32xf32, #tpu.memory_space<vmem>>, %arg21: memref<2x32x128xbf16, #tpu.memory_space<vmem>>, %arg22: memref<2x1x128xf32, #tpu.memory_space<vmem>>, %arg23: memref<2x128x32xbf16, #tpu.memory_space<vmem>>, %arg24: memref<2x1x32xf32, #tpu.memory_space<vmem>>, %arg25: memref<1x32xf32, #tpu.memory_space<vmem>>, %arg26: memref<1x32xf32, #tpu.memory_space<vmem>>, %arg27: memref<32x32xbf16, #tpu.memory_space<vmem>>, %arg28: memref<32x32xbf16, #tpu.memory_space<vmem>>, %arg29: memref<1x32xf32, #tpu.memory_space<vmem>>, %arg30: memref<32x16xbf16, #tpu.memory_space<vmem>>, %arg31: memref<1x16xf32, #tpu.memory_space<vmem>>, %arg32: memref<16x24xbf16, #tpu.memory_space<vmem>>, %arg33: memref<1x2x256xf32, #tpu.memory_space<vmem>>) attributes {dimension_semantics = [#tpu.dimension_semantics<parallel>], iteration_bounds = array<i64: 2>, scalar_prefetch = 0 : i64, scratch_operands = 0 : i64, tpu.core_type = #tpu.core_type<tc>, window_params = [{pipeline_mode = #tpu.pipeline_mode<synchronous>, transform_indices = @transform_0, window_bounds = array<i64: 2, 768>}, {pipeline_mode = #tpu.pipeline_mode<synchronous>, transform_indices = @transform_1, window_bounds = array<i64: 768, 64>}, {pipeline_mode = #tpu.pipeline_mode<synchronous>, transform_indices = @transform_2, window_bounds = array<i64: 1, 64>}, {pipeline_mode = #tpu.pipeline_mode<synchronous>, transform_indices = @transform_3, window_bounds = array<i64: 64, 32>}, {pipeline_mode = #tpu.pipeline_mode<synchronous>, transform_indices = @transform_4, window_bounds = array<i64: 64, 32>}, {pipeline_mode = #tpu.pipeline_mode<synchronous>, transform_indices = @transform_5, window_bounds = array<i64: 1, 32>}, {pipeline_mode = #tpu.pipeline_mode<synchronous>, transform_indices = @transform_6, window_bounds = array<i64: 32, 16>}, {pipeline_mode = #tpu.pipeline_mode<synchronous>, transform_indices = @transform_7, window_bounds = array<i64: 1, 16>}, {pipeline_mode = #tpu.pipeline_mode<synchronous>, transform_indices = @transform_8, window_bounds = array<i64: 16, 1>}, {pipeline_mode = #tpu.pipeline_mode<synchronous>, transform_indices = @transform_9, window_bounds = array<i64: 2, 1>}, {pipeline_mode = #tpu.pipeline_mode<synchronous>, transform_indices = @transform_10, window_bounds = array<i64: 64, 32>}, {pipeline_mode = #tpu.pipeline_mode<synchronous>, transform_indices = @transform_11, window_bounds = array<i64: 8, 32>}, {pipeline_mode = #tpu.pipeline_mode<synchronous>, transform_indices = @transform_12, window_bounds = array<i64: 2, 1, 32>}, {pipeline_mode = #tpu.pipeline_mode<synchronous>, transform_indices = @transform_13, window_bounds = array<i64: 2, 1, 32>}, {pipeline_mode = #tpu.pipeline_mode<synchronous>, transform_indices = @transform_14, window_bounds = array<i64: 2, 32, 96>}, {pipeline_mode = #tpu.pipeline_mode<synchronous>, transform_indices = @transform_15, window_bounds = array<i64: 2, 1, 96>}, {pipeline_mode = #tpu.pipeline_mode<synchronous>, transform_indices = @transform_16, window_bounds = array<i64: 2, 32, 32>}, {pipeline_mode = #tpu.pipeline_mode<synchronous>, transform_indices = @transform_17, window_bounds = array<i64: 2, 1, 32>}, {pipeline_mode = #tpu.pipeline_mode<synchronous>, transform_indices = @transform_18, window_bounds = array<i64: 2, 1, 32>}, {pipeline_mode = #tpu.pipeline_mode<synchronous>, transform_indices = @transform_19, window_bounds = array<i64: 2, 1, 32>}, {pipeline_mode = #tpu.pipeline_mode<synchronous>, transform_indices = @transform_20, window_bounds = array<i64: 2, 32, 128>}, {pipeline_mode = #tpu.pipeline_mode<synchronous>, transform_indices = @transform_21, window_bounds = array<i64: 2, 1, 128>}, {pipeline_mode = #tpu.pipeline_mode<synchronous>, transform_indices = @transform_22, window_bounds = array<i64: 2, 128, 32>}, {pipeline_mode = #tpu.pipeline_mode<synchronous>, transform_indices = @transform_23, window_bounds = array<i64: 2, 1, 32>}, {pipeline_mode = #tpu.pipeline_mode<synchronous>, transform_indices = @transform_24, window_bounds = array<i64: 1, 32>}, {pipeline_mode = #tpu.pipeline_mode<synchronous>, transform_indices = @transform_25, window_bounds = array<i64: 1, 32>}, {pipeline_mode = #tpu.pipeline_mode<synchronous>, transform_indices = @transform_26, window_bounds = array<i64: 32, 32>}, {pipeline_mode = #tpu.pipeline_mode<synchronous>, transform_indices = @transform_27, window_bounds = array<i64: 32, 32>}, {pipeline_mode = #tpu.pipeline_mode<synchronous>, transform_indices = @transform_28, window_bounds = array<i64: 1, 32>}, {pipeline_mode = #tpu.pipeline_mode<synchronous>, transform_indices = @transform_29, window_bounds = array<i64: 32, 16>}, {pipeline_mode = #tpu.pipeline_mode<synchronous>, transform_indices = @transform_30, window_bounds = array<i64: 1, 16>}, {pipeline_mode = #tpu.pipeline_mode<synchronous>, transform_indices = @transform_31, window_bounds = array<i64: 16, 24>}, {transform_indices = @transform_32, window_bounds = array<i64: 1, 2, 256>}]} {
    %c0_i32 = arith.constant 0 : i32
    %0 = arith.cmpi eq, %arg0, %c0_i32 : i32
    %1 = arith.extui %0 : i1 to i32
    %c0_i32_0 = arith.constant 0 : i32
    %2 = arith.cmpi ne, %1, %c0_i32_0 : i32
    scf.if %2 {
      %c0 = arith.constant 0 : index
      %c0_2 = arith.constant 0 : index
      %6 = vector.load %arg1[%c0, %c0_2] : memref<2x768xf32, #tpu.memory_space<vmem>>, vector<2x768xf32>
      %c0_3 = arith.constant 0 : index
      %c0_4 = arith.constant 0 : index
      %7 = vector.load %arg2[%c0_3, %c0_4] : memref<768x64xbf16, #tpu.memory_space<vmem>>, vector<768x64xbf16>
      %8 = arith.truncf %6 : vector<2x768xf32> to vector<2x768xbf16>
      %cst = arith.constant dense<0.000000e+00> : vector<2x64xf32>
      %9 = tpu.matmul %8, %7, %cst {dimension_numbers = #tpu.dot_dimension_numbers<[1], [0], [0], [1], [0, 0, 1, 1], [], []>} : vector<2x768xbf16>, vector<768x64xbf16>, vector<2x64xf32> -> vector<2x64xf32>
      %c0_5 = arith.constant 0 : index
      %c0_6 = arith.constant 0 : index
      %10 = vector.load %arg3[%c0_5, %c0_6] : memref<1x64xf32, #tpu.memory_space<vmem>>, vector<1x64xf32>
      %11 = vector.broadcast %10 : vector<1x64xf32> to vector<2x64xf32>
      %12 = arith.addf %9, %11 : vector<2x64xf32>
      %c0_7 = arith.constant 0 : index
      %c0_8 = arith.constant 0 : index
      %13 = vector.load %arg4[%c0_7, %c0_8] : memref<64x32xbf16, #tpu.memory_space<vmem>>, vector<64x32xbf16>
      %14 = arith.truncf %12 : vector<2x64xf32> to vector<2x64xbf16>
      %cst_9 = arith.constant dense<0.000000e+00> : vector<2x32xf32>
      %15 = tpu.matmul %14, %13, %cst_9 {dimension_numbers = #tpu.dot_dimension_numbers<[1], [0], [0], [1], [0, 0, 1, 1], [], []>} : vector<2x64xbf16>, vector<64x32xbf16>, vector<2x32xf32> -> vector<2x32xf32>
      %c0_10 = arith.constant 0 : index
      %c0_11 = arith.constant 0 : index
      %16 = vector.load %arg5[%c0_10, %c0_11] : memref<64x32xbf16, #tpu.memory_space<vmem>>, vector<64x32xbf16>
      %c0_12 = arith.constant 0 : index
      %c0_13 = arith.constant 0 : index
      %17 = vector.load %arg6[%c0_12, %c0_13] : memref<1x32xf32, #tpu.memory_space<vmem>>, vector<1x32xf32>
      %c0_14 = arith.constant 0 : index
      %c0_15 = arith.constant 0 : index
      %18 = vector.load %arg7[%c0_14, %c0_15] : memref<32x16xbf16, #tpu.memory_space<vmem>>, vector<32x16xbf16>
      %c0_16 = arith.constant 0 : index
      %c0_17 = arith.constant 0 : index
      %19 = vector.load %arg8[%c0_16, %c0_17] : memref<1x16xf32, #tpu.memory_space<vmem>>, vector<1x16xf32>
      %c0_18 = arith.constant 0 : index
      %c0_19 = arith.constant 0 : index
      %20 = vector.load %arg32[%c0_18, %c0_19] : memref<16x24xbf16, #tpu.memory_space<vmem>>, vector<16x24xbf16>
      %21 = arith.truncf %12 : vector<2x64xf32> to vector<2x64xbf16>
      %cst_20 = arith.constant dense<0.000000e+00> : vector<2x32xf32>
      %22 = tpu.matmul %21, %16, %cst_20 {dimension_numbers = #tpu.dot_dimension_numbers<[1], [0], [0], [1], [0, 0, 1, 1], [], []>} : vector<2x64xbf16>, vector<64x32xbf16>, vector<2x32xf32> -> vector<2x32xf32>
      %23 = vector.broadcast %17 : vector<1x32xf32> to vector<2x32xf32>
      %24 = arith.addf %22, %23 : vector<2x32xf32>
      %cst_21 = arith.constant dense<0.000000e+00> : vector<32xf32>
      %25 = vector.multi_reduction <add>, %24, %cst_21 [0] : vector<2x32xf32> to vector<32xf32>
      %26 = vector.shape_cast %25 : vector<32xf32> to vector<1x32xf32>
      %cst_22 = arith.constant 2.000000e+00 : f32
      %27 = vector.broadcast %cst_22 : f32 to vector<1x32xf32>
      %28 = arith.divf %26, %27 : vector<1x32xf32>
      %29 = vector.broadcast %28 : vector<1x32xf32> to vector<2x32xf32>
      %30 = arith.subf %24, %29 : vector<2x32xf32>
      %31 = arith.mulf %30, %30 : vector<2x32xf32>
      %cst_23 = arith.constant dense<0.000000e+00> : vector<32xf32>
      %32 = vector.multi_reduction <add>, %31, %cst_23 [0] : vector<2x32xf32> to vector<32xf32>
      %33 = vector.shape_cast %32 : vector<32xf32> to vector<1x32xf32>
      %cst_24 = arith.constant 2.000000e+00 : f32
      %34 = vector.broadcast %cst_24 : f32 to vector<1x32xf32>
      %35 = arith.divf %33, %34 : vector<1x32xf32>
      %36 = vector.broadcast %28 : vector<1x32xf32> to vector<2x32xf32>
      %37 = arith.subf %24, %36 : vector<2x32xf32>
      %cst_25 = arith.constant 9.99999974E-6 : f32
      %38 = vector.broadcast %cst_25 : f32 to vector<1x32xf32>
      %39 = arith.addf %35, %38 : vector<1x32xf32>
      %40 = math.rsqrt %39 : vector<1x32xf32>
      %41 = vector.broadcast %40 : vector<1x32xf32> to vector<2x32xf32>
      %42 = arith.mulf %37, %41 : vector<2x32xf32>
      %cst_26 = arith.constant 0.000000e+00 : f32
      %43 = vector.broadcast %cst_26 : f32 to vector<2x32xf32>
      %44 = arith.maximumf %42, %43 : vector<2x32xf32>
      %45 = arith.truncf %44 : vector<2x32xf32> to vector<2x32xbf16>
      %cst_27 = arith.constant dense<0.000000e+00> : vector<2x16xf32>
      %46 = tpu.matmul %45, %18, %cst_27 {dimension_numbers = #tpu.dot_dimension_numbers<[1], [0], [0], [1], [0, 0, 1, 1], [], []>} : vector<2x32xbf16>, vector<32x16xbf16>, vector<2x16xf32> -> vector<2x16xf32>
      %47 = vector.broadcast %19 : vector<1x16xf32> to vector<2x16xf32>
      %48 = arith.addf %46, %47 : vector<2x16xf32>
      %49 = arith.mulf %48, %48 : vector<2x16xf32>
      %cst_28 = arith.constant dense<0.000000e+00> : vector<2xf32>
      %50 = vector.multi_reduction <add>, %49, %cst_28 [1] : vector<2x16xf32> to vector<2xf32>
      %51 = vector.shape_cast %50 : vector<2xf32> to vector<2x1xf32>
      %52 = math.sqrt %51 : vector<2x1xf32>
      %cst_29 = arith.constant 9.99999996E-13 : f32
      %53 = vector.broadcast %cst_29 : f32 to vector<2x1xf32>
      %54 = arith.maximumf %52, %53 : vector<2x1xf32>
      %55 = vector.broadcast %54 : vector<2x1xf32> to vector<2x16xf32>
      %56 = arith.divf %48, %55 : vector<2x16xf32>
      %57 = arith.truncf %56 : vector<2x16xf32> to vector<2x16xbf16>
      %cst_30 = arith.constant dense<0.000000e+00> : vector<2x24xf32>
      %58 = tpu.matmul %57, %20, %cst_30 {dimension_numbers = #tpu.dot_dimension_numbers<[1], [0], [0], [1], [0, 0, 1, 1], [], []>} : vector<2x16xbf16>, vector<16x24xbf16>, vector<2x24xf32> -> vector<2x24xf32>
      %cst_31 = arith.constant 0.000000e+00 : f32
      %59 = vector.broadcast %cst_31 : f32 to vector<2x120xf32>
      %60 = tpu.concatenate %12, %15, %48, %58, %59 in 1 : vector<2x64xf32>, vector<2x32xf32>, vector<2x16xf32>, vector<2x24xf32>, vector<2x120xf32> -> vector<2x256xf32>
      %c0_32 = arith.constant 0 : index
      %c0_33 = arith.constant 0 : index
      %c0_34 = arith.constant 0 : index
      %61 = vector.load %arg33[%c0_32, %c0_33, %c0_34] : memref<1x2x256xf32, #tpu.memory_space<vmem>>, vector<1x2x256xf32>
      %62 = vector.shape_cast %61 : vector<1x2x256xf32> to vector<2x256xf32>
      %63 = vector.shape_cast %60 : vector<2x256xf32> to vector<1x2x256xf32>
      tpu.vector_store %arg33[%c0_32, %c0_33, %c0_34], %63 {strides = array<i32>} : memref<1x2x256xf32, #tpu.memory_space<vmem>>, vector<1x2x256xf32>,
    } else {
    }
    %c1_i32 = arith.constant 1 : i32
    %3 = arith.cmpi eq, %arg0, %c1_i32 : i32
    %4 = arith.extui %3 : i1 to i32
    %c0_i32_1 = arith.constant 0 : i32
    %5 = arith.cmpi ne, %4, %c0_i32_1 : i32
    scf.if %5 {
      %c0 = arith.constant 0 : index
      %c0_2 = arith.constant 0 : index
      %6 = vector.load %arg9[%c0, %c0_2] : memref<16x1xi32, #tpu.memory_space<vmem>>, vector<16x1xi32>
      %7 = tpu.iota {dimensions = array<i32: 1>} : vector<16x64xi32>
      %8 = vector.broadcast %6 : vector<16x1xi32> to vector<16x64xi32>
      %9 = arith.cmpi eq, %7, %8 : vector<16x64xi32>
      %10 = arith.extui %9 : vector<16x64xi1> to vector<16x64xi32>
      %11 = arith.sitofp %10 : vector<16x64xi32> to vector<16x64xf32>
      %c0_3 = arith.constant 0 : index
      %c0_4 = arith.constant 0 : index
      %12 = vector.load %arg11[%c0_3, %c0_4] : memref<64x32xf32, #tpu.memory_space<vmem>>, vector<64x32xf32>
      %cst = arith.constant dense<0.000000e+00> : vector<16x32xf32>
      %13 = tpu.matmul %11, %12, %cst {dimension_numbers = #tpu.dot_dimension_numbers<[1], [0], [0], [1], [0, 0, 1, 1], [], []>} : vector<16x64xf32>, vector<64x32xf32>, vector<16x32xf32> -> vector<16x32xf32>
      %14 = vector.shape_cast %13 : vector<16x32xf32> to vector<2x8x32xf32>
      %c0_5 = arith.constant 0 : index
      %c0_6 = arith.constant 0 : index
      %15 = vector.load %arg12[%c0_5, %c0_6] : memref<8x32xf32, #tpu.memory_space<vmem>>, vector<8x32xf32>
      %16 = vector.shape_cast %15 : vector<8x32xf32> to vector<1x8x32xf32>
      %17 = vector.broadcast %16 : vector<1x8x32xf32> to vector<2x8x32xf32>
      %18 = arith.addf %14, %17 : vector<2x8x32xf32>
      %19 = vector.shape_cast %18 : vector<2x8x32xf32> to vector<16x32xf32>
      %20 = tpu.iota {dimensions = array<i32: 0>} : vector<8x8xi32>
      %21 = tpu.iota {dimensions = array<i32: 1>} : vector<8x8xi32>
      %22 = arith.cmpi sgt, %21, %20 : vector<8x8xi32>
      %cst_7 = arith.constant 0xFF800000 : f32
      %cst_8 = arith.constant 0.000000e+00 : f32
      %23 = vector.broadcast %cst_7 : f32 to vector<8x8xf32>
      %24 = vector.broadcast %cst_8 : f32 to vector<8x8xf32>
      %25 = arith.select %22, %23, %24 : vector<8x8xi1>, vector<8x8xf32>
      %26 = vector.shape_cast %25 : vector<8x8xf32> to vector<1x8x8xf32>
      %c0_9 = arith.constant 0 : index
      %c0_10 = arith.constant 0 : index
      %c0_11 = arith.constant 0 : index
      %27 = vector.load %arg13[%c0_9, %c0_10, %c0_11] : memref<2x1x32xf32, #tpu.memory_space<vmem>>, vector<1x1x32xf32>
      %28 = vector.shape_cast %27 : vector<1x1x32xf32> to vector<1x32xf32>
      %c0_12 = arith.constant 0 : index
      %c0_13 = arith.constant 0 : index
      %c0_14 = arith.constant 0 : index
      %29 = vector.load %arg14[%c0_12, %c0_13, %c0_14] : memref<2x1x32xf32, #tpu.memory_space<vmem>>, vector<1x1x32xf32>
      %30 = vector.shape_cast %29 : vector<1x1x32xf32> to vector<1x32xf32>
      %cst_15 = arith.constant dense<0.000000e+00> : vector<16xf32>
      %31 = vector.multi_reduction <add>, %19, %cst_15 [1] : vector<16x32xf32> to vector<16xf32>
      %32 = vector.shape_cast %31 : vector<16xf32> to vector<16x1xf32>
      %cst_16 = arith.constant 3.200000e+01 : f32
      %33 = vector.broadcast %cst_16 : f32 to vector<16x1xf32>
      %34 = arith.divf %32, %33 : vector<16x1xf32>
      %35 = vector.broadcast %34 : vector<16x1xf32> to vector<16x32xf32>
      %36 = arith.subf %19, %35 : vector<16x32xf32>
      %37 = arith.mulf %36, %36 : vector<16x32xf32>
      %cst_17 = arith.constant dense<0.000000e+00> : vector<16xf32>
      %38 = vector.multi_reduction <add>, %37, %cst_17 [1] : vector<16x32xf32> to vector<16xf32>
      %39 = vector.shape_cast %38 : vector<16xf32> to vector<16x1xf32>
      %cst_18 = arith.constant 3.200000e+01 : f32
      %40 = vector.broadcast %cst_18 : f32 to vector<16x1xf32>
      %41 = arith.divf %39, %40 : vector<16x1xf32>
      %42 = vector.broadcast %34 : vector<16x1xf32> to vector<16x32xf32>
      %43 = arith.subf %19, %42 : vector<16x32xf32>
      %cst_19 = arith.constant 9.99999974E-6 : f32
      %44 = vector.broadcast %cst_19 : f32 to vector<16x1xf32>
      %45 = arith.addf %41, %44 : vector<16x1xf32>
      %46 = math.rsqrt %45 : vector<16x1xf32>
      %47 = vector.broadcast %46 : vector<16x1xf32> to vector<16x32xf32>
      %48 = arith.mulf %43, %47 : vector<16x32xf32>
      %49 = vector.broadcast %28 : vector<1x32xf32> to vector<16x32xf32>
      %50 = arith.mulf %48, %49 : vector<16x32xf32>
      %51 = vector.broadcast %30 : vector<1x32xf32> to vector<16x32xf32>
      %52 = arith.addf %50, %51 : vector<16x32xf32>
      %c0_20 = arith.constant 0 : index
      %c0_21 = arith.constant 0 : index
      %c0_22 = arith.constant 0 : index
      %53 = vector.load %arg15[%c0_20, %c0_21, %c0_22] : memref<2x32x96xbf16, #tpu.memory_space<vmem>>, vector<1x32x96xbf16>
      %54 = vector.shape_cast %53 : vector<1x32x96xbf16> to vector<32x96xbf16>
      %55 = arith.truncf %52 : vector<16x32xf32> to vector<16x32xbf16>
      %cst_23 = arith.constant dense<0.000000e+00> : vector<16x96xf32>
      %56 = tpu.matmul %55, %54, %cst_23 {dimension_numbers = #tpu.dot_dimension_numbers<[1], [0], [0], [1], [0, 0, 1, 1], [], []>} : vector<16x32xbf16>, vector<32x96xbf16>, vector<16x96xf32> -> vector<16x96xf32>
      %c0_24 = arith.constant 0 : index
      %c0_25 = arith.constant 0 : index
      %c0_26 = arith.constant 0 : index
      %57 = vector.load %arg16[%c0_24, %c0_25, %c0_26] : memref<2x1x96xf32, #tpu.memory_space<vmem>>, vector<1x1x96xf32>
      %58 = vector.shape_cast %57 : vector<1x1x96xf32> to vector<1x96xf32>
      %59 = vector.broadcast %58 : vector<1x96xf32> to vector<16x96xf32>
      %60 = arith.addf %56, %59 : vector<16x96xf32>
      %61 = vector.extract_strided_slice %60 {offsets = [0, 0], sizes = [16, 32], strides = [1, 1]} : vector<16x96xf32> to vector<16x32xf32>
      %62 = vector.shape_cast %61 : vector<16x32xf32> to vector<2x8x32xf32>
      %63 = vector.extract_strided_slice %60 {offsets = [0, 32], sizes = [16, 32], strides = [1, 1]} : vector<16x96xf32> to vector<16x32xf32>
      %64 = vector.shape_cast %63 : vector<16x32xf32> to vector<2x8x32xf32>
      %65 = vector.extract_strided_slice %60 {offsets = [0, 64], sizes = [16, 32], strides = [1, 1]} : vector<16x96xf32> to vector<16x32xf32>
      %66 = vector.shape_cast %65 : vector<16x32xf32> to vector<2x8x32xf32>
      %67 = vector.extract_strided_slice %62 {offsets = [0, 0, 0], sizes = [2, 8, 8], strides = [1, 1, 1]} : vector<2x8x32xf32> to vector<2x8x8xf32>
      %68 = vector.extract_strided_slice %64 {offsets = [0, 0, 0], sizes = [2, 8, 8], strides = [1, 1, 1]} : vector<2x8x32xf32> to vector<2x8x8xf32>
      %69 = vector.extract_strided_slice %66 {offsets = [0, 0, 0], sizes = [2, 8, 8], strides = [1, 1, 1]} : vector<2x8x32xf32> to vector<2x8x8xf32>
      %70 = arith.truncf %67 : vector<2x8x8xf32> to vector<2x8x8xbf16>
      %71 = arith.truncf %68 : vector<2x8x8xf32> to vector<2x8x8xbf16>
      "tpu.trace_start"() <{level = 10 : i32, message = "bqd,bkd->bqk"}> : () -> ()
      %cst_27 = arith.constant dense<0.000000e+00> : vector<2x8x8xf32>
      %72 = tpu.matmul %70, %71, %cst_27 {dimension_numbers = #tpu.dot_dimension_numbers<[2], [2], [1], [1], [0, 0, 0, 1, 1, 1], [0], [0]>} : vector<2x8x8xbf16>, vector<2x8x8xbf16>, vector<2x8x8xf32> -> vector<2x8x8xf32>
      "tpu.trace_stop"() : () -> ()
      %cst_28 = arith.constant 0.353553385 : f32
      %73 = vector.broadcast %cst_28 : f32 to vector<2x8x8xf32>
      %74 = arith.mulf %72, %73 : vector<2x8x8xf32>
      %75 = vector.broadcast %26 : vector<1x8x8xf32> to vector<2x8x8xf32>
      %76 = arith.addf %74, %75 : vector<2x8x8xf32>
      %cst_29 = arith.constant dense<0xFF800000> : vector<2x8xf32>
      %77 = vector.multi_reduction <maximumf>, %76, %cst_29 [2] : vector<2x8x8xf32> to vector<2x8xf32>
      %78 = vector.shape_cast %77 : vector<2x8xf32> to vector<2x8x1xf32>
      %79 = vector.broadcast %78 : vector<2x8x1xf32> to vector<2x8x8xf32>
      %80 = arith.subf %76, %79 : vector<2x8x8xf32>
      %81 = math.exp %80 : vector<2x8x8xf32>
      %cst_30 = arith.constant dense<0.000000e+00> : vector<2x8xf32>
      %82 = vector.multi_reduction <add>, %81, %cst_30 [2] : vector<2x8x8xf32> to vector<2x8xf32>
      %83 = vector.shape_cast %82 : vector<2x8xf32> to vector<2x8x1xf32>
      %84 = tpu.reciprocal %83 {approx = true} : vector<2x8x1xf32> -> vector<2x8x1xf32>
      %85 = arith.truncf %81 : vector<2x8x8xf32> to vector<2x8x8xbf16>
      %86 = arith.truncf %69 : vector<2x8x8xf32> to vector<2x8x8xbf16>
      "tpu.trace_start"() <{level = 10 : i32, message = "bqk,bkd->bqd"}> : () -> ()
      %cst_31 = arith.constant dense<0.000000e+00> : vector<2x8x8xf32>
      %87 = tpu.matmul %85, %86, %cst_31 {dimension_numbers = #tpu.dot_dimension_numbers<[2], [1], [1], [2], [0, 0, 0, 1, 1, 2], [0], [0]>} : vector<2x8x8xbf16>, vector<2x8x8xbf16>, vector<2x8x8xf32> -> vector<2x8x8xf32>
      "tpu.trace_stop"() : () -> ()
      %88 = vector.broadcast %84 : vector<2x8x1xf32> to vector<2x8x8xf32>
      %89 = arith.mulf %87, %88 : vector<2x8x8xf32>
      %90 = vector.extract_strided_slice %62 {offsets = [0, 0, 8], sizes = [2, 8, 8], strides = [1, 1, 1]} : vector<2x8x32xf32> to vector<2x8x8xf32>
      %91 = vector.extract_strided_slice %64 {offsets = [0, 0, 8], sizes = [2, 8, 8], strides = [1, 1, 1]} : vector<2x8x32xf32> to vector<2x8x8xf32>
      %92 = vector.extract_strided_slice %66 {offsets = [0, 0, 8], sizes = [2, 8, 8], strides = [1, 1, 1]} : vector<2x8x32xf32> to vector<2x8x8xf32>
      %93 = arith.truncf %90 : vector<2x8x8xf32> to vector<2x8x8xbf16>
      %94 = arith.truncf %91 : vector<2x8x8xf32> to vector<2x8x8xbf16>
      "tpu.trace_start"() <{level = 10 : i32, message = "bqd,bkd->bqk"}> : () -> ()
      %cst_32 = arith.constant dense<0.000000e+00> : vector<2x8x8xf32>
      %95 = tpu.matmul %93, %94, %cst_32 {dimension_numbers = #tpu.dot_dimension_numbers<[2], [2], [1], [1], [0, 0, 0, 1, 1, 1], [0], [0]>} : vector<2x8x8xbf16>, vector<2x8x8xbf16>, vector<2x8x8xf32> -> vector<2x8x8xf32>
      "tpu.trace_stop"() : () -> ()
      %cst_33 = arith.constant 0.353553385 : f32
      %96 = vector.broadcast %cst_33 : f32 to vector<2x8x8xf32>
      %97 = arith.mulf %95, %96 : vector<2x8x8xf32>
      %98 = vector.broadcast %26 : vector<1x8x8xf32> to vector<2x8x8xf32>
      %99 = arith.addf %97, %98 : vector<2x8x8xf32>
      %cst_34 = arith.constant dense<0xFF800000> : vector<2x8xf32>
      %100 = vector.multi_reduction <maximumf>, %99, %cst_34 [2] : vector<2x8x8xf32> to vector<2x8xf32>
      %101 = vector.shape_cast %100 : vector<2x8xf32> to vector<2x8x1xf32>
      %102 = vector.broadcast %101 : vector<2x8x1xf32> to vector<2x8x8xf32>
      %103 = arith.subf %99, %102 : vector<2x8x8xf32>
      %104 = math.exp %103 : vector<2x8x8xf32>
      %cst_35 = arith.constant dense<0.000000e+00> : vector<2x8xf32>
      %105 = vector.multi_reduction <add>, %104, %cst_35 [2] : vector<2x8x8xf32> to vector<2x8xf32>
      %106 = vector.shape_cast %105 : vector<2x8xf32> to vector<2x8x1xf32>
      %107 = tpu.reciprocal %106 {approx = true} : vector<2x8x1xf32> -> vector<2x8x1xf32>
      %108 = arith.truncf %104 : vector<2x8x8xf32> to vector<2x8x8xbf16>
      %109 = arith.truncf %92 : vector<2x8x8xf32> to vector<2x8x8xbf16>
      "tpu.trace_start"() <{level = 10 : i32, message = "bqk,bkd->bqd"}> : () -> ()
      %cst_36 = arith.constant dense<0.000000e+00> : vector<2x8x8xf32>
      %110 = tpu.matmul %108, %109, %cst_36 {dimension_numbers = #tpu.dot_dimension_numbers<[2], [1], [1], [2], [0, 0, 0, 1, 1, 2], [0], [0]>} : vector<2x8x8xbf16>, vector<2x8x8xbf16>, vector<2x8x8xf32> -> vector<2x8x8xf32>
      "tpu.trace_stop"() : () -> ()
      %111 = vector.broadcast %107 : vector<2x8x1xf32> to vector<2x8x8xf32>
      %112 = arith.mulf %110, %111 : vector<2x8x8xf32>
      %113 = vector.extract_strided_slice %62 {offsets = [0, 0, 16], sizes = [2, 8, 8], strides = [1, 1, 1]} : vector<2x8x32xf32> to vector<2x8x8xf32>
      %114 = vector.extract_strided_slice %64 {offsets = [0, 0, 16], sizes = [2, 8, 8], strides = [1, 1, 1]} : vector<2x8x32xf32> to vector<2x8x8xf32>
      %115 = vector.extract_strided_slice %66 {offsets = [0, 0, 16], sizes = [2, 8, 8], strides = [1, 1, 1]} : vector<2x8x32xf32> to vector<2x8x8xf32>
      %116 = arith.truncf %113 : vector<2x8x8xf32> to vector<2x8x8xbf16>
      %117 = arith.truncf %114 : vector<2x8x8xf32> to vector<2x8x8xbf16>
      "tpu.trace_start"() <{level = 10 : i32, message = "bqd,bkd->bqk"}> : () -> ()
      %cst_37 = arith.constant dense<0.000000e+00> : vector<2x8x8xf32>
      %118 = tpu.matmul %116, %117, %cst_37 {dimension_numbers = #tpu.dot_dimension_numbers<[2], [2], [1], [1], [0, 0, 0, 1, 1, 1], [0], [0]>} : vector<2x8x8xbf16>, vector<2x8x8xbf16>, vector<2x8x8xf32> -> vector<2x8x8xf32>
      "tpu.trace_stop"() : () -> ()
      %cst_38 = arith.constant 0.353553385 : f32
      %119 = vector.broadcast %cst_38 : f32 to vector<2x8x8xf32>
      %120 = arith.mulf %118, %119 : vector<2x8x8xf32>
      %121 = vector.broadcast %26 : vector<1x8x8xf32> to vector<2x8x8xf32>
      %122 = arith.addf %120, %121 : vector<2x8x8xf32>
      %cst_39 = arith.constant dense<0xFF800000> : vector<2x8xf32>
      %123 = vector.multi_reduction <maximumf>, %122, %cst_39 [2] : vector<2x8x8xf32> to vector<2x8xf32>
      %124 = vector.shape_cast %123 : vector<2x8xf32> to vector<2x8x1xf32>
      %125 = vector.broadcast %124 : vector<2x8x1xf32> to vector<2x8x8xf32>
      %126 = arith.subf %122, %125 : vector<2x8x8xf32>
      %127 = math.exp %126 : vector<2x8x8xf32>
      %cst_40 = arith.constant dense<0.000000e+00> : vector<2x8xf32>
      %128 = vector.multi_reduction <add>, %127, %cst_40 [2] : vector<2x8x8xf32> to vector<2x8xf32>
      %129 = vector.shape_cast %128 : vector<2x8xf32> to vector<2x8x1xf32>
      %130 = tpu.reciprocal %129 {approx = true} : vector<2x8x1xf32> -> vector<2x8x1xf32>
      %131 = arith.truncf %127 : vector<2x8x8xf32> to vector<2x8x8xbf16>
      %132 = arith.truncf %115 : vector<2x8x8xf32> to vector<2x8x8xbf16>
      "tpu.trace_start"() <{level = 10 : i32, message = "bqk,bkd->bqd"}> : () -> ()
      %cst_41 = arith.constant dense<0.000000e+00> : vector<2x8x8xf32>
      %133 = tpu.matmul %131, %132, %cst_41 {dimension_numbers = #tpu.dot_dimension_numbers<[2], [1], [1], [2], [0, 0, 0, 1, 1, 2], [0], [0]>} : vector<2x8x8xbf16>, vector<2x8x8xbf16>, vector<2x8x8xf32> -> vector<2x8x8xf32>
      "tpu.trace_stop"() : () -> ()
      %134 = vector.broadcast %130 : vector<2x8x1xf32> to vector<2x8x8xf32>
      %135 = arith.mulf %133, %134 : vector<2x8x8xf32>
      %136 = vector.extract_strided_slice %62 {offsets = [0, 0, 24], sizes = [2, 8, 8], strides = [1, 1, 1]} : vector<2x8x32xf32> to vector<2x8x8xf32>
      %137 = vector.extract_strided_slice %64 {offsets = [0, 0, 24], sizes = [2, 8, 8], strides = [1, 1, 1]} : vector<2x8x32xf32> to vector<2x8x8xf32>
      %138 = vector.extract_strided_slice %66 {offsets = [0, 0, 24], sizes = [2, 8, 8], strides = [1, 1, 1]} : vector<2x8x32xf32> to vector<2x8x8xf32>
      %139 = arith.truncf %136 : vector<2x8x8xf32> to vector<2x8x8xbf16>
      %140 = arith.truncf %137 : vector<2x8x8xf32> to vector<2x8x8xbf16>
      "tpu.trace_start"() <{level = 10 : i32, message = "bqd,bkd->bqk"}> : () -> ()
      %cst_42 = arith.constant dense<0.000000e+00> : vector<2x8x8xf32>
      %141 = tpu.matmul %139, %140, %cst_42 {dimension_numbers = #tpu.dot_dimension_numbers<[2], [2], [1], [1], [0, 0, 0, 1, 1, 1], [0], [0]>} : vector<2x8x8xbf16>, vector<2x8x8xbf16>, vector<2x8x8xf32> -> vector<2x8x8xf32>
      "tpu.trace_stop"() : () -> ()
      %cst_43 = arith.constant 0.353553385 : f32
      %142 = vector.broadcast %cst_43 : f32 to vector<2x8x8xf32>
      %143 = arith.mulf %141, %142 : vector<2x8x8xf32>
      %144 = vector.broadcast %26 : vector<1x8x8xf32> to vector<2x8x8xf32>
      %145 = arith.addf %143, %144 : vector<2x8x8xf32>
      %cst_44 = arith.constant dense<0xFF800000> : vector<2x8xf32>
      %146 = vector.multi_reduction <maximumf>, %145, %cst_44 [2] : vector<2x8x8xf32> to vector<2x8xf32>
      %147 = vector.shape_cast %146 : vector<2x8xf32> to vector<2x8x1xf32>
      %148 = vector.broadcast %147 : vector<2x8x1xf32> to vector<2x8x8xf32>
      %149 = arith.subf %145, %148 : vector<2x8x8xf32>
      %150 = math.exp %149 : vector<2x8x8xf32>
      %cst_45 = arith.constant dense<0.000000e+00> : vector<2x8xf32>
      %151 = vector.multi_reduction <add>, %150, %cst_45 [2] : vector<2x8x8xf32> to vector<2x8xf32>
      %152 = vector.shape_cast %151 : vector<2x8xf32> to vector<2x8x1xf32>
      %153 = tpu.reciprocal %152 {approx = true} : vector<2x8x1xf32> -> vector<2x8x1xf32>
      %154 = arith.truncf %150 : vector<2x8x8xf32> to vector<2x8x8xbf16>
      %155 = arith.truncf %138 : vector<2x8x8xf32> to vector<2x8x8xbf16>
      "tpu.trace_start"() <{level = 10 : i32, message = "bqk,bkd->bqd"}> : () -> ()
      %cst_46 = arith.constant dense<0.000000e+00> : vector<2x8x8xf32>
      %156 = tpu.matmul %154, %155, %cst_46 {dimension_numbers = #tpu.dot_dimension_numbers<[2], [1], [1], [2], [0, 0, 0, 1, 1, 2], [0], [0]>} : vector<2x8x8xbf16>, vector<2x8x8xbf16>, vector<2x8x8xf32> -> vector<2x8x8xf32>
      "tpu.trace_stop"() : () -> ()
      %157 = vector.broadcast %153 : vector<2x8x1xf32> to vector<2x8x8xf32>
      %158 = arith.mulf %156, %157 : vector<2x8x8xf32>
      %159 = tpu.concatenate %89, %112, %135, %158 in 2 : vector<2x8x8xf32>, vector<2x8x8xf32>, vector<2x8x8xf32>, vector<2x8x8xf32> -> vector<2x8x32xf32>
      %160 = vector.shape_cast %159 : vector<2x8x32xf32> to vector<16x32xf32>
      %c0_47 = arith.constant 0 : index
      %c0_48 = arith.constant 0 : index
      %c0_49 = arith.constant 0 : index
      %161 = vector.load %arg17[%c0_47, %c0_48, %c0_49] : memref<2x32x32xbf16, #tpu.memory_space<vmem>>, vector<1x32x32xbf16>
      %162 = vector.shape_cast %161 : vector<1x32x32xbf16> to vector<32x32xbf16>
      %163 = arith.truncf %160 : vector<16x32xf32> to vector<16x32xbf16>
      %cst_50 = arith.constant dense<0.000000e+00> : vector<16x32xf32>
      %164 = tpu.matmul %163, %162, %cst_50 {dimension_numbers = #tpu.dot_dimension_numbers<[1], [0], [0], [1], [0, 0, 1, 1], [], []>} : vector<16x32xbf16>, vector<32x32xbf16>, vector<16x32xf32> -> vector<16x32xf32>
      %165 = arith.addf %19, %164 : vector<16x32xf32>
      %c0_51 = arith.constant 0 : index
      %c0_52 = arith.constant 0 : index
      %c0_53 = arith.constant 0 : index
      %166 = vector.load %arg18[%c0_51, %c0_52, %c0_53] : memref<2x1x32xf32, #tpu.memory_space<vmem>>, vector<1x1x32xf32>
      %167 = vector.shape_cast %166 : vector<1x1x32xf32> to vector<1x32xf32>
      %168 = vector.broadcast %167 : vector<1x32xf32> to vector<16x32xf32>
      %169 = arith.addf %165, %168 : vector<16x32xf32>
      %c0_54 = arith.constant 0 : index
      %c0_55 = arith.constant 0 : index
      %c0_56 = arith.constant 0 : index
      %170 = vector.load %arg19[%c0_54, %c0_55, %c0_56] : memref<2x1x32xf32, #tpu.memory_space<vmem>>, vector<1x1x32xf32>
      %171 = vector.shape_cast %170 : vector<1x1x32xf32> to vector<1x32xf32>
      %c0_57 = arith.constant 0 : index
      %c0_58 = arith.constant 0 : index
      %c0_59 = arith.constant 0 : index
      %172 = vector.load %arg20[%c0_57, %c0_58, %c0_59] : memref<2x1x32xf32, #tpu.memory_space<vmem>>, vector<1x1x32xf32>
      %173 = vector.shape_cast %172 : vector<1x1x32xf32> to vector<1x32xf32>
      %cst_60 = arith.constant dense<0.000000e+00> : vector<16xf32>
      %174 = vector.multi_reduction <add>, %169, %cst_60 [1] : vector<16x32xf32> to vector<16xf32>
      %175 = vector.shape_cast %174 : vector<16xf32> to vector<16x1xf32>
      %cst_61 = arith.constant 3.200000e+01 : f32
      %176 = vector.broadcast %cst_61 : f32 to vector<16x1xf32>
      %177 = arith.divf %175, %176 : vector<16x1xf32>
      %178 = vector.broadcast %177 : vector<16x1xf32> to vector<16x32xf32>
      %179 = arith.subf %169, %178 : vector<16x32xf32>
      %180 = arith.mulf %179, %179 : vector<16x32xf32>
      %cst_62 = arith.constant dense<0.000000e+00> : vector<16xf32>
      %181 = vector.multi_reduction <add>, %180, %cst_62 [1] : vector<16x32xf32> to vector<16xf32>
      %182 = vector.shape_cast %181 : vector<16xf32> to vector<16x1xf32>
      %cst_63 = arith.constant 3.200000e+01 : f32
      %183 = vector.broadcast %cst_63 : f32 to vector<16x1xf32>
      %184 = arith.divf %182, %183 : vector<16x1xf32>
      %185 = vector.broadcast %177 : vector<16x1xf32> to vector<16x32xf32>
      %186 = arith.subf %169, %185 : vector<16x32xf32>
      %cst_64 = arith.constant 9.99999974E-6 : f32
      %187 = vector.broadcast %cst_64 : f32 to vector<16x1xf32>
      %188 = arith.addf %184, %187 : vector<16x1xf32>
      %189 = math.rsqrt %188 : vector<16x1xf32>
      %190 = vector.broadcast %189 : vector<16x1xf32> to vector<16x32xf32>
      %191 = arith.mulf %186, %190 : vector<16x32xf32>
      %192 = vector.broadcast %171 : vector<1x32xf32> to vector<16x32xf32>
      %193 = arith.mulf %191, %192 : vector<16x32xf32>
      %194 = vector.broadcast %173 : vector<1x32xf32> to vector<16x32xf32>
      %195 = arith.addf %193, %194 : vector<16x32xf32>
      %c0_65 = arith.constant 0 : index
      %c0_66 = arith.constant 0 : index
      %c0_67 = arith.constant 0 : index
      %196 = vector.load %arg21[%c0_65, %c0_66, %c0_67] : memref<2x32x128xbf16, #tpu.memory_space<vmem>>, vector<1x32x128xbf16>
      %197 = vector.shape_cast %196 : vector<1x32x128xbf16> to vector<32x128xbf16>
      %198 = arith.truncf %195 : vector<16x32xf32> to vector<16x32xbf16>
      %cst_68 = arith.constant dense<0.000000e+00> : vector<16x128xf32>
      %199 = tpu.matmul %198, %197, %cst_68 {dimension_numbers = #tpu.dot_dimension_numbers<[1], [0], [0], [1], [0, 0, 1, 1], [], []>} : vector<16x32xbf16>, vector<32x128xbf16>, vector<16x128xf32> -> vector<16x128xf32>
      %c0_69 = arith.constant 0 : index
      %c0_70 = arith.constant 0 : index
      %c0_71 = arith.constant 0 : index
      %200 = vector.load %arg22[%c0_69, %c0_70, %c0_71] : memref<2x1x128xf32, #tpu.memory_space<vmem>>, vector<1x1x128xf32>
      %201 = vector.shape_cast %200 : vector<1x1x128xf32> to vector<1x128xf32>
      %202 = vector.broadcast %201 : vector<1x128xf32> to vector<16x128xf32>
      %203 = arith.addf %199, %202 : vector<16x128xf32>
      %cst_72 = arith.constant 1.702000e+00 : f32
      %204 = vector.broadcast %cst_72 : f32 to vector<16x128xf32>
      %205 = arith.mulf %204, %203 : vector<16x128xf32>
      %206 = arith.negf %205 : vector<16x128xf32>
      %207 = math.exp %206 : vector<16x128xf32>
      %cst_73 = arith.constant 1.000000e+00 : f32
      %208 = vector.broadcast %cst_73 : f32 to vector<16x128xf32>
      %209 = arith.addf %208, %207 : vector<16x128xf32>
      %210 = arith.divf %208, %209 : vector<16x128xf32>
      %211 = arith.mulf %203, %210 : vector<16x128xf32>
      %c0_74 = arith.constant 0 : index
      %c0_75 = arith.constant 0 : index
      %c0_76 = arith.constant 0 : index
      %212 = vector.load %arg23[%c0_74, %c0_75, %c0_76] : memref<2x128x32xbf16, #tpu.memory_space<vmem>>, vector<1x128x32xbf16>
      %213 = vector.shape_cast %212 : vector<1x128x32xbf16> to vector<128x32xbf16>
      %214 = arith.truncf %211 : vector<16x128xf32> to vector<16x128xbf16>
      %cst_77 = arith.constant dense<0.000000e+00> : vector<16x32xf32>
      %215 = tpu.matmul %214, %213, %cst_77 {dimension_numbers = #tpu.dot_dimension_numbers<[1], [0], [0], [1], [0, 0, 1, 1], [], []>} : vector<16x128xbf16>, vector<128x32xbf16>, vector<16x32xf32> -> vector<16x32xf32>
      %216 = arith.addf %169, %215 : vector<16x32xf32>
      %c0_78 = arith.constant 0 : index
      %c0_79 = arith.constant 0 : index
      %c0_80 = arith.constant 0 : index
      %217 = vector.load %arg24[%c0_78, %c0_79, %c0_80] : memref<2x1x32xf32, #tpu.memory_space<vmem>>, vector<1x1x32xf32>
      %218 = vector.shape_cast %217 : vector<1x1x32xf32> to vector<1x32xf32>
      %219 = vector.broadcast %218 : vector<1x32xf32> to vector<16x32xf32>
      %220 = arith.addf %216, %219 : vector<16x32xf32>
      %c1 = arith.constant 1 : index
      %c0_81 = arith.constant 0 : index
      %c0_82 = arith.constant 0 : index
      %221 = vector.load %arg13[%c1, %c0_81, %c0_82] : memref<2x1x32xf32, #tpu.memory_space<vmem>>, vector<1x1x32xf32>
      %222 = vector.shape_cast %221 : vector<1x1x32xf32> to vector<1x32xf32>
      %c1_83 = arith.constant 1 : index
      %c0_84 = arith.constant 0 : index
      %c0_85 = arith.constant 0 : index
      %223 = vector.load %arg14[%c1_83, %c0_84, %c0_85] : memref<2x1x32xf32, #tpu.memory_space<vmem>>, vector<1x1x32xf32>
      %224 = vector.shape_cast %223 : vector<1x1x32xf32> to vector<1x32xf32>
      %cst_86 = arith.constant dense<0.000000e+00> : vector<16xf32>
      %225 = vector.multi_reduction <add>, %220, %cst_86 [1] : vector<16x32xf32> to vector<16xf32>
      %226 = vector.shape_cast %225 : vector<16xf32> to vector<16x1xf32>
      %cst_87 = arith.constant 3.200000e+01 : f32
      %227 = vector.broadcast %cst_87 : f32 to vector<16x1xf32>
      %228 = arith.divf %226, %227 : vector<16x1xf32>
      %229 = vector.broadcast %228 : vector<16x1xf32> to vector<16x32xf32>
      %230 = arith.subf %220, %229 : vector<16x32xf32>
      %231 = arith.mulf %230, %230 : vector<16x32xf32>
      %cst_88 = arith.constant dense<0.000000e+00> : vector<16xf32>
      %232 = vector.multi_reduction <add>, %231, %cst_88 [1] : vector<16x32xf32> to vector<16xf32>
      %233 = vector.shape_cast %232 : vector<16xf32> to vector<16x1xf32>
      %cst_89 = arith.constant 3.200000e+01 : f32
      %234 = vector.broadcast %cst_89 : f32 to vector<16x1xf32>
      %235 = arith.divf %233, %234 : vector<16x1xf32>
      %236 = vector.broadcast %228 : vector<16x1xf32> to vector<16x32xf32>
      %237 = arith.subf %220, %236 : vector<16x32xf32>
      %cst_90 = arith.constant 9.99999974E-6 : f32
      %238 = vector.broadcast %cst_90 : f32 to vector<16x1xf32>
      %239 = arith.addf %235, %238 : vector<16x1xf32>
      %240 = math.rsqrt %239 : vector<16x1xf32>
      %241 = vector.broadcast %240 : vector<16x1xf32> to vector<16x32xf32>
      %242 = arith.mulf %237, %241 : vector<16x32xf32>
      %243 = vector.broadcast %222 : vector<1x32xf32> to vector<16x32xf32>
      %244 = arith.mulf %242, %243 : vector<16x32xf32>
      %245 = vector.broadcast %224 : vector<1x32xf32> to vector<16x32xf32>
      %246 = arith.addf %244, %245 : vector<16x32xf32>
      %c1_91 = arith.constant 1 : index
      %c0_92 = arith.constant 0 : index
      %c0_93 = arith.constant 0 : index
      %247 = vector.load %arg15[%c1_91, %c0_92, %c0_93] : memref<2x32x96xbf16, #tpu.memory_space<vmem>>, vector<1x32x96xbf16>
      %248 = vector.shape_cast %247 : vector<1x32x96xbf16> to vector<32x96xbf16>
      %249 = arith.truncf %246 : vector<16x32xf32> to vector<16x32xbf16>
      %cst_94 = arith.constant dense<0.000000e+00> : vector<16x96xf32>
      %250 = tpu.matmul %249, %248, %cst_94 {dimension_numbers = #tpu.dot_dimension_numbers<[1], [0], [0], [1], [0, 0, 1, 1], [], []>} : vector<16x32xbf16>, vector<32x96xbf16>, vector<16x96xf32> -> vector<16x96xf32>
      %c1_95 = arith.constant 1 : index
      %c0_96 = arith.constant 0 : index
      %c0_97 = arith.constant 0 : index
      %251 = vector.load %arg16[%c1_95, %c0_96, %c0_97] : memref<2x1x96xf32, #tpu.memory_space<vmem>>, vector<1x1x96xf32>
      %252 = vector.shape_cast %251 : vector<1x1x96xf32> to vector<1x96xf32>
      %253 = vector.broadcast %252 : vector<1x96xf32> to vector<16x96xf32>
      %254 = arith.addf %250, %253 : vector<16x96xf32>
      %255 = vector.extract_strided_slice %254 {offsets = [0, 0], sizes = [16, 32], strides = [1, 1]} : vector<16x96xf32> to vector<16x32xf32>
      %256 = vector.shape_cast %255 : vector<16x32xf32> to vector<2x8x32xf32>
      %257 = vector.extract_strided_slice %254 {offsets = [0, 32], sizes = [16, 32], strides = [1, 1]} : vector<16x96xf32> to vector<16x32xf32>
      %258 = vector.shape_cast %257 : vector<16x32xf32> to vector<2x8x32xf32>
      %259 = vector.extract_strided_slice %254 {offsets = [0, 64], sizes = [16, 32], strides = [1, 1]} : vector<16x96xf32> to vector<16x32xf32>
      %260 = vector.shape_cast %259 : vector<16x32xf32> to vector<2x8x32xf32>
      %261 = vector.extract_strided_slice %256 {offsets = [0, 0, 0], sizes = [2, 8, 8], strides = [1, 1, 1]} : vector<2x8x32xf32> to vector<2x8x8xf32>
      %262 = vector.extract_strided_slice %258 {offsets = [0, 0, 0], sizes = [2, 8, 8], strides = [1, 1, 1]} : vector<2x8x32xf32> to vector<2x8x8xf32>
      %263 = vector.extract_strided_slice %260 {offsets = [0, 0, 0], sizes = [2, 8, 8], strides = [1, 1, 1]} : vector<2x8x32xf32> to vector<2x8x8xf32>
      %264 = arith.truncf %261 : vector<2x8x8xf32> to vector<2x8x8xbf16>
      %265 = arith.truncf %262 : vector<2x8x8xf32> to vector<2x8x8xbf16>
      "tpu.trace_start"() <{level = 10 : i32, message = "bqd,bkd->bqk"}> : () -> ()
      %cst_98 = arith.constant dense<0.000000e+00> : vector<2x8x8xf32>
      %266 = tpu.matmul %264, %265, %cst_98 {dimension_numbers = #tpu.dot_dimension_numbers<[2], [2], [1], [1], [0, 0, 0, 1, 1, 1], [0], [0]>} : vector<2x8x8xbf16>, vector<2x8x8xbf16>, vector<2x8x8xf32> -> vector<2x8x8xf32>
      "tpu.trace_stop"() : () -> ()
      %cst_99 = arith.constant 0.353553385 : f32
      %267 = vector.broadcast %cst_99 : f32 to vector<2x8x8xf32>
      %268 = arith.mulf %266, %267 : vector<2x8x8xf32>
      %269 = vector.broadcast %26 : vector<1x8x8xf32> to vector<2x8x8xf32>
      %270 = arith.addf %268, %269 : vector<2x8x8xf32>
      %cst_100 = arith.constant dense<0xFF800000> : vector<2x8xf32>
      %271 = vector.multi_reduction <maximumf>, %270, %cst_100 [2] : vector<2x8x8xf32> to vector<2x8xf32>
      %272 = vector.shape_cast %271 : vector<2x8xf32> to vector<2x8x1xf32>
      %273 = vector.broadcast %272 : vector<2x8x1xf32> to vector<2x8x8xf32>
      %274 = arith.subf %270, %273 : vector<2x8x8xf32>
      %275 = math.exp %274 : vector<2x8x8xf32>
      %cst_101 = arith.constant dense<0.000000e+00> : vector<2x8xf32>
      %276 = vector.multi_reduction <add>, %275, %cst_101 [2] : vector<2x8x8xf32> to vector<2x8xf32>
      %277 = vector.shape_cast %276 : vector<2x8xf32> to vector<2x8x1xf32>
      %278 = tpu.reciprocal %277 {approx = true} : vector<2x8x1xf32> -> vector<2x8x1xf32>
      %279 = arith.truncf %275 : vector<2x8x8xf32> to vector<2x8x8xbf16>
      %280 = arith.truncf %263 : vector<2x8x8xf32> to vector<2x8x8xbf16>
      "tpu.trace_start"() <{level = 10 : i32, message = "bqk,bkd->bqd"}> : () -> ()
      %cst_102 = arith.constant dense<0.000000e+00> : vector<2x8x8xf32>
      %281 = tpu.matmul %279, %280, %cst_102 {dimension_numbers = #tpu.dot_dimension_numbers<[2], [1], [1], [2], [0, 0, 0, 1, 1, 2], [0], [0]>} : vector<2x8x8xbf16>, vector<2x8x8xbf16>, vector<2x8x8xf32> -> vector<2x8x8xf32>
      "tpu.trace_stop"() : () -> ()
      %282 = vector.broadcast %278 : vector<2x8x1xf32> to vector<2x8x8xf32>
      %283 = arith.mulf %281, %282 : vector<2x8x8xf32>
      %284 = vector.extract_strided_slice %256 {offsets = [0, 0, 8], sizes = [2, 8, 8], strides = [1, 1, 1]} : vector<2x8x32xf32> to vector<2x8x8xf32>
      %285 = vector.extract_strided_slice %258 {offsets = [0, 0, 8], sizes = [2, 8, 8], strides = [1, 1, 1]} : vector<2x8x32xf32> to vector<2x8x8xf32>
      %286 = vector.extract_strided_slice %260 {offsets = [0, 0, 8], sizes = [2, 8, 8], strides = [1, 1, 1]} : vector<2x8x32xf32> to vector<2x8x8xf32>
      %287 = arith.truncf %284 : vector<2x8x8xf32> to vector<2x8x8xbf16>
      %288 = arith.truncf %285 : vector<2x8x8xf32> to vector<2x8x8xbf16>
      "tpu.trace_start"() <{level = 10 : i32, message = "bqd,bkd->bqk"}> : () -> ()
      %cst_103 = arith.constant dense<0.000000e+00> : vector<2x8x8xf32>
      %289 = tpu.matmul %287, %288, %cst_103 {dimension_numbers = #tpu.dot_dimension_numbers<[2], [2], [1], [1], [0, 0, 0, 1, 1, 1], [0], [0]>} : vector<2x8x8xbf16>, vector<2x8x8xbf16>, vector<2x8x8xf32> -> vector<2x8x8xf32>
      "tpu.trace_stop"() : () -> ()
      %cst_104 = arith.constant 0.353553385 : f32
      %290 = vector.broadcast %cst_104 : f32 to vector<2x8x8xf32>
      %291 = arith.mulf %289, %290 : vector<2x8x8xf32>
      %292 = vector.broadcast %26 : vector<1x8x8xf32> to vector<2x8x8xf32>
      %293 = arith.addf %291, %292 : vector<2x8x8xf32>
      %cst_105 = arith.constant dense<0xFF800000> : vector<2x8xf32>
      %294 = vector.multi_reduction <maximumf>, %293, %cst_105 [2] : vector<2x8x8xf32> to vector<2x8xf32>
      %295 = vector.shape_cast %294 : vector<2x8xf32> to vector<2x8x1xf32>
      %296 = vector.broadcast %295 : vector<2x8x1xf32> to vector<2x8x8xf32>
      %297 = arith.subf %293, %296 : vector<2x8x8xf32>
      %298 = math.exp %297 : vector<2x8x8xf32>
      %cst_106 = arith.constant dense<0.000000e+00> : vector<2x8xf32>
      %299 = vector.multi_reduction <add>, %298, %cst_106 [2] : vector<2x8x8xf32> to vector<2x8xf32>
      %300 = vector.shape_cast %299 : vector<2x8xf32> to vector<2x8x1xf32>
      %301 = tpu.reciprocal %300 {approx = true} : vector<2x8x1xf32> -> vector<2x8x1xf32>
      %302 = arith.truncf %298 : vector<2x8x8xf32> to vector<2x8x8xbf16>
      %303 = arith.truncf %286 : vector<2x8x8xf32> to vector<2x8x8xbf16>
      "tpu.trace_start"() <{level = 10 : i32, message = "bqk,bkd->bqd"}> : () -> ()
      %cst_107 = arith.constant dense<0.000000e+00> : vector<2x8x8xf32>
      %304 = tpu.matmul %302, %303, %cst_107 {dimension_numbers = #tpu.dot_dimension_numbers<[2], [1], [1], [2], [0, 0, 0, 1, 1, 2], [0], [0]>} : vector<2x8x8xbf16>, vector<2x8x8xbf16>, vector<2x8x8xf32> -> vector<2x8x8xf32>
      "tpu.trace_stop"() : () -> ()
      %305 = vector.broadcast %301 : vector<2x8x1xf32> to vector<2x8x8xf32>
      %306 = arith.mulf %304, %305 : vector<2x8x8xf32>
      %307 = vector.extract_strided_slice %256 {offsets = [0, 0, 16], sizes = [2, 8, 8], strides = [1, 1, 1]} : vector<2x8x32xf32> to vector<2x8x8xf32>
      %308 = vector.extract_strided_slice %258 {offsets = [0, 0, 16], sizes = [2, 8, 8], strides = [1, 1, 1]} : vector<2x8x32xf32> to vector<2x8x8xf32>
      %309 = vector.extract_strided_slice %260 {offsets = [0, 0, 16], sizes = [2, 8, 8], strides = [1, 1, 1]} : vector<2x8x32xf32> to vector<2x8x8xf32>
      %310 = arith.truncf %307 : vector<2x8x8xf32> to vector<2x8x8xbf16>
      %311 = arith.truncf %308 : vector<2x8x8xf32> to vector<2x8x8xbf16>
      "tpu.trace_start"() <{level = 10 : i32, message = "bqd,bkd->bqk"}> : () -> ()
      %cst_108 = arith.constant dense<0.000000e+00> : vector<2x8x8xf32>
      %312 = tpu.matmul %310, %311, %cst_108 {dimension_numbers = #tpu.dot_dimension_numbers<[2], [2], [1], [1], [0, 0, 0, 1, 1, 1], [0], [0]>} : vector<2x8x8xbf16>, vector<2x8x8xbf16>, vector<2x8x8xf32> -> vector<2x8x8xf32>
      "tpu.trace_stop"() : () -> ()
      %cst_109 = arith.constant 0.353553385 : f32
      %313 = vector.broadcast %cst_109 : f32 to vector<2x8x8xf32>
      %314 = arith.mulf %312, %313 : vector<2x8x8xf32>
      %315 = vector.broadcast %26 : vector<1x8x8xf32> to vector<2x8x8xf32>
      %316 = arith.addf %314, %315 : vector<2x8x8xf32>
      %cst_110 = arith.constant dense<0xFF800000> : vector<2x8xf32>
      %317 = vector.multi_reduction <maximumf>, %316, %cst_110 [2] : vector<2x8x8xf32> to vector<2x8xf32>
      %318 = vector.shape_cast %317 : vector<2x8xf32> to vector<2x8x1xf32>
      %319 = vector.broadcast %318 : vector<2x8x1xf32> to vector<2x8x8xf32>
      %320 = arith.subf %316, %319 : vector<2x8x8xf32>
      %321 = math.exp %320 : vector<2x8x8xf32>
      %cst_111 = arith.constant dense<0.000000e+00> : vector<2x8xf32>
      %322 = vector.multi_reduction <add>, %321, %cst_111 [2] : vector<2x8x8xf32> to vector<2x8xf32>
      %323 = vector.shape_cast %322 : vector<2x8xf32> to vector<2x8x1xf32>
      %324 = tpu.reciprocal %323 {approx = true} : vector<2x8x1xf32> -> vector<2x8x1xf32>
      %325 = arith.truncf %321 : vector<2x8x8xf32> to vector<2x8x8xbf16>
      %326 = arith.truncf %309 : vector<2x8x8xf32> to vector<2x8x8xbf16>
      "tpu.trace_start"() <{level = 10 : i32, message = "bqk,bkd->bqd"}> : () -> ()
      %cst_112 = arith.constant dense<0.000000e+00> : vector<2x8x8xf32>
      %327 = tpu.matmul %325, %326, %cst_112 {dimension_numbers = #tpu.dot_dimension_numbers<[2], [1], [1], [2], [0, 0, 0, 1, 1, 2], [0], [0]>} : vector<2x8x8xbf16>, vector<2x8x8xbf16>, vector<2x8x8xf32> -> vector<2x8x8xf32>
      "tpu.trace_stop"() : () -> ()
      %328 = vector.broadcast %324 : vector<2x8x1xf32> to vector<2x8x8xf32>
      %329 = arith.mulf %327, %328 : vector<2x8x8xf32>
      %330 = vector.extract_strided_slice %256 {offsets = [0, 0, 24], sizes = [2, 8, 8], strides = [1, 1, 1]} : vector<2x8x32xf32> to vector<2x8x8xf32>
      %331 = vector.extract_strided_slice %258 {offsets = [0, 0, 24], sizes = [2, 8, 8], strides = [1, 1, 1]} : vector<2x8x32xf32> to vector<2x8x8xf32>
      %332 = vector.extract_strided_slice %260 {offsets = [0, 0, 24], sizes = [2, 8, 8], strides = [1, 1, 1]} : vector<2x8x32xf32> to vector<2x8x8xf32>
      %333 = arith.truncf %330 : vector<2x8x8xf32> to vector<2x8x8xbf16>
      %334 = arith.truncf %331 : vector<2x8x8xf32> to vector<2x8x8xbf16>
      "tpu.trace_start"() <{level = 10 : i32, message = "bqd,bkd->bqk"}> : () -> ()
      %cst_113 = arith.constant dense<0.000000e+00> : vector<2x8x8xf32>
      %335 = tpu.matmul %333, %334, %cst_113 {dimension_numbers = #tpu.dot_dimension_numbers<[2], [2], [1], [1], [0, 0, 0, 1, 1, 1], [0], [0]>} : vector<2x8x8xbf16>, vector<2x8x8xbf16>, vector<2x8x8xf32> -> vector<2x8x8xf32>
      "tpu.trace_stop"() : () -> ()
      %cst_114 = arith.constant 0.353553385 : f32
      %336 = vector.broadcast %cst_114 : f32 to vector<2x8x8xf32>
      %337 = arith.mulf %335, %336 : vector<2x8x8xf32>
      %338 = vector.broadcast %26 : vector<1x8x8xf32> to vector<2x8x8xf32>
      %339 = arith.addf %337, %338 : vector<2x8x8xf32>
      %cst_115 = arith.constant dense<0xFF800000> : vector<2x8xf32>
      %340 = vector.multi_reduction <maximumf>, %339, %cst_115 [2] : vector<2x8x8xf32> to vector<2x8xf32>
      %341 = vector.shape_cast %340 : vector<2x8xf32> to vector<2x8x1xf32>
      %342 = vector.broadcast %341 : vector<2x8x1xf32> to vector<2x8x8xf32>
      %343 = arith.subf %339, %342 : vector<2x8x8xf32>
      %344 = math.exp %343 : vector<2x8x8xf32>
      %cst_116 = arith.constant dense<0.000000e+00> : vector<2x8xf32>
      %345 = vector.multi_reduction <add>, %344, %cst_116 [2] : vector<2x8x8xf32> to vector<2x8xf32>
      %346 = vector.shape_cast %345 : vector<2x8xf32> to vector<2x8x1xf32>
      %347 = tpu.reciprocal %346 {approx = true} : vector<2x8x1xf32> -> vector<2x8x1xf32>
      %348 = arith.truncf %344 : vector<2x8x8xf32> to vector<2x8x8xbf16>
      %349 = arith.truncf %332 : vector<2x8x8xf32> to vector<2x8x8xbf16>
      "tpu.trace_start"() <{level = 10 : i32, message = "bqk,bkd->bqd"}> : () -> ()
      %cst_117 = arith.constant dense<0.000000e+00> : vector<2x8x8xf32>
      %350 = tpu.matmul %348, %349, %cst_117 {dimension_numbers = #tpu.dot_dimension_numbers<[2], [1], [1], [2], [0, 0, 0, 1, 1, 2], [0], [0]>} : vector<2x8x8xbf16>, vector<2x8x8xbf16>, vector<2x8x8xf32> -> vector<2x8x8xf32>
      "tpu.trace_stop"() : () -> ()
      %351 = vector.broadcast %347 : vector<2x8x1xf32> to vector<2x8x8xf32>
      %352 = arith.mulf %350, %351 : vector<2x8x8xf32>
      %353 = tpu.concatenate %283, %306, %329, %352 in 2 : vector<2x8x8xf32>, vector<2x8x8xf32>, vector<2x8x8xf32>, vector<2x8x8xf32> -> vector<2x8x32xf32>
      %354 = vector.shape_cast %353 : vector<2x8x32xf32> to vector<16x32xf32>
      %c1_118 = arith.constant 1 : index
      %c0_119 = arith.constant 0 : index
      %c0_120 = arith.constant 0 : index
      %355 = vector.load %arg17[%c1_118, %c0_119, %c0_120] : memref<2x32x32xbf16, #tpu.memory_space<vmem>>, vector<1x32x32xbf16>
      %356 = vector.shape_cast %355 : vector<1x32x32xbf16> to vector<32x32xbf16>
      %357 = arith.truncf %354 : vector<16x32xf32> to vector<16x32xbf16>
      %cst_121 = arith.constant dense<0.000000e+00> : vector<16x32xf32>
      %358 = tpu.matmul %357, %356, %cst_121 {dimension_numbers = #tpu.dot_dimension_numbers<[1], [0], [0], [1], [0, 0, 1, 1], [], []>} : vector<16x32xbf16>, vector<32x32xbf16>, vector<16x32xf32> -> vector<16x32xf32>
      %359 = arith.addf %220, %358 : vector<16x32xf32>
      %c1_122 = arith.constant 1 : index
      %c0_123 = arith.constant 0 : index
      %c0_124 = arith.constant 0 : index
      %360 = vector.load %arg18[%c1_122, %c0_123, %c0_124] : memref<2x1x32xf32, #tpu.memory_space<vmem>>, vector<1x1x32xf32>
      %361 = vector.shape_cast %360 : vector<1x1x32xf32> to vector<1x32xf32>
      %362 = vector.broadcast %361 : vector<1x32xf32> to vector<16x32xf32>
      %363 = arith.addf %359, %362 : vector<16x32xf32>
      %c1_125 = arith.constant 1 : index
      %c0_126 = arith.constant 0 : index
      %c0_127 = arith.constant 0 : index
      %364 = vector.load %arg19[%c1_125, %c0_126, %c0_127] : memref<2x1x32xf32, #tpu.memory_space<vmem>>, vector<1x1x32xf32>
      %365 = vector.shape_cast %364 : vector<1x1x32xf32> to vector<1x32xf32>
      %c1_128 = arith.constant 1 : index
      %c0_129 = arith.constant 0 : index
      %c0_130 = arith.constant 0 : index
      %366 = vector.load %arg20[%c1_128, %c0_129, %c0_130] : memref<2x1x32xf32, #tpu.memory_space<vmem>>, vector<1x1x32xf32>
      %367 = vector.shape_cast %366 : vector<1x1x32xf32> to vector<1x32xf32>
      %cst_131 = arith.constant dense<0.000000e+00> : vector<16xf32>
      %368 = vector.multi_reduction <add>, %363, %cst_131 [1] : vector<16x32xf32> to vector<16xf32>
      %369 = vector.shape_cast %368 : vector<16xf32> to vector<16x1xf32>
      %cst_132 = arith.constant 3.200000e+01 : f32
      %370 = vector.broadcast %cst_132 : f32 to vector<16x1xf32>
      %371 = arith.divf %369, %370 : vector<16x1xf32>
      %372 = vector.broadcast %371 : vector<16x1xf32> to vector<16x32xf32>
      %373 = arith.subf %363, %372 : vector<16x32xf32>
      %374 = arith.mulf %373, %373 : vector<16x32xf32>
      %cst_133 = arith.constant dense<0.000000e+00> : vector<16xf32>
      %375 = vector.multi_reduction <add>, %374, %cst_133 [1] : vector<16x32xf32> to vector<16xf32>
      %376 = vector.shape_cast %375 : vector<16xf32> to vector<16x1xf32>
      %cst_134 = arith.constant 3.200000e+01 : f32
      %377 = vector.broadcast %cst_134 : f32 to vector<16x1xf32>
      %378 = arith.divf %376, %377 : vector<16x1xf32>
      %379 = vector.broadcast %371 : vector<16x1xf32> to vector<16x32xf32>
      %380 = arith.subf %363, %379 : vector<16x32xf32>
      %cst_135 = arith.constant 9.99999974E-6 : f32
      %381 = vector.broadcast %cst_135 : f32 to vector<16x1xf32>
      %382 = arith.addf %378, %381 : vector<16x1xf32>
      %383 = math.rsqrt %382 : vector<16x1xf32>
      %384 = vector.broadcast %383 : vector<16x1xf32> to vector<16x32xf32>
      %385 = arith.mulf %380, %384 : vector<16x32xf32>
      %386 = vector.broadcast %365 : vector<1x32xf32> to vector<16x32xf32>
      %387 = arith.mulf %385, %386 : vector<16x32xf32>
      %388 = vector.broadcast %367 : vector<1x32xf32> to vector<16x32xf32>
      %389 = arith.addf %387, %388 : vector<16x32xf32>
      %c1_136 = arith.constant 1 : index
      %c0_137 = arith.constant 0 : index
      %c0_138 = arith.constant 0 : index
      %390 = vector.load %arg21[%c1_136, %c0_137, %c0_138] : memref<2x32x128xbf16, #tpu.memory_space<vmem>>, vector<1x32x128xbf16>
      %391 = vector.shape_cast %390 : vector<1x32x128xbf16> to vector<32x128xbf16>
      %392 = arith.truncf %389 : vector<16x32xf32> to vector<16x32xbf16>
      %cst_139 = arith.constant dense<0.000000e+00> : vector<16x128xf32>
      %393 = tpu.matmul %392, %391, %cst_139 {dimension_numbers = #tpu.dot_dimension_numbers<[1], [0], [0], [1], [0, 0, 1, 1], [], []>} : vector<16x32xbf16>, vector<32x128xbf16>, vector<16x128xf32> -> vector<16x128xf32>
      %c1_140 = arith.constant 1 : index
      %c0_141 = arith.constant 0 : index
      %c0_142 = arith.constant 0 : index
      %394 = vector.load %arg22[%c1_140, %c0_141, %c0_142] : memref<2x1x128xf32, #tpu.memory_space<vmem>>, vector<1x1x128xf32>
      %395 = vector.shape_cast %394 : vector<1x1x128xf32> to vector<1x128xf32>
      %396 = vector.broadcast %395 : vector<1x128xf32> to vector<16x128xf32>
      %397 = arith.addf %393, %396 : vector<16x128xf32>
      %cst_143 = arith.constant 1.702000e+00 : f32
      %398 = vector.broadcast %cst_143 : f32 to vector<16x128xf32>
      %399 = arith.mulf %398, %397 : vector<16x128xf32>
      %400 = arith.negf %399 : vector<16x128xf32>
      %401 = math.exp %400 : vector<16x128xf32>
      %cst_144 = arith.constant 1.000000e+00 : f32
      %402 = vector.broadcast %cst_144 : f32 to vector<16x128xf32>
      %403 = arith.addf %402, %401 : vector<16x128xf32>
      %404 = arith.divf %402, %403 : vector<16x128xf32>
      %405 = arith.mulf %397, %404 : vector<16x128xf32>
      %c1_145 = arith.constant 1 : index
      %c0_146 = arith.constant 0 : index
      %c0_147 = arith.constant 0 : index
      %406 = vector.load %arg23[%c1_145, %c0_146, %c0_147] : memref<2x128x32xbf16, #tpu.memory_space<vmem>>, vector<1x128x32xbf16>
      %407 = vector.shape_cast %406 : vector<1x128x32xbf16> to vector<128x32xbf16>
      %408 = arith.truncf %405 : vector<16x128xf32> to vector<16x128xbf16>
      %cst_148 = arith.constant dense<0.000000e+00> : vector<16x32xf32>
      %409 = tpu.matmul %408, %407, %cst_148 {dimension_numbers = #tpu.dot_dimension_numbers<[1], [0], [0], [1], [0, 0, 1, 1], [], []>} : vector<16x128xbf16>, vector<128x32xbf16>, vector<16x32xf32> -> vector<16x32xf32>
      %410 = arith.addf %363, %409 : vector<16x32xf32>
      %c1_149 = arith.constant 1 : index
      %c0_150 = arith.constant 0 : index
      %c0_151 = arith.constant 0 : index
      %411 = vector.load %arg24[%c1_149, %c0_150, %c0_151] : memref<2x1x32xf32, #tpu.memory_space<vmem>>, vector<1x1x32xf32>
      %412 = vector.shape_cast %411 : vector<1x1x32xf32> to vector<1x32xf32>
      %413 = vector.broadcast %412 : vector<1x32xf32> to vector<16x32xf32>
      %414 = arith.addf %410, %413 : vector<16x32xf32>
      %c0_152 = arith.constant 0 : index
      %c0_153 = arith.constant 0 : index
      %415 = vector.load %arg25[%c0_152, %c0_153] : memref<1x32xf32, #tpu.memory_space<vmem>>, vector<1x32xf32>
      %c0_154 = arith.constant 0 : index
      %c0_155 = arith.constant 0 : index
      %416 = vector.load %arg26[%c0_154, %c0_155] : memref<1x32xf32, #tpu.memory_space<vmem>>, vector<1x32xf32>
      %cst_156 = arith.constant dense<0.000000e+00> : vector<16xf32>
      %417 = vector.multi_reduction <add>, %414, %cst_156 [1] : vector<16x32xf32> to vector<16xf32>
      %418 = vector.shape_cast %417 : vector<16xf32> to vector<16x1xf32>
      %cst_157 = arith.constant 3.200000e+01 : f32
      %419 = vector.broadcast %cst_157 : f32 to vector<16x1xf32>
      %420 = arith.divf %418, %419 : vector<16x1xf32>
      %421 = vector.broadcast %420 : vector<16x1xf32> to vector<16x32xf32>
      %422 = arith.subf %414, %421 : vector<16x32xf32>
      %423 = arith.mulf %422, %422 : vector<16x32xf32>
      %cst_158 = arith.constant dense<0.000000e+00> : vector<16xf32>
      %424 = vector.multi_reduction <add>, %423, %cst_158 [1] : vector<16x32xf32> to vector<16xf32>
      %425 = vector.shape_cast %424 : vector<16xf32> to vector<16x1xf32>
      %cst_159 = arith.constant 3.200000e+01 : f32
      %426 = vector.broadcast %cst_159 : f32 to vector<16x1xf32>
      %427 = arith.divf %425, %426 : vector<16x1xf32>
      %428 = vector.broadcast %420 : vector<16x1xf32> to vector<16x32xf32>
      %429 = arith.subf %414, %428 : vector<16x32xf32>
      %cst_160 = arith.constant 9.99999974E-6 : f32
      %430 = vector.broadcast %cst_160 : f32 to vector<16x1xf32>
      %431 = arith.addf %427, %430 : vector<16x1xf32>
      %432 = math.rsqrt %431 : vector<16x1xf32>
      %433 = vector.broadcast %432 : vector<16x1xf32> to vector<16x32xf32>
      %434 = arith.mulf %429, %433 : vector<16x32xf32>
      %435 = vector.broadcast %415 : vector<1x32xf32> to vector<16x32xf32>
      %436 = arith.mulf %434, %435 : vector<16x32xf32>
      %437 = vector.broadcast %416 : vector<1x32xf32> to vector<16x32xf32>
      %438 = arith.addf %436, %437 : vector<16x32xf32>
      %439 = tpu.iota {dimensions = array<i32: 0>} : vector<2x16xi32>
      %440 = tpu.iota {dimensions = array<i32: 1>} : vector<2x16xi32>
      %c8_i32 = arith.constant 8 : i32
      %441 = vector.broadcast %c8_i32 : i32 to vector<2x16xi32>
      %442 = arith.muli %439, %441 : vector<2x16xi32>
      %c0_161 = arith.constant 0 : index
      %c0_162 = arith.constant 0 : index
      %443 = vector.load %arg10[%c0_161, %c0_162] : memref<2x1xi32, #tpu.memory_space<vmem>>, vector<2x1xi32>
      %444 = vector.broadcast %443 : vector<2x1xi32> to vector<2x16xi32>
      %445 = arith.addi %442, %444 : vector<2x16xi32>
      %446 = arith.cmpi eq, %440, %445 : vector<2x16xi32>
      %447 = arith.extui %446 : vector<2x16xi1> to vector<2x16xi32>
      %448 = arith.sitofp %447 : vector<2x16xi32> to vector<2x16xf32>
      %cst_163 = arith.constant dense<0.000000e+00> : vector<2x32xf32>
      %449 = tpu.matmul %448, %438, %cst_163 {dimension_numbers = #tpu.dot_dimension_numbers<[1], [0], [0], [1], [0, 0, 1, 1], [], []>} : vector<2x16xf32>, vector<16x32xf32>, vector<2x32xf32> -> vector<2x32xf32>
      %c0_164 = arith.constant 0 : index
      %c0_165 = arith.constant 0 : index
      %450 = vector.load %arg27[%c0_164, %c0_165] : memref<32x32xbf16, #tpu.memory_space<vmem>>, vector<32x32xbf16>
      %451 = arith.truncf %449 : vector<2x32xf32> to vector<2x32xbf16>
      %cst_166 = arith.constant dense<0.000000e+00> : vector<2x32xf32>
      %452 = tpu.matmul %451, %450, %cst_166 {dimension_numbers = #tpu.dot_dimension_numbers<[1], [0], [0], [1], [0, 0, 1, 1], [], []>} : vector<2x32xbf16>, vector<32x32xbf16>, vector<2x32xf32> -> vector<2x32xf32>
      %c0_167 = arith.constant 0 : index
      %c0_168 = arith.constant 0 : index
      %453 = vector.load %arg28[%c0_167, %c0_168] : memref<32x32xbf16, #tpu.memory_space<vmem>>, vector<32x32xbf16>
      %c0_169 = arith.constant 0 : index
      %c0_170 = arith.constant 0 : index
      %454 = vector.load %arg29[%c0_169, %c0_170] : memref<1x32xf32, #tpu.memory_space<vmem>>, vector<1x32xf32>
      %c0_171 = arith.constant 0 : index
      %c0_172 = arith.constant 0 : index
      %455 = vector.load %arg30[%c0_171, %c0_172] : memref<32x16xbf16, #tpu.memory_space<vmem>>, vector<32x16xbf16>
      %c0_173 = arith.constant 0 : index
      %c0_174 = arith.constant 0 : index
      %456 = vector.load %arg31[%c0_173, %c0_174] : memref<1x16xf32, #tpu.memory_space<vmem>>, vector<1x16xf32>
      %c0_175 = arith.constant 0 : index
      %c0_176 = arith.constant 0 : index
      %457 = vector.load %arg32[%c0_175, %c0_176] : memref<16x24xbf16, #tpu.memory_space<vmem>>, vector<16x24xbf16>
      %458 = arith.truncf %449 : vector<2x32xf32> to vector<2x32xbf16>
      %cst_177 = arith.constant dense<0.000000e+00> : vector<2x32xf32>
      %459 = tpu.matmul %458, %453, %cst_177 {dimension_numbers = #tpu.dot_dimension_numbers<[1], [0], [0], [1], [0, 0, 1, 1], [], []>} : vector<2x32xbf16>, vector<32x32xbf16>, vector<2x32xf32> -> vector<2x32xf32>
      %460 = vector.broadcast %454 : vector<1x32xf32> to vector<2x32xf32>
      %461 = arith.addf %459, %460 : vector<2x32xf32>
      %cst_178 = arith.constant dense<0.000000e+00> : vector<32xf32>
      %462 = vector.multi_reduction <add>, %461, %cst_178 [0] : vector<2x32xf32> to vector<32xf32>
      %463 = vector.shape_cast %462 : vector<32xf32> to vector<1x32xf32>
      %cst_179 = arith.constant 2.000000e+00 : f32
      %464 = vector.broadcast %cst_179 : f32 to vector<1x32xf32>
      %465 = arith.divf %463, %464 : vector<1x32xf32>
      %466 = vector.broadcast %465 : vector<1x32xf32> to vector<2x32xf32>
      %467 = arith.subf %461, %466 : vector<2x32xf32>
      %468 = arith.mulf %467, %467 : vector<2x32xf32>
      %cst_180 = arith.constant dense<0.000000e+00> : vector<32xf32>
      %469 = vector.multi_reduction <add>, %468, %cst_180 [0] : vector<2x32xf32> to vector<32xf32>
      %470 = vector.shape_cast %469 : vector<32xf32> to vector<1x32xf32>
      %cst_181 = arith.constant 2.000000e+00 : f32
      %471 = vector.broadcast %cst_181 : f32 to vector<1x32xf32>
      %472 = arith.divf %470, %471 : vector<1x32xf32>
      %473 = vector.broadcast %465 : vector<1x32xf32> to vector<2x32xf32>
      %474 = arith.subf %461, %473 : vector<2x32xf32>
      %cst_182 = arith.constant 9.99999974E-6 : f32
      %475 = vector.broadcast %cst_182 : f32 to vector<1x32xf32>
      %476 = arith.addf %472, %475 : vector<1x32xf32>
      %477 = math.rsqrt %476 : vector<1x32xf32>
      %478 = vector.broadcast %477 : vector<1x32xf32> to vector<2x32xf32>
      %479 = arith.mulf %474, %478 : vector<2x32xf32>
      %cst_183 = arith.constant 0.000000e+00 : f32
      %480 = vector.broadcast %cst_183 : f32 to vector<2x32xf32>
      %481 = arith.maximumf %479, %480 : vector<2x32xf32>
      %482 = arith.truncf %481 : vector<2x32xf32> to vector<2x32xbf16>
      %cst_184 = arith.constant dense<0.000000e+00> : vector<2x16xf32>
      %483 = tpu.matmul %482, %455, %cst_184 {dimension_numbers = #tpu.dot_dimension_numbers<[1], [0], [0], [1], [0, 0, 1, 1], [], []>} : vector<2x32xbf16>, vector<32x16xbf16>, vector<2x16xf32> -> vector<2x16xf32>
      %484 = vector.broadcast %456 : vector<1x16xf32> to vector<2x16xf32>
      %485 = arith.addf %483, %484 : vector<2x16xf32>
      %486 = arith.mulf %485, %485 : vector<2x16xf32>
      %cst_185 = arith.constant dense<0.000000e+00> : vector<2xf32>
      %487 = vector.multi_reduction <add>, %486, %cst_185 [1] : vector<2x16xf32> to vector<2xf32>
      %488 = vector.shape_cast %487 : vector<2xf32> to vector<2x1xf32>
      %489 = math.sqrt %488 : vector<2x1xf32>
      %cst_186 = arith.constant 9.99999996E-13 : f32
      %490 = vector.broadcast %cst_186 : f32 to vector<2x1xf32>
      %491 = arith.maximumf %489, %490 : vector<2x1xf32>
      %492 = vector.broadcast %491 : vector<2x1xf32> to vector<2x16xf32>
      %493 = arith.divf %485, %492 : vector<2x16xf32>
      %494 = arith.truncf %493 : vector<2x16xf32> to vector<2x16xbf16>
      %cst_187 = arith.constant dense<0.000000e+00> : vector<2x24xf32>
      %495 = tpu.matmul %494, %457, %cst_187 {dimension_numbers = #tpu.dot_dimension_numbers<[1], [0], [0], [1], [0, 0, 1, 1], [], []>} : vector<2x16xbf16>, vector<16x24xbf16>, vector<2x24xf32> -> vector<2x24xf32>
      %cst_188 = arith.constant 0.000000e+00 : f32
      %496 = vector.broadcast %cst_188 : f32 to vector<2x152xf32>
      %497 = tpu.concatenate %449, %452, %485, %495, %496 in 1 : vector<2x32xf32>, vector<2x32xf32>, vector<2x16xf32>, vector<2x24xf32>, vector<2x152xf32> -> vector<2x256xf32>
      %c0_189 = arith.constant 0 : index
      %c0_190 = arith.constant 0 : index
      %c0_191 = arith.constant 0 : index
      %498 = vector.load %arg33[%c0_189, %c0_190, %c0_191] : memref<1x2x256xf32, #tpu.memory_space<vmem>>, vector<1x2x256xf32>
      %499 = vector.shape_cast %498 : vector<1x2x256xf32> to vector<2x256xf32>
      %500 = vector.shape_cast %497 : vector<2x256xf32> to vector<1x2x256xf32>
      tpu.vector_store %arg33[%c0_189, %c0_190, %c0_191], %500 {strides = array<i32>} : memref<1x2x256xf32, #tpu.memory_space<vmem>>, vector<1x2x256xf32>,
    } else {
    }
    return
  }
  func.func @transform_0(%arg0: i32) -> (i32, i32) {
    %c0_i32 = arith.constant 0 : i32
    %c0_i32_0 = arith.constant 0 : i32
    %c0_i32_1 = arith.constant 0 : i32
    return %c0_i32, %c0_i32_0 : i32, i32
  }
  func.func @transform_1(%arg0: i32) -> (i32, i32) {
    %c0_i32 = arith.constant 0 : i32
    %c0_i32_0 = arith.constant 0 : i32
    %c0_i32_1 = arith.constant 0 : i32
    return %c0_i32, %c0_i32_0 : i32, i32
  }
  func.func @transform_2(%arg0: i32) -> (i32, i32) {
    %c0_i32 = arith.constant 0 : i32
    %c0_i32_0 = arith.constant 0 : i32
    %c0_i32_1 = arith.constant 0 : i32
    return %c0_i32, %c0_i32_0 : i32, i32
  }
  func.func @transform_3(%arg0: i32) -> (i32, i32) {
    %c0_i32 = arith.constant 0 : i32
    %c0_i32_0 = arith.constant 0 : i32
    %c0_i32_1 = arith.constant 0 : i32
    return %c0_i32, %c0_i32_0 : i32, i32
  }
  func.func @transform_4(%arg0: i32) -> (i32, i32) {
    %c0_i32 = arith.constant 0 : i32
    %c0_i32_0 = arith.constant 0 : i32
    %c0_i32_1 = arith.constant 0 : i32
    return %c0_i32, %c0_i32_0 : i32, i32
  }
  func.func @transform_5(%arg0: i32) -> (i32, i32) {
    %c0_i32 = arith.constant 0 : i32
    %c0_i32_0 = arith.constant 0 : i32
    %c0_i32_1 = arith.constant 0 : i32
    return %c0_i32, %c0_i32_0 : i32, i32
  }
  func.func @transform_6(%arg0: i32) -> (i32, i32) {
    %c0_i32 = arith.constant 0 : i32
    %c0_i32_0 = arith.constant 0 : i32
    %c0_i32_1 = arith.constant 0 : i32
    return %c0_i32, %c0_i32_0 : i32, i32
  }
  func.func @transform_7(%arg0: i32) -> (i32, i32) {
    %c0_i32 = arith.constant 0 : i32
    %c0_i32_0 = arith.constant 0 : i32
    %c0_i32_1 = arith.constant 0 : i32
    return %c0_i32, %c0_i32_0 : i32, i32
  }
  func.func @transform_8(%arg0: i32) -> (i32, i32) {
    %c0_i32 = arith.constant 0 : i32
    %c0_i32_0 = arith.constant 0 : i32
    %c0_i32_1 = arith.constant 0 : i32
    return %c0_i32, %c0_i32_0 : i32, i32
  }
  func.func @transform_9(%arg0: i32) -> (i32, i32) {
    %c0_i32 = arith.constant 0 : i32
    %c0_i32_0 = arith.constant 0 : i32
    %c0_i32_1 = arith.constant 0 : i32
    return %c0_i32, %c0_i32_0 : i32, i32
  }
  func.func @transform_10(%arg0: i32) -> (i32, i32) {
    %c0_i32 = arith.constant 0 : i32
    %c0_i32_0 = arith.constant 0 : i32
    %c0_i32_1 = arith.constant 0 : i32
    return %c0_i32, %c0_i32_0 : i32, i32
  }
  func.func @transform_11(%arg0: i32) -> (i32, i32) {
    %c0_i32 = arith.constant 0 : i32
    %c0_i32_0 = arith.constant 0 : i32
    %c0_i32_1 = arith.constant 0 : i32
    return %c0_i32, %c0_i32_0 : i32, i32
  }
  func.func @transform_12(%arg0: i32) -> (i32, i32, i32) {
    %c0_i32 = arith.constant 0 : i32
    %c0_i32_0 = arith.constant 0 : i32
    %c0_i32_1 = arith.constant 0 : i32
    %c0_i32_2 = arith.constant 0 : i32
    return %c0_i32, %c0_i32_0, %c0_i32_1 : i32, i32, i32
  }
  func.func @transform_13(%arg0: i32) -> (i32, i32, i32) {
    %c0_i32 = arith.constant 0 : i32
    %c0_i32_0 = arith.constant 0 : i32
    %c0_i32_1 = arith.constant 0 : i32
    %c0_i32_2 = arith.constant 0 : i32
    return %c0_i32, %c0_i32_0, %c0_i32_1 : i32, i32, i32
  }
  func.func @transform_14(%arg0: i32) -> (i32, i32, i32) {
    %c0_i32 = arith.constant 0 : i32
    %c0_i32_0 = arith.constant 0 : i32
    %c0_i32_1 = arith.constant 0 : i32
    %c0_i32_2 = arith.constant 0 : i32
    return %c0_i32, %c0_i32_0, %c0_i32_1 : i32, i32, i32
  }
  func.func @transform_15(%arg0: i32) -> (i32, i32, i32) {
    %c0_i32 = arith.constant 0 : i32
    %c0_i32_0 = arith.constant 0 : i32
    %c0_i32_1 = arith.constant 0 : i32
    %c0_i32_2 = arith.constant 0 : i32
    return %c0_i32, %c0_i32_0, %c0_i32_1 : i32, i32, i32
  }
  func.func @transform_16(%arg0: i32) -> (i32, i32, i32) {
    %c0_i32 = arith.constant 0 : i32
    %c0_i32_0 = arith.constant 0 : i32
    %c0_i32_1 = arith.constant 0 : i32
    %c0_i32_2 = arith.constant 0 : i32
    return %c0_i32, %c0_i32_0, %c0_i32_1 : i32, i32, i32
  }
  func.func @transform_17(%arg0: i32) -> (i32, i32, i32) {
    %c0_i32 = arith.constant 0 : i32
    %c0_i32_0 = arith.constant 0 : i32
    %c0_i32_1 = arith.constant 0 : i32
    %c0_i32_2 = arith.constant 0 : i32
    return %c0_i32, %c0_i32_0, %c0_i32_1 : i32, i32, i32
  }
  func.func @transform_18(%arg0: i32) -> (i32, i32, i32) {
    %c0_i32 = arith.constant 0 : i32
    %c0_i32_0 = arith.constant 0 : i32
    %c0_i32_1 = arith.constant 0 : i32
    %c0_i32_2 = arith.constant 0 : i32
    return %c0_i32, %c0_i32_0, %c0_i32_1 : i32, i32, i32
  }
  func.func @transform_19(%arg0: i32) -> (i32, i32, i32) {
    %c0_i32 = arith.constant 0 : i32
    %c0_i32_0 = arith.constant 0 : i32
    %c0_i32_1 = arith.constant 0 : i32
    %c0_i32_2 = arith.constant 0 : i32
    return %c0_i32, %c0_i32_0, %c0_i32_1 : i32, i32, i32
  }
  func.func @transform_20(%arg0: i32) -> (i32, i32, i32) {
    %c0_i32 = arith.constant 0 : i32
    %c0_i32_0 = arith.constant 0 : i32
    %c0_i32_1 = arith.constant 0 : i32
    %c0_i32_2 = arith.constant 0 : i32
    return %c0_i32, %c0_i32_0, %c0_i32_1 : i32, i32, i32
  }
  func.func @transform_21(%arg0: i32) -> (i32, i32, i32) {
    %c0_i32 = arith.constant 0 : i32
    %c0_i32_0 = arith.constant 0 : i32
    %c0_i32_1 = arith.constant 0 : i32
    %c0_i32_2 = arith.constant 0 : i32
    return %c0_i32, %c0_i32_0, %c0_i32_1 : i32, i32, i32
  }
  func.func @transform_22(%arg0: i32) -> (i32, i32, i32) {
    %c0_i32 = arith.constant 0 : i32
    %c0_i32_0 = arith.constant 0 : i32
    %c0_i32_1 = arith.constant 0 : i32
    %c0_i32_2 = arith.constant 0 : i32
    return %c0_i32, %c0_i32_0, %c0_i32_1 : i32, i32, i32
  }
  func.func @transform_23(%arg0: i32) -> (i32, i32, i32) {
    %c0_i32 = arith.constant 0 : i32
    %c0_i32_0 = arith.constant 0 : i32
    %c0_i32_1 = arith.constant 0 : i32
    %c0_i32_2 = arith.constant 0 : i32
    return %c0_i32, %c0_i32_0, %c0_i32_1 : i32, i32, i32
  }
  func.func @transform_24(%arg0: i32) -> (i32, i32) {
    %c0_i32 = arith.constant 0 : i32
    %c0_i32_0 = arith.constant 0 : i32
    %c0_i32_1 = arith.constant 0 : i32
    return %c0_i32, %c0_i32_0 : i32, i32
  }
  func.func @transform_25(%arg0: i32) -> (i32, i32) {
    %c0_i32 = arith.constant 0 : i32
    %c0_i32_0 = arith.constant 0 : i32
    %c0_i32_1 = arith.constant 0 : i32
    return %c0_i32, %c0_i32_0 : i32, i32
  }
  func.func @transform_26(%arg0: i32) -> (i32, i32) {
    %c0_i32 = arith.constant 0 : i32
    %c0_i32_0 = arith.constant 0 : i32
    %c0_i32_1 = arith.constant 0 : i32
    return %c0_i32, %c0_i32_0 : i32, i32
  }
  func.func @transform_27(%arg0: i32) -> (i32, i32) {
    %c0_i32 = arith.constant 0 : i32
    %c0_i32_0 = arith.constant 0 : i32
    %c0_i32_1 = arith.constant 0 : i32
    return %c0_i32, %c0_i32_0 : i32, i32
  }
  func.func @transform_28(%arg0: i32) -> (i32, i32) {
    %c0_i32 = arith.constant 0 : i32
    %c0_i32_0 = arith.constant 0 : i32
    %c0_i32_1 = arith.constant 0 : i32
    return %c0_i32, %c0_i32_0 : i32, i32
  }
  func.func @transform_29(%arg0: i32) -> (i32, i32) {
    %c0_i32 = arith.constant 0 : i32
    %c0_i32_0 = arith.constant 0 : i32
    %c0_i32_1 = arith.constant 0 : i32
    return %c0_i32, %c0_i32_0 : i32, i32
  }
  func.func @transform_30(%arg0: i32) -> (i32, i32) {
    %c0_i32 = arith.constant 0 : i32
    %c0_i32_0 = arith.constant 0 : i32
    %c0_i32_1 = arith.constant 0 : i32
    return %c0_i32, %c0_i32_0 : i32, i32
  }
  func.func @transform_31(%arg0: i32) -> (i32, i32) {
    %c0_i32 = arith.constant 0 : i32
    %c0_i32_0 = arith.constant 0 : i32
    %c0_i32_1 = arith.constant 0 : i32
    return %c0_i32, %c0_i32_0 : i32, i32
  }
  func.func @transform_32(%arg0: i32) -> (i32, i32, i32) {
    %c0_i32 = arith.constant 0 : i32
    %c0_i32_0 = arith.constant 0 : i32
    %c0_i32_1 = arith.constant 0 : i32
    return %arg0, %c0_i32, %c0_i32_0 : i32, i32, i32
  }
}

</mosaic_0001>

<bundles_post_ra>
// kernel: swalip_forward.1
= control target key start
LH: loop header
LB: loop body
LE: loop exit
PB: predicated region body
PF: predicated region fallthrough
CT: control target
= control target key end

     0   :  { %s6340_s6 = smov 1   ;;  %s6341_s10 = smov 2   ;;  %s7297_s0 = inlined_call_operand.smem [shape: u32[33], index: -1, kind: input, shape index: {}] }
   0x1   :  { %s6404_s5 = sld [smem:[%s7297_s0]]   ;;  %s6342_s14 = smov 3  }
   0x2   :  { %s6409_s9 = sld [smem:[%s7297_s0 + %s6340_s6]]   ;;  %s6343_s18 = smov 4  }
   0x3   :  { %s6414_s13 = sld [smem:[%s7297_s0 + %s6341_s10]]   ;;  %s6344_s22 = smov 5  }
   0x4   :  { %s6419_s17 = sld [smem:[%s7297_s0 + %s6342_s14]]   ;;  %s6345_s26 = smov 6  }
   0x5   :  { %s6424_s21 = sld [smem:[%s7297_s0 + %s6343_s18]]   ;;  %s6346_s30 = smov 7  }
   0x6   :  { %s6429_s25 = sld [smem:[%s7297_s0 + %s6344_s22]]   ;;  %s6347_s4 = smov 8  }
   0x7   :  { %7335 = sst [smem:[#allocation2_spill]] %s6404_s5  ;;  %s6348_s10 = smov 9  }
   0x8   :  { %s6434_s29 = sld [smem:[%s7297_s0 + %s6345_s26]]   ;;  %s6349_s15 = smov 10  }
   0x9   :  { %s6439_s3 = sld [smem:[%s7297_s0 + %s6346_s30]]   ;;  %s6350_s20 = smov 11  }
   0xa   :  { %s6444_s8 = sld [smem:[%s7297_s0 + %s6347_s4]]   ;;  %s6351_s26 = smov 12  }
   0xb   :  { %s6449_s14 = sld [smem:[%s7297_s0 + %s6348_s10]]   ;;  %s6352_s1 = smov 13  }
   0xc   :  { %s6454_s19 = sld [smem:[%s7297_s0 + %s6349_s15]]   ;;  %s6353_s7 = smov 14  }
   0xd   :  { %s6459_s24 = sld [smem:[%s7297_s0 + %s6350_s20]]   ;;  %s6354_s15 = smov 15  }
   0xe   :  { %s6464_s30 = sld [smem:[%s7297_s0 + %s6351_s26]]   ;;  %s6355_s22 = smov 16  }
   0xf   :  { %7336 = sst [smem:[#allocation3_spill]] %s6439_s3  ;;  %s6356_s28 = smov 17  }
  0x10   :  { %s6469_s6 = sld [smem:[%s7297_s0 + %s6352_s1]]  }
  0x11   :  { %7337 = sst [smem:[#allocation4_spill]] %s6449_s14 }
  0x12   :  { %s6474_s12 = sld [smem:[%s7297_s0 + %s6353_s7]]   ;;  %s6357_s7 = smov 18  }
  0x13   :  { %s6479_s20 = sld [smem:[%s7297_s0 + %s6354_s15]]   ;;  %s6358_s15 = smov 19  }
  0x14   :  { %s6484_s27 = sld [smem:[%s7297_s0 + %s6355_s22]]   ;;  %s6359_s22 = smov 20  }
  0x15   :  { %s6489_s4 = sld [smem:[%s7297_s0 + %s6356_s28]]   ;;  %s6360_s28 = smov 21  }
  0x16   :  { %7338 = sst [smem:[#allocation5_spill]] %s6469_s6 }
  0x17   :  { %s6494_s14 = sld [smem:[%s7297_s0 + %s6357_s7]]   ;;  %s6361_s7 = smov 22  }
  0x19   :  { %7339 = sst [smem:[#allocation6_spill]] %s6479_s20 }
  0x1a   :  { %7340 = sst [smem:[#allocation7_spill]] %s6484_s27 }
  0x1b   :  { %7341 = sst [smem:[#allocation8_spill]] %s6489_s4 }
  0x1c   :  { %s6499_s20 = sld [smem:[%s7297_s0 + %s6358_s15]]   ;;  %s6362_s15 = smov 23  }
  0x1d   :  { %7342 = sst [smem:[#allocation9_spill]] %s6494_s14 }
  0x1e   :  { %s6504_s27 = sld [smem:[%s7297_s0 + %s6359_s22]]   ;;  %s6363_s22 = smov 24  }
  0x1f   :  { %s6509_s4 = sld [smem:[%s7297_s0 + %s6360_s28]]   ;;  %s6364_s28 = smov 25  }
  0x20   :  { %s6514_s14 = sld [smem:[%s7297_s0 + %s6361_s7]]   ;;  %s6365_s7 = smov 26  }
  0x22   :  { %7343 = sst [smem:[#allocation10_spill]] %s6499_s20 }
  0x23   :  { %s6519_s20 = sld [smem:[%s7297_s0 + %s6362_s15]]   ;;  %s6366_s15 = smov 27  }
  0x24   :  { %7344 = sst [smem:[#allocation11_spill]] %s6504_s27 }
  0x25   :  { %7345 = sst [smem:[#allocation12_spill]] %s6509_s4 }
  0x26   :  { %7346 = sst [smem:[#allocation13_spill]] %s6514_s14 }
  0x27   :  { %s6524_s27 = sld [smem:[%s7297_s0 + %s6363_s22]]   ;;  %s6367_s22 = smov 28  }
  0x28   :  { %s6529_s4 = sld [smem:[%s7297_s0 + %s6364_s28]]   ;;  %s6368_s28 = smov 29  }
  0x29   :  { %7347 = sst [smem:[#allocation14_spill]] %s6519_s20 }
  0x2a   :  { %s6534_s14 = sld [smem:[%s7297_s0 + %s6365_s7]]   ;;  %s6369_s7 = smov 30  }
  0x2b   :  { %s6539_s20 = sld [smem:[%s7297_s0 + %s6366_s15]]   ;;  %s6370_s15 = smov 31  }
  0x2d   :  { %7348 = sst [smem:[#allocation15_spill]] %s6524_s27 }
  0x2e   :  { %7349 = sst [smem:[#allocation16_spill]] %s6529_s4 }
  0x2f   :  { %s6544_s27 = sld [smem:[%s7297_s0 + %s6367_s22]]   ;;  %s6371_s22 = smov 32  }
  0x30   :  { %7350 = sst [smem:[#allocation17_spill]] %s6534_s14 }
  0x31   :  { %7351 = sst [smem:[#allocation18_spill]] %s6539_s20 }
  0x32   :  { %s6549_s4 = sld [smem:[%s7297_s0 + %s6368_s28]]   ;;  %s6566_s28 = smov 0  }
  0x33   :  { %s6554_s14 = sld [smem:[%s7297_s0 + %s6369_s7]]  }
  0x34   :  { %s6559_s20 = sld [smem:[%s7297_s0 + %s6370_s15]]  }
  0x35   :  { %7352 = sst [smem:[#allocation19_spill]] %s6544_s27 }
  0x36   :  { %s6564_s27 = sld [smem:[%s7297_s0 + %s6371_s22]]  }
  0x37 LB: > { %s7353_s6 = sld [smem:[#allocation5_spill]]  ;;  %s6572_s1 = sadd.s32 4294967295, %s6338_s28   ;;  %s6338_s28 = sphi %s6566_s28, %s75_s28  }
  0x38   : > { %s7354_s5 = sld [smem:[#allocation2_spill]]  ;;  %p5231_p0 = scmp.ge.s32.totalorder %s6338_s28, 1 }
  0x39   : > { %p885_p1 = scmp.lt.s32.totalorder %s6338_s28, 3 }
  0x3b   : > { %p886_p2 = pnand %p5231_p0, %p885_p1 }
  0x3c   : > { %p962_p3 = scmp.lt.s32.totalorder (!%p886_p2), %s6572_s1, 1  ;;  %p5234_p4 = scmp.ne.s32.totalorder (!%p886_p2), %s6572_s1, 0 }
  0x3d   : > { %889 = sbr.rel (%p886_p2) target bundleno = 9783 (0x2637), region = 148 }
  0x42   : > { %s963_s0 = scalar_select %p962_p3, %s6572_s1, 1 }
  0x43   : > { %971 = sbr.rel (%p5234_p4) target bundleno = 1291 (0x50b), region = 152  ;;  %s7355_s3 = sld [smem:[#allocation3_spill]] (!%p5234_p4) }
  0x44   : > { %s5450_s2 = sshll.u32 %s963_s0, 2  ;;  %s6375_s10 = smov (!%p5234_p4), 96  }
  0x45   : > { %s6579_s7 = scalar_lea.vmem %s6564_s27, %s5450_s2  ;;  %s6376_s11 = smov (!%p5234_p4), 64  }
  0x46   : > { %s6377_s15 = smov (!%p5234_p4), 112  }
  0x48   : > { %v6094_v0 = vld [vmem:[%s6409_s9 + $0x78] sm:$0xff]   ;;  %v6098_v4 = vld [vmem:[%s6409_s9 + $0x70] sm:$0xff]   ;;  %v6102_v8 = vld [vmem:[%s6409_s9 + $0x68] sm:$0xff]   ;;  %v1076_v27 = vlaneseq  ;;  %v6372_v35 = vmov 1983009808   ;;  %vm6374_vm0 = vmmov 0  }
  0x49   : > { %v6095_v1 = vld [vmem:[%s6409_s9 + $0x38] sm:$0xff]   ;;  %5451 = vmatprep.subr.bf16.mxu0 %v6094_v0  ;;  %v6099_v5 = vld [vmem:[%s6409_s9 + $0x30] sm:$0xff]   ;;  %v6103_v9 = vld [vmem:[%s6409_s9 + $0x28] sm:$0xff]   ;;  %v1074_v36 = vunpack.c.l.s4 %v6372_v35  ;;  %vm1557_vm1 = vcmask 523264   ;;  %vm1687_vm2 = vcmask 254976   ;;  %vm1730_vm3 = vcmask 261120  }
  0x4a   : > { %v6096_v2 = vld [vmem:[%s6409_s9 + $0xf8] sm:$0xff]   ;;  %5452 = vmatpush3.bf16.msra.mxu0 %v6095_v1  ;;  %v6100_v6 = vld [vmem:[%s6409_s9 + $0xf0] sm:$0xff]   ;;  %v6104_v10 = vld [vmem:[%s6409_s9 + $0xe8] sm:$0xff]   ;;  %v1077_v32 = vshrl.u32 %v1076_v27, 7  ;;  %vm1775_vm4 = vcmask 123904   ;;  %vm1796_vm7 = vcmask 130048  }
  0x4b   : > { %v6097_v3 = vld [vmem:[%s6409_s9 + $0xb8] sm:$0xff]   ;;  %5473 = vmatprep.subr.bf16.mxu1 %v6096_v2  ;;  %5453 = vmatprep.subr.bf16.mxu0 %v6098_v4  ;;  %v6101_v7 = vld [vmem:[%s6409_s9 + $0xb0] sm:$0xff]   ;;  %v6105_v11 = vld [vmem:[%s6409_s9 + $0xa8] sm:$0xff]   ;;  %v1075_v38 = vunpack.c.0.s8 %v1074_v36  ;;  %vm1853_vm8 = vcmask 785408   ;;  %vm1855_vm9 = vcmask 916480   ;;  %vm1857_vm10 = vcmask 64512  }
  0x4c   : > { %5474 = vmatpush3.bf16.msra.mxu1 %v6097_v3  ;;  %v6106_v12 = vld [vmem:[%s6409_s9 + $0x60] sm:$0xff]   ;;  %v6110_v16 = vld [vmem:[%s6409_s9 + $0x58] sm:$0xff]   ;;  %v6114_v20 = vld [vmem:[%s6409_s9 + $0x50] sm:$0xff]  }
  0x4d   : > { %5475 = vmatprep.subr.bf16.mxu1 %v6100_v6  ;;  %v6107_v13 = vld [vmem:[%s6409_s9 + $0x20] sm:$0xff]   ;;  %v6111_v17 = vld [vmem:[%s6409_s9 + $0x18] sm:$0xff]   ;;  %v6115_v21 = vld [vmem:[%s6409_s9 + $0x10] sm:$0xff]   ;;  %v1078_v40 = vsub.s32 %v1075_v38, %v1077_v32 }
  0x4e   : > { %5454 = vmatpush3.bf16.msra.mxu0 %v6099_v5  ;;  %v6108_v14 = vld [vmem:[%s6409_s9 + $0xe0] sm:$0xff]   ;;  %v6112_v18 = vld [vmem:[%s6409_s9 + $0xd8] sm:$0xff]   ;;  %v6116_v22 = vld [vmem:[%s6409_s9 + $0xd0] sm:$0xff]   ;;  %v6373_v5 = vmov 0.0  }
  0x4f   : > { %5455 = vmatprep.subr.bf16.mxu0 %v6102_v8  ;;  %v6109_v15 = vld [vmem:[%s6409_s9 + $0xa0] sm:$0xff]   ;;  %v6113_v19 = vld [vmem:[%s6409_s9 + $0x98] sm:$0xff]   ;;  %v6117_v23 = vld [vmem:[%s6409_s9 + $0x90] sm:$0xff]  }
  0x50   : > { %5476 = vmatpush3.bf16.msra.mxu1 %v6101_v7  ;;  %v6118_v24 = vld [vmem:[%s6409_s9 + $0x48] sm:$0xff]   ;;  %v6122_v29 = vld [vmem:[%s6409_s9 + $0x40] sm:$0xff]   ;;  %v6126_v37 = vld [vmem:[%s6409_s9 + $0x178] sm:$0xff]  }
  0x51   : > { %5477 = vmatprep.subr.bf16.mxu1 %v6104_v10  ;;  %v6119_v25 = vld [vmem:[%s6409_s9 + $0x8] sm:$0xff]   ;;  %v6123_v30 = vld [vmem:[%s6409_s9] sm:$0xff]   ;;  %v6128_v49 = vld [vmem:[%s6409_s9 + $0x138] sm:$0xff]  }
  0x52   : > { %5456 = vmatpush3.bf16.msra.mxu0 %v6103_v9  ;;  %v6120_v26 = vld [vmem:[%s6409_s9 + $0xc8] sm:$0xff]   ;;  %v6124_v31 = vld [vmem:[%s6409_s9 + $0xc0] sm:$0xff]   ;;  %v6129_v50 = vld [vmem:[%s6409_s9 + $0x170] sm:$0xff]  }
  0x53   : > { %5457 = vmatprep.subr.bf16.mxu0 %v6106_v12  ;;  %v6121_v28 = vld [vmem:[%s6409_s9 + $0x88] sm:$0xff]   ;;  %v972_v33 = vld [vmem:[%s7354_s5] sm:$0xff]  ;;  %v6130_v51 = vld [vmem:[%s6409_s9 + $0x130] sm:$0xff]  }
  0x54   : > { %5478 = vmatpush3.bf16.msra.mxu1 %v6105_v11  ;;  %v6125_v34 = vld [vmem:[%s6409_s9 + $0x80] sm:$0xff]   ;;  %v1072_v39 = vcombine.high %v972_v33, %v972_v33  ;;  %v1079_v41 = vrot.slane %v972_v33, %v1078_v40  ;;  %v6131_v52 = vld [vmem:[%s6409_s9 + $0x168] sm:$0xff]   ;;  %v6135_v59 = vld [vmem:[%s6409_s9 + $0x158] sm:$0xff]  }
  0x55   : > { %5479 = vmatprep.subr.bf16.mxu1 %v6108_v14  ;;  %v6132_v53 = vld [vmem:[%s6409_s9 + $0x128] sm:$0xff]   ;;  %v6133_v55 = vld [vmem:[%s6409_s9 + $0x160] sm:$0xff]   ;;  %v6136_v60 = vld [vmem:[%s6409_s9 + $0x118] sm:$0xff]  }
  0x56   : > { %5458 = vmatpush3.bf16.msra.mxu0 %v6107_v13  ;;  %v1086_v42 = vrot.slane %v1072_v39, %v1078_v40  ;;  %v1087_v43 = vcombine.high %v1079_v41, %v1079_v41  ;;  %v1103_v45 = vpack.c.bf16 %v1079_v41, %v1079_v41  ;;  %v5235_v54 = vld.sshfl [vmem:[%s7354_s5 + $0x8] sm:$0x33 pattern:$0x76325410]  ;;  %v6134_v58 = vld [vmem:[%s6409_s9 + $0x120] sm:$0xff]   ;;  %v6137_v61 = vld [vmem:[%s6409_s9 + $0x150] sm:$0xff]  }
  0x57   : > { %5459 = vmatprep.subr.bf16.mxu0 %v6110_v16  ;;  %v1096_v56 = vcombine.high %v5235_v54, %v5235_v54  ;;  %v6138_v62 = vld [vmem:[%s6409_s9 + $0x110] sm:$0xff]   ;;  %v6139_v63 = vld [vmem:[%s6409_s9 + $0x148] sm:$0xff]   ;;  %v6141_v1 = vld [vmem:[%s6409_s9 + $0x140] sm:$0xff]   ;;  %v1107_v3 = vpack.c.bf16 %v5235_v54, %v5235_v54 }
  0x58   : > { %5480 = vmatpush3.bf16.msra.mxu1 %v6109_v15  ;;  %v1088_v44 = vcombine.high %v1086_v42, %v1086_v42  ;;  %v1105_v46 = vpack.c.bf16 %v1086_v42, %v1086_v42  ;;  %v1104_v47 = vpack.c.bf16 %v1087_v43, %v1087_v43  ;;  %v6140_v0 = vld [vmem:[%s6409_s9 + $0x108] sm:$0xff]   ;;  %v6142_v2 = vld [vmem:[%s6409_s9 + $0x100] sm:$0xff]   ;;  %v6143_v4 = vld [vmem:[%s6419_s17 + $0x18] sm:$0xff]  }
  0x59   : > { %5481 = vmatprep.subr.bf16.mxu1 %v6112_v18  ;;  %v1108_v57 = vpack.c.bf16 %v1096_v56, %v1096_v56  ;;  %v6144_v6 = vld [vmem:[%s6419_s17 + $0x10] sm:$0xff]   ;;  %v6145_v7 = vld [vmem:[%s6419_s17 + $0x8] sm:$0xff]   ;;  %v6146_v8 = vld [vmem:[%s6419_s17] sm:$0xff]  }
  0x5a   : > { %5460 = vmatpush3.bf16.msra.mxu0 %v6111_v17  ;;  %v1106_v48 = vpack.c.bf16 %v1088_v44, %v1088_v44  ;;  %1436 = vmatprep.mubr.bf16.mxu0 %v1104_v47  ;;  %v5236_v18 = vld [vmem:[%s6414_s13] ss:$0 sm:$0xff]  ;;  %v6151_v33 = vld [vmem:[%s6434_s29 + $0x8] sm:$0xff]  }
  0x5b   : > { %5461 = vmatprep.subr.bf16.mxu0 %v6114_v20  ;;  %v6150_v32 = vld [vmem:[%s6424_s21] sm:$0xff]  }
  0x5c   : > { %5482 = vmatpush3.bf16.msra.mxu1 %v6113_v19  ;;  %1476 = vmatprep.mubr.bf16.mxu1 %v1106_v48  ;;  %v5290_v39 = vld [vmem:[%s6429_s25] ss:$0 sm:$0xff] }
  0x5d   : > { %5483 = vmatprep.subr.bf16.mxu1 %v6116_v22 }
  0x5e   : > { %5462 = vmatpush3.bf16.msra.mxu0 %v6115_v21 }
  0x5f   : > { %5463 = vmatprep.subr.bf16.mxu0 %v6118_v24 }
  0x60   : > { %5484 = vmatpush3.bf16.msra.mxu1 %v6117_v23 }
  0x61   : > { %5485 = vmatprep.subr.bf16.mxu1 %v6120_v26 }
  0x62   : > { %5464 = vmatpush3.bf16.msra.mxu0 %v6119_v25 }
  0x63   : > { %5465 = vmatprep.subr.bf16.mxu0 %v6122_v29 }
  0x64   : > { %5486 = vmatpush3.bf16.msra.mxu1 %v6121_v28  ;;  %v6147_v28 = vld [vmem:[%s6424_s21 + $0x18] sm:$0xff]  }
  0x65   : > { %5487 = vmatprep.subr.bf16.mxu1 %v6124_v31  ;;  %v6149_v31 = vld [vmem:[%s6424_s21 + $0x8] sm:$0xff]  }
  0x66   : > { %5466 = vmatpush3.bf16.msra.mxu0 %v6123_v30  ;;  %v6148_v30 = vld [vmem:[%s6424_s21 + $0x10] sm:$0xff]  }
  0x67   : > { %5495 = vmatprep.subr.bf16.mxu0 %v6126_v37 }
  0x68   : > { %5488 = vmatpush3.bf16.msra.mxu1 %v6125_v34  ;;  %v6152_v34 = vld [vmem:[%s6434_s29] sm:$0xff]  }
  0x69   : > { %1437 = vmatmul.mubr.bf16.vlgmr.msra.gmra.mxu0 %v1103_v45  ;;  %5656 = vmatprep.subr.bf16.mxu1 %v6373_v5 }
  0x6a   : > { %5496 = vmatpush3.bf16.msra.mxu0 %v6128_v49  ;;  %1516 = vmatprep.mubr.bf16.mxu0 %v1108_v57 }
  0x6b   : > { %1477 = vmatmul.mubr.bf16.vlgmr.msra.gmra.mxu1 %v1105_v46  ;;  %5497 = vmatprep.subr.bf16.mxu0 %v6129_v50 }
  0x6c   : > { %5657 = vmatpush3.bf16.msra.mxu1 %v6143_v4  ;;  %5664 = vmatprep.mubr.msk.bf16.mxu1 %vm6374_vm0, %v6373_v5  ;;  %v5296_v4 = vld [vmem:[%s7355_s3] ss:$0 sm:$0xff] }
  0x6d   : > { %5658 = vmatprep.subr.bf16.mxu1 %v6373_v5 }
  0x6e   : > { %5498 = vmatpush3.bf16.msra.mxu0 %v6130_v51 }
  0x6f   : > { %5499 = vmatprep.subr.bf16.mxu0 %v6131_v52 }
  0x70   : > { %5659 = vmatpush3.bf16.msra.mxu1 %v6144_v6 }
  0x71   : > { %5660 = vmatprep.subr.bf16.mxu1 %v6373_v5 }
  0x72   : > { %5500 = vmatpush3.bf16.msra.mxu0 %v6132_v53 }
  0x73   : > { %5501 = vmatprep.subr.bf16.mxu0 %v6133_v55 }
  0x74   : > { %5661 = vmatpush3.bf16.msra.mxu1 %v6145_v7 }
  0x75   : > { %5662 = vmatprep.subr.bf16.mxu1 %v6373_v5 }
  0x76   : > { %5502 = vmatpush3.bf16.msra.mxu0 %v6134_v58 }
  0x77   : > { %5503 = vmatprep.subr.bf16.mxu0 %v6135_v59 }
  0x78   : > { %5663 = vmatpush3.bf16.msra.mxu1 %v6146_v8 }
  0x79   : > { %5668 = vmatprep.subr.bf16.mxu1 %v6373_v5 }
  0x7a   : > { %5504 = vmatpush3.bf16.msra.mxu0 %v6136_v60 }
  0x7b   : > { %5505 = vmatprep.subr.bf16.mxu0 %v6137_v61 }
  0x7e   : > { %5506 = vmatpush3.bf16.msra.mxu0 %v6138_v62 }
  0x7f   : > { %5507 = vmatprep.subr.bf16.mxu0 %v6139_v63 }
  0x82   : > { %5508 = vmatpush3.bf16.msra.mxu0 %v6140_v0 }
  0x83   : > { %5509 = vmatprep.subr.bf16.mxu0 %v6141_v1 }
  0x86   : > { %5510 = vmatpush3.bf16.msra.mxu0 %v6142_v2 }
  0x87   : > { %5680 = vmatprep.subr.bf16.mxu0 %v6373_v5 }
  0x89   : > { %1517 = vmatmul.mubr.bf16.vlgmr.msra.gmra.mxu0 %v1107_v3 }
  0x8a   : > { %5684 = vmatprep.mubr.msk.bf16.mxu0 %vm6374_vm0, %v6373_v5  ;;  %5681 = vmatpush3.bf16.msra.mxu0 %v6151_v33 }
  0x8b   : > { %5682 = vmatprep.subr.bf16.mxu0 %v6373_v5 }
  0x8e   : > { %5683 = vmatpush3.bf16.msra.mxu0 %v6152_v34 }
 0x129   : > { %v5467_v9 = vpop.f32.mrf.mxu0 }
 0x12b   : > { %v5489_v10 = vpop.f32.mrf.mxu1  ;;  %v5468_v11 = vpop.f32.mrf.mxu0 }
 0x12c   : > { %v5469_v17 = vadd.f32 %v5468_v11, %v5467_v9 }
 0x12d   : > { %v5490_v12 = vpop.f32.mrf.mxu1  ;;  %v5470_v13 = vpop.f32.mrf.mxu0 }
 0x12e   : > { %v1439_v19 = vadd.f32 %v5469_v17, %v5236_v18  ;;  %v5491_v20 = vadd.f32 %v5490_v12, %v5489_v10  ;;  %v6153_v12 = vld [vmem:[%s6559_s20] sm:$0xff]  }
 0x12f   : > { %v5492_v14 = vpop.f32.mrf.mxu1  ;;  %v5471_v15 = vpop.f32.mrf.mxu0 }
 0x130   : > { %v1479_v23 = vadd.f32 %v5491_v20, %v1439_v19 }
 0x131   : > { %v5493_v16 = vpop.f32.mrf.mxu1 }
 0x149   : > { %v5511_v21 = vpop.f32.mrf.mxu0 }
 0x14b   : > { %v5512_v22 = vpop.f32.mrf.mxu0 }
 0x14c   : > { %v5513_v24 = vadd.f32 %v5512_v22, %v5511_v21 }
 0x14d   : > { %v5514_v25 = vpop.f32.mrf.mxu0 }
 0x14e   : > { %v6639_v26 = vadd.f32 %v5513_v24, %v1479_v23 }
 0x14f   : > { %v5515_v27 = vpop.f32.mrf.mxu0 }
 0x150   : > { %v1532_v29 = vpack.c.bf16 %v6639_v26, %v6639_v26 }
 0x152   : > { %5665 = vmatmul.mubr.msk.bf16.vlgmr.msra.gmra.mxu1 %vm1557_vm1, %v1532_v29 }
 0x153   : > { %5669 = vmatpush3.bf16.msra.mxu1 %v6147_v28  ;;  %5676 = vmatprep.mubr.msk.bf16.mxu1 %vm6374_vm0, %v6373_v5 }
 0x154   : > { %5670 = vmatprep.subr.bf16.mxu1 %v6373_v5 }
 0x157   : > { %5671 = vmatpush3.bf16.msra.mxu1 %v6148_v30 }
 0x158   : > { %5672 = vmatprep.subr.bf16.mxu1 %v6373_v5 }
 0x15b   : > { %5673 = vmatpush3.bf16.msra.mxu1 %v6149_v31 }
 0x15c   : > { %5674 = vmatprep.subr.bf16.mxu1 %v6373_v5 }
 0x15f   : > { %5675 = vmatpush3.bf16.msra.mxu1 %v6150_v32 }
 0x160   : > { %5688 = vmatprep.subr.bf16.mxu1 %v6373_v5 }
 0x162   : > { %5677 = vmatmul.mubr.msk.bf16.vlgmr.msra.gmra.mxu1 %vm1557_vm1, %v1532_v29 }
 0x163   : > { %5690 = vmatprep.mubr.msk.bf16.mxu1 %vm6374_vm0, %v6373_v5  ;;  %5689 = vmatpush3.bf16.msra.mxu1 %v6153_v12 }
 0x212   : > { %v1595_v35 = vpop.f32.mrf.mxu1 }
 0x214   : > { %v5666_v36 = vpop.f32.mrf.mxu1 }
 0x216   : > { %v1598_v37 = vpop.f32.mrf.mxu1 }
 0x218   : > { %v5667_v38 = vpop.f32.mrf.mxu1 }
 0x222   : > { %v1681_v40 = vpop.f32.mrf.mxu1 }
 0x223   : > { %v1682_v41 = vadd.f32 %v5290_v39, %v1681_v40 }
 0x224   : > { %v5678_v42 = vpop.f32.mrf.mxu1 }
 0x225   : > { %v1688_v43 = vsel %vm1687_vm2, %v1682_v41, 0.0 }
 0x226   : > { %v1689_v44 = vrot.slane %v1688_v43, 4  ;;  %v1684_v45 = vpop.f32.mrf.mxu1 }
 0x228   : > { %v1690_v46 = vadd.f32 %v1689_v44, %v1688_v43  ;;  %v5679_v47 = vpop.f32.mrf.mxu1 }
 0x22a   : > { %v1691_v48 = vrot.slane %v1690_v46, 2 }
 0x22c   : > { %v1692_v49 = vadd.f32 %v1691_v48, %v1690_v46 }
 0x22e   : > { %v1693_v50 = vrot.slane %v1692_v49, 1 }
 0x230   : > { %v1694_v51 = vadd.f32 %v1693_v50, %v1692_v49 }
 0x232   : > { %v1696_v52 = vmul.f32 0.5, %v1694_v51 }
 0x234   : > { %v1697_v53 = vsub.f32 %v1682_v41, %v1696_v52 }
 0x236   : > { %v1698_v54 = vmul.f32 %v1697_v53, %v1697_v53 }
 0x238   : > { %v1699_v55 = vsel %vm1687_vm2, %v1698_v54, 0.0 }
 0x239   : > { %v1700_v56 = vrot.slane %v1699_v55, 4 }
 0x23b   : > { %v1701_v57 = vadd.f32 %v1700_v56, %v1699_v55 }
 0x23d   : > { %v1702_v58 = vrot.slane %v1701_v57, 2 }
 0x23f   : > { %v1703_v59 = vadd.f32 %v1702_v58, %v1701_v57 }
 0x241   : > { %v1704_v60 = vrot.slane %v1703_v59, 1 }
 0x243   : > { %v1705_v61 = vadd.f32 %v1704_v60, %v1703_v59 }
 0x245   : > { %v1706_v62 = vmul.f32 0.5, %v1705_v61 }
 0x247   : > { %v1707_v63 = vadd.f32 1e-05, %v1706_v62 }
 0x249   : > { %6154 = vrsqrt.f32 %v1707_v63 }
 0x256   : > { %v6155_v0 = vpop.eup %6154 }
 0x257   : > { %v1709_v1 = vmul.f32 %v6155_v0, %v1697_v53 }
 0x259   : > { %v1710_v2 = vmax.f32 %v1709_v1, 0.0 }
 0x25b   : > { %v1711_v3 = vpack.c.bf16 %v1710_v2, %v1710_v2 }
 0x25d   : > { %5685 = vmatmul.mubr.msk.bf16.vlgmr.msra.gmra.mxu0 %vm1730_vm3, %v1711_v3 }
 0x31d   : > { %v1768_v5 = vpop.f32.mrf.mxu0 }
 0x31e   : > { %v1769_v6 = vadd.f32 %v5296_v4, %v1768_v5 }
 0x31f   : > { %v5686_v7 = vpop.f32.mrf.mxu0 }
 0x320   : > { %1845 = vrot.lane.b32.xlu1 %v1769_v6, %s6375_s10  ;;  %v1774_v8 = vmul.f32 %v1769_v6, %v1769_v6 }
 0x321   : > { %v1771_v9 = vpop.f32.mrf.mxu0 }
 0x322   : > { %v1776_v10 = vsel %vm1775_vm4, %v1774_v8, 0.0 }
 0x323   : > { %1777 = vadd.xlane.f32.xlu0 %v1776_v10  ;;  %v5687_v11 = vpop.f32.mrf.mxu0 }
 0x339   : > { %1841 = vrot.lane.b32.xlu0 %v1595_v35, %s6376_s11 }
 0x392   : > { %v1846_v29 = vpop.permute.xlu1 %1845 }
 0x3ac   : > { %v1778_v13 = vpop.xlane.xlu0 %1777 }
 0x3ad   : > { %6156 = vrsqrt.f32 %v1778_v13  ;;  %vm1781_vm5 = vcmp.eq.f32.partialorder %v1778_v13, inf  ;;  %v1784_v16 = vand.u32 2147483648, %v1778_v13  ;;  %vm1783_vm6 = vcmp.eq.f32.partialorder %v1778_v13, 0.0 }
 0x3b0   : > { %v1842_v28 = vpop.permute.xlu0 %1841 }
 0x3b1   : > { %v1852_v30 = vsel %vm1557_vm1, %v6639_v26, %v1842_v28 }
 0x3b2   : > { %v1854_v31 = vsel %vm1853_vm8, %v1852_v30, %v1846_v29 }
 0x3ba   : > { %v6157_v14 = vpop.eup %6156 }
 0x3bb   : > { %v1780_v15 = vmul.f32 %v6157_v14, %v1778_v13 }
 0x3bd   : > { %v1782_v17 = vsel %vm1781_vm5, %v1778_v13, %v1780_v15 }
 0x3be   : > { %v1785_v18 = vsel %vm1783_vm6, %v1784_v16, %v1782_v17 }
 0x3bf   : > { %v1786_v19 = vmax.f32 %v1785_v18, 1e-12 }
 0x3c1   : > { %6158 = vrcp.f32 %v1786_v19 }
 0x3ce   : > { %v6159_v20 = vpop.eup %6158 }
 0x3cf   : > { %v1788_v21 = vmul.f32 %v6159_v20, %v1769_v6 }
 0x3d1   : > { %v1789_v22 = vpack.c.bf16 %v1788_v21, %v1788_v21 }
 0x3d3   : > { %5691 = vmatmul.mubr.msk.bf16.vlgmr.msra.gmra.mxu1 %vm1796_vm7, %v1789_v22 }
 0x493   : > { %v1834_v23 = vpop.f32.mrf.mxu1 }
 0x494   : > { %1849 = vrot.lane.b32.xlu1 %v1834_v23, %s6377_s15 }
 0x495   : > { %v5692_v24 = vpop.f32.mrf.mxu1 }
 0x497   : > { %v1837_v25 = vpop.f32.mrf.mxu1 }
 0x499   : > { %v5693_v27 = vpop.f32.mrf.mxu1 }
 0x506   : > { %v1850_v32 = vpop.permute.xlu1 %1849 }
 0x507   : > { %v1856_v33 = vsel %vm1855_vm9, %v1854_v31, %v1850_v32  ;;  %v1858_v34 = vsel %vm1857_vm10, %v1850_v32, 0.0 }
 0x508   : > { %v1861_v35 = vcombine.low %v1856_v33, %v1858_v34 }
 0x50a   : > { %5302 = vst.sshfl [vmem:[%s6579_s7] sm:$0x33 pattern:$0x76325410] %v1861_v35 }
 0x50b PF: > { %p5303_p5 = scmp.ne.s32.totalorder %s6572_s1, 1 }
 0x50c   : > { %s7356_s16 = sld [smem:[#allocation6_spill]] (!%p5303_p5)  ;;  %s7330_s18 = smov (!%p5303_p5), 64  }
 0x50d   : > { %1874 = sbr.rel (%p5303_p5) target bundleno = 9783 (0x2637), region = 156  ;;  %s6382_s22 = smov (!%p5303_p5), 96  }
 0x50e   : > { %s7328_s23 = smov (!%p5303_p5), 88   ;;  %s7326_s26 = smov (!%p5303_p5), 120  }
 0x50f   : > { %s7324_s1 = smov (!%p5303_p5), 56   ;;  %s7322_s0 = smov (!%p5303_p5), 80  }
 0x510   : > { %s7320_s2 = smov (!%p5303_p5), 112   ;;  %s7315_s10 = smov (!%p5303_p5), 48  }
 0x511   : > { %s7313_s11 = smov (!%p5303_p5), 72   ;;  %s7309_s15 = smov (!%p5303_p5), 104  }
 0x512   : > { %v1875_v26 = vld [vmem:[%s6444_s8] sm:$0xff]  ;;  %v1898_v36 = vld [vmem:[%s6454_s19 + $0x38] sm:$0xff]  ;;  %v6378_v37 = vmov 0   ;;  %v1897_v38 = vld [vmem:[%s6454_s19 + $0x30] sm:$0xff]  ;;  %v6379_v42 = vmov 0.0   ;;  %v1877_v47 = vlaneseq  ;;  %vm1899_vm11 = vcmask 523264  }
 0x513   : > { %6160 = vset.pattern.permute.xlu0 %v6378_v37  ;;  %5694 = vmatprep.subr.mxu0 %v1898_v36  ;;  %v1876_v39 = vld [vmem:[%s6444_s8 + $0x8] sm:$0xff]  ;;  %v1895_v41 = vld [vmem:[%s6454_s19 + $0x20] sm:$0xff]  ;;  %v1894_v43 = vld [vmem:[%s6454_s19 + $0x18] sm:$0xff]  ;;  %vm1990_vm14 = vcmask 261120   ;;  %vm6380_vm15 = vmmov 0   ;;  %vm2107_vm0 = vcmask 64512  }
 0x514   : > { %1880 = vperm.xlu0 %6160, %v1875_v26   ;;  %5695 = vmatpush3.msra.mxu0 %v1898_v36  ;;  %v1896_v40 = vld [vmem:[%s6454_s19 + $0x28] sm:$0xff]  ;;  %v1893_v44 = vld [vmem:[%s6454_s19 + $0x10] sm:$0xff]  ;;  %v1891_v46 = vld [vmem:[%s6454_s19] sm:$0xff]  ;;  %v6673_v48 = vand.u32 127, %v1877_v47  ;;  %vm2234_vm1 = vcmask 1043456   ;;  %vm3026_vm3 = vcmask 130048  }
 0x515   : > { %5696 = vmatprep.subr.mxu0 %v1897_v38  ;;  %5713 = vmatprep.subr.bf16.mxu1 %v6379_v42  ;;  %v1892_v45 = vld [vmem:[%s6454_s19 + $0x8] sm:$0xff]  ;;  %v1981_v54 = vld [vmem:[%s6459_s24] sm:$0xff]  ;;  %vm3029_vm4 = vcmask 195584   ;;  %s7367_s3 = smov 56   ;;  %s7368_s5 = smov 64   ;;  %vm4972_vm6 = vcmask 254976  }
 0x516   : > { %5697 = vmatpush3.msra.mxu0 %v1897_v38  ;;  %v6191_v6 = vld [vmem:[%s6474_s12 + $0x8] sm:$0xff]   ;;  %5717 = vmatprep.mubr.msk.bf16.mxu1 %vm6380_vm15, %v6379_v42  ;;  %v6192_v7 = vld [vmem:[%s6474_s12] sm:$0xff]   ;;  %vm5059_vm7 = vcmask 123904   ;;  %vm5137_vm10 = vcmask 654336  }
 0x517   : > { %5698 = vmatprep.subr.mxu0 %v1896_v40  ;;  %5714 = vmatpush3.bf16.msra.mxu1 %v6191_v6  ;;  %v5308_v16 = vld [vmem:[%s6464_s30] ss:$0 sm:$0xff] }
 0x518   : > { %1883 = vperm.xlu0 %6160, %v1876_v39   ;;  %5699 = vmatpush3.msra.mxu0 %v1896_v40  ;;  %v5309_v20 = vld [vmem:[%s7353_s6] ss:$0 sm:$0xff]  ;;  %v6733_v40 = vshrl.u32 %v1877_v47, 7 }
 0x519   : > { %5700 = vmatprep.subr.mxu0 %v1895_v41  ;;  %5715 = vmatprep.subr.bf16.mxu1 %v6379_v42  ;;  %v5310_v25 = vld [vmem:[%s7356_s16] ss:$0 sm:$0xff] }
 0x51a   : > { %5701 = vmatpush3.msra.mxu0 %v1895_v41  ;;  %vm1986_vm2 = vcmp.gt.s32.totalorder %v6673_v48, %v6733_v40 }
 0x51b   : > { %5702 = vmatprep.subr.mxu0 %v1894_v43  ;;  %5716 = vmatpush3.bf16.msra.mxu1 %v6192_v7  ;;  %v6738_v41 = vsel %vm1986_vm2, -inf, %v6379_v42 }
 0x51c   : > { %5703 = vmatpush3.msra.mxu0 %v1894_v43  ;;  %5721 = vmatprep.subr.bf16.mxu1 %v6379_v42 }
 0x51d   : > { %5704 = vmatprep.subr.mxu0 %v1893_v44 }
 0x51e   : > { %5705 = vmatpush3.msra.mxu0 %v1893_v44 }
 0x51f   : > { %5706 = vmatprep.subr.mxu0 %v1892_v45 }
 0x520   : > { %5707 = vmatpush3.msra.mxu0 %v1892_v45 }
 0x521   : > { %5708 = vmatprep.subr.mxu0 %v1891_v46 }
 0x522   : > { %5709 = vmatpush3.msra.mxu0 %v1891_v46 }
 0x523   : > { %5727 = vmatprep.subr.bf16.mxu0 %v6379_v42 }
 0x58f   : > { %v1881_v49 = vpop.permute.xlu0 %1880 }
 0x590   : > { %vm1885_vm12 = vcmp.eq.s32.totalorder %v6673_v48, %v1881_v49 }
 0x591   : > { %v5304_v50 = vsel %vm1885_vm12, 1.0, %v6379_v42  ;;  %vm5139_vm12 = vcmask 850944  }
 0x592   : > { %5710 = vmatprep.mubr.msk.f32.mxu0 %vm1899_vm11, %v5304_v50 }
 0x593   : > { %v1884_v51 = vpop.permute.xlu0 %1883 }
 0x594   : > { %vm1886_vm13 = vcmp.eq.s32.totalorder %v6673_v48, %v1884_v51 }
 0x595   : > { %v5305_v52 = vsel %vm1886_vm13, 1.0, %v6379_v42 }
 0x596   : > { %5711 = vmatmul.mubr.msk.f32.vlgmr.msra.gmra.mxu0 %vm1899_vm11, %v5305_v52 }
 0x597   : > { %5729 = vmatprep.mubr.msk.bf16.mxu0 %vm6380_vm15, %v6379_v42 }
 0x656   : > { %v5712_v53 = vpop.f32.mrf.mxu0 }
 0x657   : > { %v6684_v57 = vadd.f32 %v5712_v53, %v1981_v54 }
 0x658   : > { %v1972_v55 = vpop.f32.mrf.mxu0 }
 0x659   : > { %v6682_v56 = vadd.f32 %v1981_v54, %v1972_v55  ;;  %v1994_v59 = vsel %vm1990_vm14, %v6684_v57, 0.0 }
 0x65b   : > { %v1991_v58 = vsel %vm1990_vm14, %v6682_v56, 0.0 }
 0x65c   : > { %1992 = vadd.xlane.f32.xlu1 %v1991_v58 }
 0x660   : > { %1995 = vadd.xlane.f32.xlu1 %v1994_v59 }
 0x6e5   : > { %v1993_v60 = vpop.xlane.xlu1 %1992 }
 0x6e6   : > { %v1998_v61 = vmul.f32 0.03125, %v1993_v60 }
 0x6e8   : > { %v2000_v62 = vsub.f32 %v6682_v56, %v1998_v61 }
 0x6e9   : > { %v1996_v63 = vpop.xlane.xlu1 %1995 }
 0x6ea   : > { %v1999_v0 = vmul.f32 0.03125, %v1996_v63  ;;  %v2002_v1 = vmul.f32 %v2000_v62, %v2000_v62 }
 0x6ec   : > { %v2001_v2 = vsub.f32 %v6684_v57, %v1999_v0  ;;  %v2004_v3 = vsel %vm1990_vm14, %v2002_v1, 0.0 }
 0x6ed   : > { %2005 = vadd.xlane.f32.xlu0 %v2004_v3 }
 0x6ee   : > { %v2003_v4 = vmul.f32 %v2001_v2, %v2001_v2 }
 0x6f0   : > { %v2007_v5 = vsel %vm1990_vm14, %v2003_v4, 0.0 }
 0x6f1   : > { %2008 = vadd.xlane.f32.xlu1 %v2007_v5 }
 0x776   : > { %v2006_v8 = vpop.xlane.xlu0 %2005 }
 0x777   : > { %v2010_v9 = vmul.f32 0.03125, %v2006_v8 }
 0x779   : > { %v2012_v10 = vadd.f32 1e-05, %v2010_v9 }
 0x77a   : > { %v2009_v11 = vpop.xlane.xlu1 %2008 }
 0x77b   : > { %6226 = vrsqrt.f32 %v2012_v10  ;;  %v2011_v12 = vmul.f32 0.03125, %v2009_v11 }
 0x77d   : > { %v2013_v13 = vadd.f32 1e-05, %v2011_v12 }
 0x77f   : > { %6228 = vrsqrt.f32 %v2013_v13 }
 0x788   : > { %v6227_v14 = vpop.eup %6226 }
 0x789   : > { %v2016_v15 = vmul.f32 %v6227_v14, %v2000_v62 }
 0x78b   : > { %v2024_v19 = vmul.f32 %v5308_v16, %v2016_v15 }
 0x78c   : > { %v6229_v17 = vpop.eup %6228 }
 0x78d   : > { %v2017_v18 = vmul.f32 %v6229_v17, %v2001_v2  ;;  %v2032_v22 = vadd.f32 %v5309_v20, %v2024_v19 }
 0x78f   : > { %v2025_v21 = vmul.f32 %v5308_v16, %v2017_v18 }
 0x791   : > { %v2033_v23 = vadd.f32 %v5309_v20, %v2025_v21 }
 0x793   : > { %v2038_v24 = vpack.c.bf16 %v2033_v23, %v2032_v22 }
 0x795   : > { %5718 = vmatmul.mubr.msk.bf16.vlgmr.msra.gmra.mxu1 %vm1990_vm14, %v2038_v24 }
 0x796   : > { %5723 = vmatprep.mubr.msk.bf16.mxu1 %vm6380_vm15, %v6379_v42 }
 0x855   : > { %v2095_v27 = vpop.f32.mrf.mxu1 }
 0x856   : > { %v2096_v28 = vadd.f32 %v5310_v25, %v2095_v27 }
 0x857   : > { %v5719_v29 = vpop.f32.mrf.mxu1 }
 0x858   : > { %v6708_v30 = vpack.c.bf16 %v2096_v28, %v2096_v28 }
 0x859   : > { %v2098_v31 = vpop.f32.mrf.mxu1 }
 0x85a   : > { %v2099_v32 = vadd.f32 %v5310_v25, %v2098_v31  ;;  %2229 = vrot.lane.b32.xlu0 %v6708_v30, %s7330_s18  ;;  %2105 = vrot.lane.b32.xlu1 %v6708_v30, %s6382_s22 }
 0x85b   : > { %v5720_v33 = vpop.f32.mrf.mxu1 }
 0x85c   : > { %v6714_v34 = vpack.c.bf16 %v2099_v32, %v2099_v32 }
 0x85e   : > { %2155 = vrot.lane.b32.xlu1 %v6714_v34, %s6382_s22 }
 0x8cc   : > { %v2106_v35 = vpop.permute.xlu1 %2105  ;;  %v2230_v38 = vpop.permute.xlu0 %2229 }
 0x8cd   : > { %v2112_v26 = vsel %vm2107_vm0, %v2106_v35, 0  ;;  %v2236_v39 = vsel %vm2234_vm1, %v2230_v38, 0 }
 0x8ce   : > { %5722 = vmatpush3.bf16.xpose.msra.mxu1 %v2112_v26 }
 0x8cf   : > { %5733 = vmatprep.subr.bf16.mxu1 %v6379_v42 }
 0x8d0   : > { %v2156_v36 = vpop.permute.xlu1 %2155 }
 0x8d1   : > { %v2161_v37 = vsel %vm2107_vm0, %v2156_v36, 0 }
 0x8d2   : > { %5728 = vmatpush3.bf16.xpose.msra.mxu0 %v2161_v37 }
 0x8d3   : > { %5739 = vmatprep.subr.bf16.mxu0 %v6379_v42 }
 0x8d5   : > { %5724 = vmatmul.mubr.msk.bf16.vlgmr.msra.gmra.mxu1 %vm2107_vm0, %v6708_v30 }
 0x8d6   : > { %5734 = vmatpush3.bf16.msra.mxu1 %v2236_v39  ;;  %5735 = vmatprep.mubr.msk.bf16.mxu1 %vm6380_vm15, %v6379_v42 }
 0x8d7   : > { %5745 = vmatprep.subr.bf16.mxu1 %v6379_v42 }
 0x8d9   : > { %5730 = vmatmul.mubr.msk.bf16.vlgmr.msra.gmra.mxu0 %vm2107_vm0, %v6714_v34 }
 0x8da   : > { %5741 = vmatprep.mubr.msk.bf16.mxu0 %vm6380_vm15, %v6379_v42 }
 0x995   : > { %v2148_v43 = vpop.f32.mrf.mxu1 }
 0x996   : > { %v2203_v44 = vmul.f32 0.35355338, %v2148_v43 }
 0x997   : > { %v5725_v45 = vpop.f32.mrf.mxu1 }
 0x998   : > { %v2205_v46 = vadd.f32 %v2203_v44, %v6738_v41 }
 0x999   : > { %v2151_v49 = vpop.f32.mrf.mxu1  ;;  %v2197_v50 = vpop.f32.mrf.mxu0 }
 0x99a   : > { %v2204_v51 = vmul.f32 0.35355338, %v2197_v50  ;;  %v2207_v52 = vsel %vm2107_vm0, %v2205_v46, -inf }
 0x99b   : > { %v5731_v53 = vpop.f32.mrf.mxu0  ;;  %2208 = vmax.xlane.f32.xlu1 %v2207_v52  ;;  %v5726_v47 = vpop.f32.mrf.mxu1 }
 0x99c   : > { %v2206_v54 = vadd.f32 %v2204_v51, %v6738_v41 }
 0x99d   : > { %v2200_v55 = vpop.f32.mrf.mxu0 }
 0x99e   : > { %v2210_v58 = vsel %vm2107_vm0, %v2206_v54, -inf }
 0x99f   : > { %2211 = vmax.xlane.f32.xlu0 %v2210_v58  ;;  %v5732_v59 = vpop.f32.mrf.mxu0 }
 0x9ac   : > { %2380 = vrot.lane.b32.xlu1 %v6714_v34, %s7328_s23 }
 0x9b5   : > { %2278 = vrot.lane.b32.xlu0 %v6714_v34, %s7330_s18 }
 0x9b9   : > { %2330 = vrot.lane.b32.xlu0 %v6708_v30, %s7328_s23  ;;  %s7364_s23 = sld [smem:[#allocation14_spill]] }
 0x9bd   : > { %2328 = vrot.lane.b32.xlu0 %v6708_v30, %s7326_s26 }
 0x9c1   : > { %2378 = vrot.lane.b32.xlu0 %v6714_v34, %s7326_s26  ;;  %s7363_s26 = sld [smem:[#allocation12_spill]] }
 0x9c5   : > { %2454 = vrot.lane.b32.xlu0 %v6708_v30, %s7324_s1 }
 0xa24   : > { %v2209_v60 = vpop.xlane.xlu1 %2208 }
 0xa25   : > { %v2213_v61 = vsub.f32 %v2205_v46, %v2209_v60 }
 0xa27   : > { %v2215_v62 = vmul.f32 1.442695, %v2213_v61 }
 0xa28   : > { %v2212_v63 = vpop.xlane.xlu0 %2211  ;;  %v2381_v11 = vpop.permute.xlu1 %2380 }
 0xa29   : > { %6230 = vpow2.f32 %v2215_v62  ;;  %v2214_v0 = vsub.f32 %v2206_v54, %v2212_v63  ;;  %v2386_v13 = vsel %vm2107_vm0, %v2381_v11, 0 }
 0xa2b   : > { %v2217_v1 = vmul.f32 1.442695, %v2214_v0 }
 0xa2c   : > { %v2279_v2 = vpop.permute.xlu0 %2278 }
 0xa2d   : > { %6232 = vpow2.f32 %v2217_v1  ;;  %v2284_v3 = vsel %vm2234_vm1, %v2279_v2, 0 }
 0xa2e   : > { %5740 = vmatpush3.bf16.msra.mxu0 %v2284_v3 }
 0xa2f   : > { %5751 = vmatprep.subr.bf16.mxu0 %v6379_v42 }
 0xa30   : > { %v2331_v4 = vpop.permute.xlu0 %2330 }
 0xa31   : > { %v2336_v9 = vsel %vm2107_vm0, %v2331_v4, 0 }
 0xa34   : > { %v2329_v5 = vpop.permute.xlu0 %2328 }
 0xa36   : > { %v6758_v6 = vpop.eup %6230 }
 0xa37   : > { %v2227_v7 = vpack.c.bf16 %v6758_v6, %v6758_v6 }
 0xa38   : > { %v2379_v8 = vpop.permute.xlu0 %2378 }
 0xa39   : > { %5736 = vmatmul.mubr.msk.bf16.vlgmr.msra.gmra.mxu1 %vm2107_vm0, %v2227_v7 }
 0xa3a   : > { %v6764_v10 = vpop.eup %6232  ;;  %5746 = vmatpush3.bf16.xpose.msra.mxu1 %v2336_v9  ;;  %5747 = vmatprep.mubr.msk.bf16.mxu1 %vm6380_vm15, %v6379_v42 }
 0xa3b   : > { %v2228_v12 = vpack.c.bf16 %v6764_v10, %v6764_v10  ;;  %5757 = vmatprep.subr.bf16.mxu1 %v6379_v42 }
 0xa3c   : > { %v2455_v14 = vpop.permute.xlu0 %2454 }
 0xa3d   : > { %5742 = vmatmul.mubr.msk.bf16.vlgmr.msra.gmra.mxu0 %vm2107_vm0, %v2228_v12  ;;  %v2460_v15 = vsel %vm2234_vm1, %v2455_v14, 0 }
 0xa3e   : > { %5752 = vmatpush3.bf16.xpose.msra.mxu0 %v2386_v13  ;;  %5753 = vmatprep.mubr.msk.bf16.mxu0 %vm6380_vm15, %v6379_v42 }
 0xa3f   : > { %5763 = vmatprep.subr.bf16.mxu0 %v6379_v42 }
 0xa41   : > { %5748 = vmatmul.mubr.msk.bf16.vlgmr.msra.gmra.mxu1 %vm2107_vm0, %v2329_v5 }
 0xa42   : > { %5758 = vmatpush3.bf16.msra.mxu1 %v2460_v15  ;;  %5759 = vmatprep.mubr.msk.bf16.mxu1 %vm6380_vm15, %v6379_v42 }
 0xa43   : > { %5769 = vmatprep.subr.bf16.mxu1 %v6379_v42 }
 0xa45   : > { %5754 = vmatmul.mubr.msk.bf16.vlgmr.msra.gmra.mxu0 %vm2107_vm0, %v2379_v8 }
 0xa46   : > { %5765 = vmatprep.mubr.msk.bf16.mxu0 %vm6380_vm15, %v6379_v42 }
 0xaf9   : > { %v6784_v16 = vpop.f32.mrf.mxu1 }
 0xafb   : > { %v5737_v17 = vpop.f32.mrf.mxu1 }
 0xafd   : > { %v2275_v18 = vpop.f32.mrf.mxu1  ;;  %v6786_v19 = vpop.f32.mrf.mxu0 }
 0xaff   : > { %v5738_v20 = vpop.f32.mrf.mxu1  ;;  %v5743_v21 = vpop.f32.mrf.mxu0 }
 0xb01   : > { %v2323_v22 = vpop.f32.mrf.mxu0  ;;  %v2372_v23 = vpop.f32.mrf.mxu1 }
 0xb02   : > { %v2428_v24 = vmul.f32 0.35355338, %v2372_v23 }
 0xb03   : > { %v5744_v25 = vpop.f32.mrf.mxu0  ;;  %v5749_v27 = vpop.f32.mrf.mxu1 }
 0xb04   : > { %v2430_v28 = vadd.f32 %v2428_v24, %v6738_v41 }
 0xb05   : > { %v2375_v29 = vpop.f32.mrf.mxu1  ;;  %v2422_v31 = vpop.f32.mrf.mxu0 }
 0xb06   : > { %v2429_v32 = vmul.f32 0.35355338, %v2422_v31  ;;  %v2432_v33 = vsel %vm2107_vm0, %v2430_v28, -inf }
 0xb07   : > { %v5755_v35 = vpop.f32.mrf.mxu0  ;;  %2433 = vmax.xlane.f32.xlu0 %v2432_v33  ;;  %v5750_v26 = vpop.f32.mrf.mxu1 }
 0xb08   : > { %v2431_v36 = vadd.f32 %v2429_v32, %v6738_v41 }
 0xb09   : > { %v2425_v37 = vpop.f32.mrf.mxu0 }
 0xb0a   : > { %v2435_v38 = vsel %vm2107_vm0, %v2431_v36, -inf }
 0xb0b   : > { %2436 = vmax.xlane.f32.xlu1 %v2435_v38  ;;  %v5756_v39 = vpop.f32.mrf.mxu0 }
 0xb1c   : > { %2502 = vrot.lane.b32.xlu1 %v6714_v34, %s7324_s1  ;;  %s7362_s1 = sld [smem:[#allocation13_spill]] }
 0xb1d   : > { %2554 = vrot.lane.b32.xlu0 %v6708_v30, %s7322_s0 }
 0xb20   : > { %2552 = vrot.lane.b32.xlu1 %v6708_v30, %s7320_s2 }
 0xb21   : > { %2604 = vrot.lane.b32.xlu0 %v6714_v34, %s7322_s0  ;;  %s7361_s0 = sld [smem:[#allocation10_spill]] }
 0xb25   : > { %2602 = vrot.lane.b32.xlu0 %v6714_v34, %s7320_s2  ;;  %s7360_s2 = sld [smem:[#allocation9_spill]] }
 0xb90   : > { %v2434_v43 = vpop.xlane.xlu0 %2433 }
 0xb91   : > { %v2438_v44 = vsub.f32 %v2430_v28, %v2434_v43 }
 0xb93   : > { %v2440_v45 = vmul.f32 1.442695, %v2438_v44 }
 0xb94   : > { %v2437_v46 = vpop.xlane.xlu1 %2436  ;;  %v2555_v53 = vpop.permute.xlu0 %2554 }
 0xb95   : > { %6234 = vpow2.f32 %v2440_v45  ;;  %v2439_v49 = vsub.f32 %v2431_v36, %v2437_v46  ;;  %v2560_v55 = vsel %vm2107_vm0, %v2555_v53, 0 }
 0xb97   : > { %v2442_v50 = vmul.f32 1.442695, %v2439_v49 }
 0xb98   : > { %v2503_v51 = vpop.permute.xlu1 %2502  ;;  %v2605_v59 = vpop.permute.xlu0 %2604 }
 0xb99   : > { %6236 = vpow2.f32 %v2442_v50  ;;  %v2508_v52 = vsel %vm2234_vm1, %v2503_v51, 0  ;;  %v2610_v61 = vsel %vm2107_vm0, %v2605_v59, 0 }
 0xb9a   : > { %5764 = vmatpush3.bf16.msra.mxu0 %v2508_v52 }
 0xb9b   : > { %5775 = vmatprep.subr.bf16.mxu0 %v6379_v42 }
 0xb9c   : > { %v2553_v62 = vpop.permute.xlu1 %2552  ;;  %v2603_v63 = vpop.permute.xlu0 %2602 }
 0xba2   : > { %v6804_v47 = vpop.eup %6234 }
 0xba3   : > { %v2452_v54 = vpack.c.bf16 %v6804_v47, %v6804_v47 }
 0xba5   : > { %5760 = vmatmul.mubr.msk.bf16.vlgmr.msra.gmra.mxu1 %vm2107_vm0, %v2452_v54 }
 0xba6   : > { %v6810_v58 = vpop.eup %6236  ;;  %5770 = vmatpush3.bf16.xpose.msra.mxu1 %v2560_v55  ;;  %5771 = vmatprep.mubr.msk.bf16.mxu1 %vm6380_vm15, %v6379_v42 }
 0xba7   : > { %v2453_v60 = vpack.c.bf16 %v6810_v58, %v6810_v58  ;;  %5781 = vmatprep.subr.bf16.mxu1 %v6379_v42 }
 0xba9   : > { %5766 = vmatmul.mubr.msk.bf16.vlgmr.msra.gmra.mxu0 %vm2107_vm0, %v2453_v60 }
 0xbaa   : > { %5776 = vmatpush3.bf16.xpose.msra.mxu0 %v2610_v61  ;;  %5777 = vmatprep.mubr.msk.bf16.mxu0 %vm6380_vm15, %v6379_v42 }
 0xbab   : > { %5787 = vmatprep.subr.bf16.mxu0 %v6379_v42 }
 0xbad   : > { %5772 = vmatmul.mubr.msk.bf16.vlgmr.msra.gmra.mxu1 %vm2107_vm0, %v2553_v62 }
 0xbae   : > { %5783 = vmatprep.mubr.msk.bf16.mxu1 %vm6380_vm15, %v6379_v42 }
 0xbb1   : > { %5778 = vmatmul.mubr.msk.bf16.vlgmr.msra.gmra.mxu0 %vm2107_vm0, %v2603_v63 }
 0xbb2   : > { %5789 = vmatprep.mubr.msk.bf16.mxu0 %vm6380_vm15, %v6379_v42 }
 0xc65   : > { %v6828_v0 = vpop.f32.mrf.mxu1 }
 0xc67   : > { %v5761_v1 = vpop.f32.mrf.mxu1 }
 0xc69   : > { %v2499_v2 = vpop.f32.mrf.mxu1  ;;  %v6830_v3 = vpop.f32.mrf.mxu0 }
 0xc6b   : > { %v5762_v4 = vpop.f32.mrf.mxu1  ;;  %v5767_v5 = vpop.f32.mrf.mxu0 }
 0xc6d   : > { %v2547_v7 = vpop.f32.mrf.mxu0  ;;  %v2596_v8 = vpop.f32.mrf.mxu1 }
 0xc6e   : > { %v2652_v9 = vmul.f32 0.35355338, %v2596_v8 }
 0xc6f   : > { %v5768_v11 = vpop.f32.mrf.mxu0  ;;  %v5773_v12 = vpop.f32.mrf.mxu1 }
 0xc70   : > { %v2654_v13 = vadd.f32 %v2652_v9, %v6738_v41 }
 0xc71   : > { %v2599_v14 = vpop.f32.mrf.mxu1  ;;  %v2646_v15 = vpop.f32.mrf.mxu0 }
 0xc72   : > { %v2653_v17 = vmul.f32 0.35355338, %v2646_v15  ;;  %v2656_v18 = vsel %vm2107_vm0, %v2654_v13, -inf }
 0xc73   : > { %v5779_v20 = vpop.f32.mrf.mxu0  ;;  %2657 = vmax.xlane.f32.xlu1 %v2656_v18  ;;  %v5774_v21 = vpop.f32.mrf.mxu1 }
 0xc74   : > { %v2655_v22 = vadd.f32 %v2653_v17, %v6738_v41  ;;  %v2444_v20 = vsel %vm2107_vm0, %v6804_v47, 0.0  ;;  %v2447_v21 = vsel %vm2107_vm0, %v6810_v58, 0.0 }
 0xc75   : > { %v2649_v23 = vpop.f32.mrf.mxu0 }
 0xc76   : > { %v2659_v24 = vsel %vm2107_vm0, %v2655_v22, -inf }
 0xc77   : > { %2660 = vmax.xlane.f32.xlu0 %v2659_v24  ;;  %v5780_v25 = vpop.f32.mrf.mxu0 }
 0xc84   : > { %2726 = vrot.lane.b32.xlu1 %v6714_v34, %s7315_s10 }
 0xc88   : > { %2778 = vrot.lane.b32.xlu1 %v6708_v30, %s7313_s11 }
 0xc8c   : > { %2776 = vrot.lane.b32.xlu1 %v6708_v30, %s7309_s15 }
 0xc8d   : > { %2678 = vrot.lane.b32.xlu0 %v6708_v30, %s7315_s10  ;;  %s7318_s10 = smov 16  }
 0xc91   : > { %2828 = vrot.lane.b32.xlu0 %v6714_v34, %s7313_s11  ;;  %s7317_s11 = smov 8  }
 0xc95   : > { %2826 = vrot.lane.b32.xlu0 %v6714_v34, %s7309_s15  ;;  %s7311_s15 = smov 40  }
 0xcfc   : > { %v2658_v27 = vpop.xlane.xlu1 %2657 }
 0xcfd   : > { %v2662_v28 = vsub.f32 %v2654_v13, %v2658_v27 }
 0xcff   : > { %v2664_v29 = vmul.f32 1.442695, %v2662_v28 }
 0xd00   : > { %v2661_v31 = vpop.xlane.xlu0 %2660  ;;  %v2727_v32 = vpop.permute.xlu1 %2726 }
 0xd01   : > { %6238 = vpow2.f32 %v2664_v29  ;;  %v2663_v33 = vsub.f32 %v2655_v22, %v2661_v31  ;;  %v2732_v35 = vsel %vm2234_vm1, %v2727_v32, 0 }
 0xd02   : > { %5788 = vmatpush3.bf16.msra.mxu0 %v2732_v35 }
 0xd03   : > { %v2666_v26 = vmul.f32 1.442695, %v2663_v33  ;;  %5799 = vmatprep.subr.bf16.mxu0 %v6379_v42 }
 0xd04   : > { %v2679_v36 = vpop.permute.xlu0 %2678  ;;  %v2779_v39 = vpop.permute.xlu1 %2778 }
 0xd05   : > { %6240 = vpow2.f32 %v2666_v26  ;;  %v2684_v37 = vsel %vm2234_vm1, %v2679_v36, 0  ;;  %v2784_v44 = vsel %vm2107_vm0, %v2779_v39, 0  ;;  %v2222_v39 = vsel %vm2107_vm0, %v6764_v10, 0.0 }
 0xd06   : > { %5782 = vmatpush3.bf16.msra.mxu1 %v2684_v37  ;;  %v2219_v37 = vsel %vm2107_vm0, %v6758_v6, 0.0 }
 0xd07   : > { %5793 = vmatprep.subr.bf16.mxu1 %v6379_v42 }
 0xd08   : > { %v2829_v46 = vpop.permute.xlu0 %2828  ;;  %v2777_v51 = vpop.permute.xlu1 %2776 }
 0xd09   : > { %v2834_v50 = vsel %vm2107_vm0, %v2829_v46, 0 }
 0xd0c   : > { %v2827_v52 = vpop.permute.xlu0 %2826 }
 0xd0e   : > { %v6239_v38 = vpop.eup %6238 }
 0xd0f   : > { %v2676_v43 = vpack.c.bf16 %v6239_v38, %v6239_v38  ;;  %v2668_v23 = vsel %vm2107_vm0, %v6239_v38, 0.0 }
 0xd11   : > { %5784 = vmatmul.mubr.msk.bf16.vlgmr.msra.gmra.mxu1 %vm2107_vm0, %v2676_v43 }
 0xd12   : > { %v6241_v45 = vpop.eup %6240  ;;  %5794 = vmatpush3.bf16.xpose.msra.mxu1 %v2784_v44  ;;  %5795 = vmatprep.mubr.msk.bf16.mxu1 %vm6380_vm15, %v6379_v42 }
 0xd13   : > { %v2677_v49 = vpack.c.bf16 %v6241_v45, %v6241_v45  ;;  %5805 = vmatprep.subr.bf16.mxu1 %v6379_v42  ;;  %v2671_v22 = vsel %vm2107_vm0, %v6241_v45, 0.0 }
 0xd15   : > { %5790 = vmatmul.mubr.msk.bf16.vlgmr.msra.gmra.mxu0 %vm2107_vm0, %v2677_v49 }
 0xd16   : > { %5800 = vmatpush3.bf16.xpose.msra.mxu0 %v2834_v50  ;;  %5801 = vmatprep.mubr.msk.bf16.mxu0 %vm6380_vm15, %v6379_v42 }
 0xd17   : > { %5811 = vmatprep.subr.bf16.mxu0 %v6379_v42 }
 0xd19   : > { %5796 = vmatmul.mubr.msk.bf16.vlgmr.msra.gmra.mxu1 %vm2107_vm0, %v2777_v51 }
 0xd1a   : > { %5807 = vmatprep.mubr.msk.bf16.mxu1 %vm6380_vm15, %v6379_v42 }
 0xd1d   : > { %5802 = vmatmul.mubr.msk.bf16.vlgmr.msra.gmra.mxu0 %vm2107_vm0, %v2827_v52 }
 0xd1e   : > { %5813 = vmatprep.mubr.msk.bf16.mxu0 %vm6380_vm15, %v6379_v42 }
 0xdd1   : > { %v6868_v53 = vpop.f32.mrf.mxu1 }
 0xdd3   : > { %v5785_v54 = vpop.f32.mrf.mxu1 }
 0xdd5   : > { %v2723_v55 = vpop.f32.mrf.mxu1  ;;  %v6870_v59 = vpop.f32.mrf.mxu0 }
 0xdd7   : > { %v5786_v60 = vpop.f32.mrf.mxu1  ;;  %v5791_v61 = vpop.f32.mrf.mxu0 }
 0xdd9   : > { %v2771_v62 = vpop.f32.mrf.mxu0  ;;  %v2820_v63 = vpop.f32.mrf.mxu1 }
 0xdda   : > { %v2876_v1 = vmul.f32 0.35355338, %v2820_v63 }
 0xddb   : > { %v5792_v2 = vpop.f32.mrf.mxu0  ;;  %v5797_v4 = vpop.f32.mrf.mxu1 }
 0xddc   : > { %v2878_v5 = vadd.f32 %v2876_v1, %v6738_v41 }
 0xddd   : > { %v2823_v7 = vpop.f32.mrf.mxu1  ;;  %v2870_v8 = vpop.f32.mrf.mxu0 }
 0xdde   : > { %v2877_v9 = vmul.f32 0.35355338, %v2870_v8  ;;  %v2880_v11 = vsel %vm2107_vm0, %v2878_v5, -inf }
 0xddf   : > { %v5803_v12 = vpop.f32.mrf.mxu0  ;;  %2881 = vmax.xlane.f32.xlu1 %v2880_v11  ;;  %v5798_v13 = vpop.f32.mrf.mxu1 }
 0xde0   : > { %v2879_v14 = vadd.f32 %v2877_v9, %v6738_v41 }
 0xde1   : > { %v2873_v15 = vpop.f32.mrf.mxu0 }
 0xde2   : > { %v2883_v17 = vsel %vm2107_vm0, %v2879_v14, -inf }
 0xde3   : > { %2884 = vmax.xlane.f32.xlu0 %v2883_v17  ;;  %v5804_v18 = vpop.f32.mrf.mxu0 }
 0xdf0   : > { %2950 = vrot.lane.b32.xlu1 %v6714_v34, %s7311_s15 }
 0xdf9   : > { %2902 = vrot.lane.b32.xlu0 %v6708_v30, %s7311_s15  ;;  %s7357_s15 = sld [smem:[#allocation7_spill]] }
 0xdff   : > { %v6193_v62 = vld [vmem:[%s7357_s15 + $0x8] sm:$0xff]   ;;  %v6194_v63 = vld [vmem:[%s7357_s15] sm:$0xff]  }
 0xe14   : > { %2445 = vadd.xlane.f32.xlu1 %v2444_v20 }
 0xe18   : > { %2448 = vadd.xlane.f32.xlu0 %v2447_v21  ;;  %2672 = vadd.xlane.f32.xlu1 %v2671_v22 }
 0xe1c   : > { %2669 = vadd.xlane.f32.xlu0 %v2668_v23 }
 0xe68   : > { %v2882_v24 = vpop.xlane.xlu1 %2881 }
 0xe69   : > { %v2886_v25 = vsub.f32 %v2878_v5, %v2882_v24 }
 0xe6b   : > { %v2888_v34 = vmul.f32 1.442695, %v2886_v25 }
 0xe6c   : > { %v2885_v27 = vpop.xlane.xlu0 %2884  ;;  %v2951_v28 = vpop.permute.xlu1 %2950 }
 0xe6d   : > { %6242 = vpow2.f32 %v2888_v34  ;;  %v2887_v30 = vsub.f32 %v2879_v14, %v2885_v27  ;;  %v2956_v47 = vsel %vm2234_vm1, %v2951_v28, 0 }
 0xe6e   : > { %5812 = vmatpush3.bf16.msra.mxu0 %v2956_v47 }
 0xe6f   : > { %v2890_v29 = vmul.f32 1.442695, %v2887_v30  ;;  %5825 = vmatprep.subr.bf16.mxu0 %v6379_v42 }
 0xe70   : > { %v2903_v58 = vpop.permute.xlu0 %2902 }
 0xe71   : > { %6244 = vpow2.f32 %v2890_v29  ;;  %v2908_v31 = vsel %vm2234_vm1, %v2903_v58, 0 }
 0xe72   : > { %5806 = vmatpush3.bf16.msra.mxu1 %v2908_v31 }
 0xe73   : > { %5817 = vmatprep.subr.bf16.mxu1 %v6379_v42 }
 0xe7a   : > { %v6243_v32 = vpop.eup %6242 }
 0xe7b   : > { %v2892_v33 = vsel %vm2107_vm0, %v6243_v32, 0.0  ;;  %v2900_v35 = vpack.c.bf16 %v6243_v32, %v6243_v32 }
 0xe7c   : > { %2893 = vadd.xlane.f32.xlu0 %v2892_v33 }
 0xe7d   : > { %5808 = vmatmul.mubr.msk.bf16.vlgmr.msra.gmra.mxu1 %vm2107_vm0, %v2900_v35 }
 0xe7e   : > { %v6245_v26 = vpop.eup %6244  ;;  %5821 = vmatprep.mubr.msk.bf16.mxu1 %vm6380_vm15, %v6379_v42  ;;  %5818 = vmatpush3.bf16.msra.mxu1 %v6193_v62 }
 0xe7f   : > { %v2895_v36 = vsel %vm2107_vm0, %v6245_v26, 0.0  ;;  %v2901_v38 = vpack.c.bf16 %v6245_v26, %v6245_v26  ;;  %5819 = vmatprep.subr.bf16.mxu1 %v6379_v42 }
 0xe80   : > { %2896 = vadd.xlane.f32.xlu1 %v2895_v36  ;;  %2220 = vadd.xlane.f32.xlu0 %v2219_v37 }
 0xe81   : > { %5814 = vmatmul.mubr.msk.bf16.vlgmr.msra.gmra.mxu0 %vm2107_vm0, %v2901_v38 }
 0xe82   : > { %5829 = vmatprep.mubr.msk.bf16.mxu0 %vm6380_vm15, %v6379_v42  ;;  %5820 = vmatpush3.bf16.msra.mxu1 %v6194_v63 }
 0xe83   : > { %5833 = vmatprep.subr.bf16.mxu1 %v6379_v42 }
 0xe84   : > { %2223 = vadd.xlane.f32.xlu1 %v2222_v39 }
 0xe9d   : > { %v2446_v43 = vpop.xlane.xlu1 %2445 }
 0xe9e   : > { %6246 = vrcp.f32 %v2446_v43 }
 0xea1   : > { %v2449_v44 = vpop.xlane.xlu0 %2448  ;;  %v2673_v45 = vpop.xlane.xlu1 %2672 }
 0xea2   : > { %6248 = vrcp.f32 %v2449_v44 }
 0xea3   : > { %6250 = vrcp.f32 %v2673_v45 }
 0xea5   : > { %v2670_v46 = vpop.xlane.xlu0 %2669 }
 0xea6   : > { %6252 = vrcp.f32 %v2670_v46 }
 0xeab   : > { %v6247_v6 = vpop.eup %6246 }
 0xeac   : > { %v2550_v50 = vmul.f32 %v6247_v6, %v6828_v0 }
 0xeaf   : > { %v6249_v49 = vpop.eup %6248 }
 0xeb0   : > { %v2551_v51 = vmul.f32 %v6249_v49, %v6830_v3  ;;  %v6251_v52 = vpop.eup %6250 }
 0xeb1   : > { %v2775_v60 = vmul.f32 %v6251_v52, %v6870_v59 }
 0xeb2   : > { %v6161_v54 = vpack.i.bf16 %v2551_v51, %v2550_v50 }
 0xeb3   : > { %v6253_v10 = vpop.eup %6252 }
 0xeb4   : > { %6162 = vrot.lane.b32.xlu0 %v6161_v54, %s7317_s11  ;;  %v2774_v55 = vmul.f32 %v6253_v10, %v6868_v53  ;;  %s7319_s11 = smov 24  }
 0xeb6   : > { %v6166_v61 = vpack.i.bf16 %v2775_v60, %v2774_v55 }
 0xeb8   : > { %6167 = vrot.lane.b32.xlu1 %v6166_v61, %s7318_s10  ;;  %s7358_s10 = sld [smem:[#allocation8_spill]] }
 0xebe   : > { %v5333_v36 = vld [vmem:[%s7358_s10] ss:$0 sm:$0xff] }
 0xf05   : > { %v2894_v0 = vpop.xlane.xlu0 %2893 }
 0xf06   : > { %6254 = vrcp.f32 %v2894_v0 }
 0xf09   : > { %v2897_v3 = vpop.xlane.xlu1 %2896  ;;  %v2221_v15 = vpop.xlane.xlu0 %2220 }
 0xf0a   : > { %6256 = vrcp.f32 %v2897_v3 }
 0xf0b   : > { %6258 = vrcp.f32 %v2221_v15 }
 0xf0d   : > { %v2224_v17 = vpop.xlane.xlu1 %2223 }
 0xf0e   : > { %6260 = vrcp.f32 %v2224_v17 }
 0xf13   : > { %v6255_v2 = vpop.eup %6254 }
 0xf17   : > { %v6257_v59 = vpop.eup %6256 }
 0xf18   : > { %v6259_v20 = vpop.eup %6258 }
 0xf19   : > { %v2326_v27 = vmul.f32 %v6259_v20, %v6784_v16  ;;  %v6198_v20 = vld [vmem:[%s7362_s1 + $0x30] sm:$0xff]  }
 0xf1b   : > { %v6261_v22 = vpop.eup %6260 }
 0xf1c   : > { %v2327_v28 = vmul.f32 %v6261_v22, %v6786_v19  ;;  %v6200_v22 = vld [vmem:[%s7362_s1 + $0x20] sm:$0xff]  }
 0xf26   : > { %v6163_v18 = vpop.permute.xlu0 %6162 }
 0xf27   : > { %v6165_v23 = vunpack.i.h.bf16 %v6163_v18  ;;  %v6164_v24 = vunpack.i.l.bf16 %v6163_v18  ;;  %v6197_v18 = vld [vmem:[%s7362_s1 + $0x38] sm:$0xff]  }
 0xf29   : > { %v3024_v47 = vsel %vm2107_vm0, %v2326_v27, %v6164_v24  ;;  %v3025_v29 = vsel %vm2107_vm0, %v2327_v28, %v6165_v23  ;;  %v6201_v23 = vld [vmem:[%s7362_s1 + $0x18] sm:$0xff]   ;;  %v6202_v24 = vld [vmem:[%s7362_s1 + $0x10] sm:$0xff]   ;;  %v5336_v27 = vld [vmem:[%s7363_s26] ss:$0 sm:$0xff] }
 0xf2a   : > { %v6168_v21 = vpop.permute.xlu1 %6167 }
 0xf2b   : > { %v6170_v25 = vunpack.i.h.bf16 %v6168_v21  ;;  %v6169_v34 = vunpack.i.l.bf16 %v6168_v21  ;;  %v6199_v21 = vld [vmem:[%s7362_s1 + $0x28] sm:$0xff]  }
 0xf2d   : > { %v3028_v32 = vsel %vm3026_vm3, %v3025_v29, %v6170_v25  ;;  %v3027_v33 = vsel %vm3026_vm3, %v3024_v47, %v6169_v34  ;;  %v6203_v25 = vld [vmem:[%s7362_s1 + $0x8] sm:$0xff]   ;;  %v6204_v34 = vld [vmem:[%s7362_s1] sm:$0xff]  }
 0xf3d   : > { %v2944_v1 = vpop.f32.mrf.mxu1 }
 0xf3e   : > { %v2998_v7 = vmul.f32 %v6255_v2, %v2944_v1 }
 0xf3f   : > { %v5809_v53 = vpop.f32.mrf.mxu1 }
 0xf41   : > { %v2947_v4 = vpop.f32.mrf.mxu1  ;;  %v2992_v5 = vpop.f32.mrf.mxu0 }
 0xf42   : > { %v2999_v8 = vmul.f32 %v6257_v59, %v2992_v5 }
 0xf43   : > { %v5810_v9 = vpop.f32.mrf.mxu1  ;;  %v5815_v11 = vpop.f32.mrf.mxu0 }
 0xf44   : > { %v6171_v12 = vpack.i.bf16 %v2999_v8, %v2998_v7  ;;  %v5334_v7 = vld [vmem:[%s7360_s2] ss:$0 sm:$0xff] }
 0xf45   : > { %v2995_v13 = vpop.f32.mrf.mxu0 }
 0xf46   : > { %6172 = vrot.lane.b32.xlu1 %v6171_v12, %s7319_s11  ;;  %s7359_s11 = sld [smem:[#allocation11_spill]]  ;;  %v5335_v12 = vld [vmem:[%s7361_s0] ss:$0 sm:$0xff] }
 0xf47   : > { %v5816_v14 = vpop.f32.mrf.mxu0 }
 0xf4c   : > { %v6195_v62 = vld [vmem:[%s7359_s11 + $0x8] sm:$0xff]   ;;  %v6196_v0 = vld [vmem:[%s7359_s11] sm:$0xff]  }
 0xf4d   : > { %5826 = vmatpush3.bf16.msra.mxu0 %v6195_v62 }
 0xf4e   : > { %5827 = vmatprep.subr.bf16.mxu0 %v6379_v42 }
 0xf51   : > { %5828 = vmatpush3.bf16.msra.mxu0 %v6196_v0 }
 0xf52   : > { %5853 = vmatprep.subr.bf16.mxu0 %v6379_v42 }
 0xfb8   : > { %v6173_v30 = vpop.permute.xlu1 %6172 }
 0xfb9   : > { %v6175_v58 = vunpack.i.h.bf16 %v6173_v30  ;;  %v6174_v31 = vunpack.i.l.bf16 %v6173_v30 }
 0xfbb   : > { %v3031_v35 = vsel %vm3029_vm4, %v3028_v32, %v6175_v58  ;;  %v3030_v16 = vsel %vm3029_vm4, %v3027_v33, %v6174_v31 }
 0xfbc   : > { %v3036_v26 = vpack.c.bf16 %v3031_v35, %v3030_v16 }
 0xfbe   : > { %5822 = vmatmul.mubr.msk.bf16.vlgmr.msra.gmra.mxu1 %vm1990_vm14, %v3036_v26 }
 0xfbf   : > { %5849 = vmatprep.mubr.msk.bf16.mxu1 %vm6380_vm15, %v6379_v42  ;;  %5834 = vmatpush3.bf16.msra.mxu1 %v6197_v18 }
 0xfc0   : > { %5835 = vmatprep.subr.bf16.mxu1 %v6379_v42 }
 0xfc3   : > { %5836 = vmatpush3.bf16.msra.mxu1 %v6198_v20 }
 0xfc4   : > { %5837 = vmatprep.subr.bf16.mxu1 %v6379_v42 }
 0xfc7   : > { %5838 = vmatpush3.bf16.msra.mxu1 %v6199_v21 }
 0xfc8   : > { %5839 = vmatprep.subr.bf16.mxu1 %v6379_v42 }
 0xfcb   : > { %5840 = vmatpush3.bf16.msra.mxu1 %v6200_v22  ;;  %v5354_v22 = vld [vmem:[%s7353_s6 + $0x1] ss:$0 sm:$0xff]  ;;  %s7371_s6 = smov 48  }
 0xfcc   : > { %5841 = vmatprep.subr.bf16.mxu1 %v6379_v42 }
 0xfcf   : > { %5842 = vmatpush3.bf16.msra.mxu1 %v6201_v23 }
 0xfd0   : > { %5843 = vmatprep.subr.bf16.mxu1 %v6379_v42 }
 0xfd3   : > { %5844 = vmatpush3.bf16.msra.mxu1 %v6202_v24 }
 0xfd4   : > { %5845 = vmatprep.subr.bf16.mxu1 %v6379_v42 }
 0xfd7   : > { %5846 = vmatpush3.bf16.msra.mxu1 %v6203_v25 }
 0xfd8   : > { %5847 = vmatprep.subr.bf16.mxu1 %v6379_v42 }
 0xfdb   : > { %5848 = vmatpush3.bf16.msra.mxu1 %v6204_v34 }
 0xfdc   : > { %5879 = vmatprep.subr.bf16.mxu1 %v6379_v42 }
0x107e   : > { %v3086_v19 = vpop.f32.mrf.mxu1 }
0x107f   : > { %v3093_v37 = vadd.f32 %v3086_v19, %v6682_v56 }
0x1080   : > { %v5823_v38 = vpop.f32.mrf.mxu1 }
0x1081   : > { %v6926_v39 = vadd.f32 %v5333_v36, %v3093_v37 }
0x1082   : > { %v3089_v43 = vpop.f32.mrf.mxu1 }
0x1083   : > { %v3094_v44 = vadd.f32 %v3089_v43, %v6684_v57  ;;  %v3106_v45 = vsel %vm1990_vm14, %v6926_v39, 0.0 }
0x1084   : > { %3107 = vadd.xlane.f32.xlu0 %v3106_v45  ;;  %v5824_v46 = vpop.f32.mrf.mxu1 }
0x1085   : > { %v6931_v6 = vadd.f32 %v5333_v36, %v3094_v44 }
0x1087   : > { %v3109_v49 = vsel %vm1990_vm14, %v6931_v6, 0.0 }
0x1088   : > { %3110 = vadd.xlane.f32.xlu1 %v3109_v49 }
0x110d   : > { %v3108_v56 = vpop.xlane.xlu0 %3107 }
0x110e   : > { %v3112_v50 = vmul.f32 0.03125, %v3108_v56  ;;  %v5350_v56 = vld [vmem:[%s7364_s23] ss:$0 sm:$0xff] }
0x1110   : > { %v3114_v51 = vsub.f32 %v6926_v39, %v3112_v50 }
0x1111   : > { %v3111_v52 = vpop.xlane.xlu1 %3110 }
0x1112   : > { %v3113_v54 = vmul.f32 0.03125, %v3111_v52  ;;  %v3116_v57 = vmul.f32 %v3114_v51, %v3114_v51 }
0x1114   : > { %v3115_v10 = vsub.f32 %v6931_v6, %v3113_v54  ;;  %v3118_v55 = vsel %vm1990_vm14, %v3116_v57, 0.0 }
0x1115   : > { %3119 = vadd.xlane.f32.xlu0 %v3118_v55 }
0x1116   : > { %v3117_v60 = vmul.f32 %v3115_v10, %v3115_v10 }
0x1118   : > { %v3121_v61 = vsel %vm1990_vm14, %v3117_v60, 0.0 }
0x1119   : > { %3122 = vadd.xlane.f32.xlu0 %v3121_v61 }
0x119e   : > { %v3120_v3 = vpop.xlane.xlu0 %3119 }
0x119f   : > { %v3124_v63 = vmul.f32 0.03125, %v3120_v3 }
0x11a1   : > { %v3126_v1 = vadd.f32 1e-05, %v3124_v63 }
0x11a2   : > { %v3123_v53 = vpop.xlane.xlu0 %3122 }
0x11a3   : > { %6262 = vrsqrt.f32 %v3126_v1  ;;  %v3125_v2 = vmul.f32 0.03125, %v3123_v53 }
0x11a5   : > { %v3127_v59 = vadd.f32 1e-05, %v3125_v2 }
0x11a7   : > { %6264 = vrsqrt.f32 %v3127_v59 }
0x11b0   : > { %v6263_v4 = vpop.eup %6262 }
0x11b1   : > { %v3130_v5 = vmul.f32 %v6263_v4, %v3114_v51  ;;  %v6205_v4 = vld [vmem:[%s6474_s12 + $0x18] sm:$0xff]  }
0x11b3   : > { %v3138_v11 = vmul.f32 %v5334_v7, %v3130_v5  ;;  %v6206_v5 = vld [vmem:[%s6474_s12 + $0x10] sm:$0xff]  }
0x11b4   : > { %v6265_v8 = vpop.eup %6264 }
0x11b5   : > { %v3131_v9 = vmul.f32 %v6265_v8, %v3115_v10  ;;  %v3146_v14 = vadd.f32 %v5335_v12, %v3138_v11 }
0x11b7   : > { %v3139_v13 = vmul.f32 %v5334_v7, %v3131_v9 }
0x11b9   : > { %v3147_v15 = vadd.f32 %v5335_v12, %v3139_v13 }
0x11bb   : > { %v3152_v17 = vpack.c.bf16 %v3147_v15, %v3146_v14 }
0x11bd   : > { %5830 = vmatmul.mubr.msk.bf16.vlgmr.msra.gmra.mxu0 %vm1990_vm14, %v3152_v17  ;;  %v5353_v17 = vld [vmem:[%s6464_s30 + $0x1] ss:$0 sm:$0xff] }
0x11be   : > { %5857 = vmatprep.mubr.msk.bf16.mxu0 %vm6380_vm15, %v6379_v42  ;;  %5854 = vmatpush3.bf16.msra.mxu0 %v6205_v4 }
0x11bf   : > { %5855 = vmatprep.subr.bf16.mxu0 %v6379_v42 }
0x11c2   : > { %5856 = vmatpush3.bf16.msra.mxu0 %v6206_v5 }
0x11c3   : > { %5861 = vmatprep.subr.bf16.mxu0 %v6379_v42 }
0x127d   : > { %v3209_v28 = vpop.f32.mrf.mxu0 }
0x127e   : > { %v3210_v30 = vadd.f32 %v5336_v27, %v3209_v28 }
0x127f   : > { %v5831_v47 = vpop.f32.mrf.mxu0 }
0x1280   : > { %v5340_v29 = vmul.f32 -1.702, %v3210_v30 }
0x1281   : > { %v3212_v58 = vpop.f32.mrf.mxu0 }
0x1282   : > { %v3220_v31 = vmul.f32 1.442695, %v5340_v29  ;;  %v3213_v32 = vadd.f32 %v5336_v27, %v3212_v58  ;;  %v5360_v27 = vld [vmem:[%s7356_s16 + $0x1] ss:$0 sm:$0xff] }
0x1283   : > { %v5832_v33 = vpop.f32.mrf.mxu0 }
0x1284   : > { %6266 = vpow2.f32 %v3220_v31  ;;  %v5341_v35 = vmul.f32 -1.702, %v3213_v32 }
0x1286   : > { %v3222_v16 = vmul.f32 1.442695, %v5341_v35 }
0x1288   : > { %6268 = vpow2.f32 %v3222_v16 }
0x1291   : > { %v6267_v26 = vpop.eup %6266 }
0x1292   : > { %v3224_v19 = vadd.f32 1.0, %v6267_v26 }
0x1294   : > { %6270 = vrcp.f32 %v3224_v19 }
0x1295   : > { %v6269_v36 = vpop.eup %6268 }
0x1296   : > { %v3225_v37 = vadd.f32 1.0, %v6269_v36 }
0x1298   : > { %6272 = vrcp.f32 %v3225_v37 }
0x12a1   : > { %v6271_v38 = vpop.eup %6270 }
0x12a2   : > { %v3230_v44 = vmul.f32 %v6271_v38, %v3210_v30 }
0x12a5   : > { %v6273_v43 = vpop.eup %6272 }
0x12a6   : > { %v3231_v45 = vmul.f32 %v6273_v43, %v3213_v32 }
0x12a8   : > { %v3248_v46 = vpack.c.bf16 %v3231_v45, %v3230_v44 }
0x12aa   : > { %5850 = vmatmul.mubr.bf16.vlgmr.msra.gmra.mxu1 %v3248_v46 }
0x12ab   : > { %5881 = vmatprep.mubr.msk.bf16.mxu1 %vm6380_vm15, %v6379_v42 }
0x136a   : > { %v3331_v49 = vpop.f32.mrf.mxu1 }
0x136b   : > { %v3338_v50 = vadd.f32 %v3331_v49, %v6926_v39 }
0x136c   : > { %v5851_v51 = vpop.f32.mrf.mxu1 }
0x136d   : > { %v6969_v52 = vadd.f32 %v5350_v56, %v3338_v50 }
0x136e   : > { %v3334_v54 = vpop.f32.mrf.mxu1 }
0x136f   : > { %v3339_v57 = vadd.f32 %v3334_v54, %v6931_v6  ;;  %v3353_v10 = vsel %vm1990_vm14, %v6969_v52, 0.0 }
0x1370   : > { %3354 = vadd.xlane.f32.xlu1 %v3353_v10  ;;  %v5852_v55 = vpop.f32.mrf.mxu1 }
0x1371   : > { %v6974_v60 = vadd.f32 %v5350_v56, %v3339_v57 }
0x1373   : > { %v3356_v61 = vsel %vm1990_vm14, %v6974_v60, 0.0 }
0x1374   : > { %3357 = vadd.xlane.f32.xlu0 %v3356_v61 }
0x13f9   : > { %v3355_v39 = vpop.xlane.xlu1 %3354 }
0x13fa   : > { %v3359_v62 = vmul.f32 0.03125, %v3355_v39 }
0x13fc   : > { %v3361_v0 = vsub.f32 %v6969_v52, %v3359_v62 }
0x13fd   : > { %v3358_v3 = vpop.xlane.xlu0 %3357 }
0x13fe   : > { %v3360_v63 = vmul.f32 0.03125, %v3358_v3  ;;  %v3363_v6 = vmul.f32 %v3361_v0, %v3361_v0 }
0x1400   : > { %v3362_v1 = vsub.f32 %v6974_v60, %v3360_v63  ;;  %v3365_v53 = vsel %vm1990_vm14, %v3363_v6, 0.0 }
0x1401   : > { %3366 = vadd.xlane.f32.xlu1 %v3365_v53 }
0x1402   : > { %v3364_v2 = vmul.f32 %v3362_v1, %v3362_v1 }
0x1404   : > { %v3368_v59 = vsel %vm1990_vm14, %v3364_v2, 0.0 }
0x1405   : > { %3369 = vadd.xlane.f32.xlu0 %v3368_v59 }
0x148a   : > { %v3367_v7 = vpop.xlane.xlu1 %3366 }
0x148b   : > { %v3371_v8 = vmul.f32 0.03125, %v3367_v7 }
0x148d   : > { %v3373_v9 = vadd.f32 1e-05, %v3371_v8 }
0x148e   : > { %v3370_v11 = vpop.xlane.xlu0 %3369 }
0x148f   : > { %6274 = vrsqrt.f32 %v3373_v9  ;;  %v3372_v12 = vmul.f32 0.03125, %v3370_v11 }
0x1491   : > { %v3374_v13 = vadd.f32 1e-05, %v3372_v12 }
0x1493   : > { %6276 = vrsqrt.f32 %v3374_v13 }
0x149c   : > { %v6275_v14 = vpop.eup %6274 }
0x149d   : > { %v3377_v15 = vmul.f32 %v6275_v14, %v3361_v0 }
0x149f   : > { %v3385_v21 = vmul.f32 %v5353_v17, %v3377_v15 }
0x14a0   : > { %v6277_v18 = vpop.eup %6276 }
0x14a1   : > { %v3378_v20 = vmul.f32 %v6277_v18, %v3362_v1  ;;  %v3393_v24 = vadd.f32 %v5354_v22, %v3385_v21 }
0x14a3   : > { %v3386_v23 = vmul.f32 %v5353_v17, %v3378_v20 }
0x14a5   : > { %v3394_v25 = vadd.f32 %v5354_v22, %v3386_v23 }
0x14a7   : > { %v3400_v34 = vpack.c.bf16 %v3394_v25, %v3393_v24 }
0x14a9   : > { %5858 = vmatmul.mubr.msk.bf16.vlgmr.msra.gmra.mxu0 %vm1990_vm14, %v3400_v34 }
0x14aa   : > { %5863 = vmatprep.mubr.msk.bf16.mxu0 %vm6380_vm15, %v6379_v42 }
0x1569   : > { %v3458_v28 = vpop.f32.mrf.mxu0 }
0x156a   : > { %v3459_v30 = vadd.f32 %v5360_v27, %v3458_v28 }
0x156b   : > { %v5859_v47 = vpop.f32.mrf.mxu0 }
0x156c   : > { %v6992_v29 = vpack.c.bf16 %v3459_v30, %v3459_v30 }
0x156d   : > { %v3461_v58 = vpop.f32.mrf.mxu0 }
0x156e   : > { %v3462_v31 = vadd.f32 %v5360_v27, %v3461_v58  ;;  %3468 = vrot.lane.b32.xlu1 %v6992_v29, %s6382_s22 }
0x156f   : > { %v5860_v32 = vpop.f32.mrf.mxu0 }
0x1570   : > { %v6996_v33 = vpack.c.bf16 %v3462_v31, %v3462_v31 }
0x1572   : > { %3591 = vrot.lane.b32.xlu1 %v6992_v29, %s7330_s18  ;;  %3517 = vrot.lane.b32.xlu0 %v6996_v33, %s6382_s22  ;;  %s7365_s22 = smov 88   ;;  %s7366_s18 = smov 120  }
0x15e0   : > { %v3469_v35 = vpop.permute.xlu1 %3468 }
0x15e1   : > { %v3474_v16 = vsel %vm2107_vm0, %v3469_v35, 0 }
0x15e2   : > { %5862 = vmatpush3.bf16.xpose.msra.mxu0 %v3474_v16 }
0x15e3   : > { %5867 = vmatprep.subr.bf16.mxu0 %v6379_v42 }
0x15e4   : > { %v3518_v26 = vpop.permute.xlu0 %3517  ;;  %v3592_v36 = vpop.permute.xlu1 %3591 }
0x15e5   : > { %v3523_v19 = vsel %vm2107_vm0, %v3518_v26, 0  ;;  %v3597_v37 = vsel %vm2234_vm1, %v3592_v36, 0 }
0x15e9   : > { %5864 = vmatmul.mubr.msk.bf16.vlgmr.msra.gmra.mxu0 %vm2107_vm0, %v6992_v29 }
0x15ea   : > { %5868 = vmatpush3.bf16.xpose.msra.mxu0 %v3523_v19  ;;  %5869 = vmatprep.mubr.msk.bf16.mxu0 %vm6380_vm15, %v6379_v42 }
0x15eb   : > { %5873 = vmatprep.subr.bf16.mxu0 %v6379_v42 }
0x15f1   : > { %5870 = vmatmul.mubr.msk.bf16.vlgmr.msra.gmra.mxu0 %vm2107_vm0, %v6996_v33 }
0x15f2   : > { %5874 = vmatpush3.bf16.msra.mxu0 %v3597_v37  ;;  %5875 = vmatprep.mubr.msk.bf16.mxu0 %vm6380_vm15, %v6379_v42 }
0x15f3   : > { %5885 = vmatprep.subr.bf16.mxu0 %v6379_v42 }
0x16a9   : > { %v3510_v38 = vpop.f32.mrf.mxu0 }
0x16aa   : > { %v3565_v43 = vmul.f32 0.35355338, %v3510_v38 }
0x16ab   : > { %v5865_v44 = vpop.f32.mrf.mxu0 }
0x16ac   : > { %v3567_v45 = vadd.f32 %v3565_v43, %v6738_v41 }
0x16ad   : > { %v3513_v46 = vpop.f32.mrf.mxu0 }
0x16ae   : > { %v3569_v49 = vsel %vm2107_vm0, %v3567_v45, -inf }
0x16af   : > { %3570 = vmax.xlane.f32.xlu1 %v3569_v49  ;;  %v5866_v56 = vpop.f32.mrf.mxu0 }
0x16b1   : > { %v3559_v50 = vpop.f32.mrf.mxu0 }
0x16b2   : > { %v3566_v51 = vmul.f32 0.35355338, %v3559_v50 }
0x16b3   : > { %v5871_v54 = vpop.f32.mrf.mxu0 }
0x16b4   : > { %v3568_v57 = vadd.f32 %v3566_v51, %v6738_v41 }
0x16b5   : > { %v3562_v10 = vpop.f32.mrf.mxu0 }
0x16b6   : > { %v3572_v55 = vsel %vm2107_vm0, %v3568_v57, -inf }
0x16b7   : > { %3573 = vmax.xlane.f32.xlu0 %v3572_v55  ;;  %v5872_v61 = vpop.f32.mrf.mxu0 }
0x16c0   : > { %3691 = vrot.lane.b32.xlu1 %v6992_v29, %s7365_s22 }
0x16c4   : > { %3741 = vrot.lane.b32.xlu1 %v6996_v33, %s7365_s22  ;;  %s7370_s22 = smov 112  }
0x16c8   : > { %3739 = vrot.lane.b32.xlu1 %v6996_v33, %s7366_s18 }
0x16cc   : > { %3863 = vrot.lane.b32.xlu1 %v6996_v33, %s7367_s3 }
0x16cd   : > { %3639 = vrot.lane.b32.xlu0 %v6996_v33, %s7368_s5 }
0x16d1   : > { %3689 = vrot.lane.b32.xlu0 %v6992_v29, %s7366_s18  ;;  %s7369_s18 = smov 80  }
0x1738   : > { %v3571_v39 = vpop.xlane.xlu1 %3570 }
0x1739   : > { %v3575_v62 = vsub.f32 %v3567_v45, %v3571_v39 }
0x173b   : > { %v3577_v0 = vmul.f32 1.442695, %v3575_v62 }
0x173c   : > { %v3692_v2 = vpop.permute.xlu1 %3691 }
0x173d   : > { %6278 = vpow2.f32 %v3577_v0  ;;  %v3697_v5 = vsel %vm2107_vm0, %v3692_v2, 0 }
0x1740   : > { %v3574_v3 = vpop.xlane.xlu0 %3573  ;;  %v3742_v7 = vpop.permute.xlu1 %3741 }
0x1741   : > { %v3576_v63 = vsub.f32 %v3568_v57, %v3574_v3  ;;  %v3747_v13 = vsel %vm2107_vm0, %v3742_v7, 0 }
0x1743   : > { %v3579_v6 = vmul.f32 1.442695, %v3576_v63 }
0x1744   : > { %v3640_v1 = vpop.permute.xlu0 %3639  ;;  %v3740_v11 = vpop.permute.xlu1 %3739 }
0x1745   : > { %6280 = vpow2.f32 %v3579_v6  ;;  %v3645_v53 = vsel %vm2234_vm1, %v3640_v1, 0 }
0x1746   : > { %5880 = vmatpush3.bf16.msra.mxu1 %v3645_v53 }
0x1747   : > { %5891 = vmatprep.subr.bf16.mxu1 %v6379_v42 }
0x1748   : > { %v3690_v12 = vpop.permute.xlu0 %3689  ;;  %v3864_v14 = vpop.permute.xlu1 %3863 }
0x1749   : > { %v3869_v15 = vsel %vm2234_vm1, %v3864_v14, 0 }
0x174a   : > { %v7034_v59 = vpop.eup %6278 }
0x174b   : > { %v3589_v4 = vpack.c.bf16 %v7034_v59, %v7034_v59 }
0x174d   : > { %5876 = vmatmul.mubr.msk.bf16.vlgmr.msra.gmra.mxu0 %vm2107_vm0, %v3589_v4 }
0x174e   : > { %5886 = vmatpush3.bf16.xpose.msra.mxu0 %v3697_v5  ;;  %5887 = vmatprep.mubr.msk.bf16.mxu0 %vm6380_vm15, %v6379_v42 }
0x174f   : > { %5897 = vmatprep.subr.bf16.mxu0 %v6379_v42 }
0x1752   : > { %v7043_v8 = vpop.eup %6280 }
0x1753   : > { %v3590_v9 = vpack.c.bf16 %v7043_v8, %v7043_v8 }
0x1755   : > { %5882 = vmatmul.mubr.msk.bf16.vlgmr.msra.gmra.mxu1 %vm2107_vm0, %v3590_v9  ;;  %5888 = vmatmul.mubr.msk.bf16.vlgmr.msra.gmra.mxu0 %vm2107_vm0, %v3690_v12 }
0x1756   : > { %5892 = vmatpush3.bf16.xpose.msra.mxu1 %v3747_v13  ;;  %5893 = vmatprep.mubr.msk.bf16.mxu1 %vm6380_vm15, %v6379_v42 }
0x1757   : > { %5903 = vmatprep.subr.bf16.mxu1 %v6379_v42  ;;  %5899 = vmatprep.mubr.msk.bf16.mxu0 %vm6380_vm15, %v6379_v42 }
0x175d   : > { %5894 = vmatmul.mubr.msk.bf16.vlgmr.msra.gmra.mxu1 %vm2107_vm0, %v3740_v11 }
0x175e   : > { %5904 = vmatpush3.bf16.msra.mxu1 %v3869_v15  ;;  %5905 = vmatprep.mubr.msk.bf16.mxu1 %vm6380_vm15, %v6379_v42 }
0x175f   : > { %5915 = vmatprep.subr.bf16.mxu1 %v6379_v42 }
0x180d   : > { %v7060_v17 = vpop.f32.mrf.mxu0 }
0x180f   : > { %v5877_v18 = vpop.f32.mrf.mxu0 }
0x1811   : > { %v3636_v20 = vpop.f32.mrf.mxu0 }
0x1813   : > { %v5878_v21 = vpop.f32.mrf.mxu0 }
0x1815   : > { %v7062_v22 = vpop.f32.mrf.mxu1  ;;  %v3733_v23 = vpop.f32.mrf.mxu0 }
0x1816   : > { %v3789_v24 = vmul.f32 0.35355338, %v3733_v23 }
0x1817   : > { %v5883_v25 = vpop.f32.mrf.mxu1  ;;  %v5889_v34 = vpop.f32.mrf.mxu0 }
0x1818   : > { %v3791_v27 = vadd.f32 %v3789_v24, %v6738_v41 }
0x1819   : > { %v3684_v28 = vpop.f32.mrf.mxu1  ;;  %v3736_v30 = vpop.f32.mrf.mxu0 }
0x181a   : > { %v3793_v47 = vsel %vm2107_vm0, %v3791_v27, -inf }
0x181b   : > { %3794 = vmax.xlane.f32.xlu0 %v3793_v47  ;;  %v5884_v58 = vpop.f32.mrf.mxu1  ;;  %v5890_v31 = vpop.f32.mrf.mxu0 }
0x181d   : > { %v3783_v32 = vpop.f32.mrf.mxu1 }
0x181e   : > { %v3790_v35 = vmul.f32 0.35355338, %v3783_v32 }
0x181f   : > { %v5895_v16 = vpop.f32.mrf.mxu1 }
0x1820   : > { %v3792_v26 = vadd.f32 %v3790_v35, %v6738_v41 }
0x1821   : > { %v3786_v19 = vpop.f32.mrf.mxu1 }
0x1822   : > { %v3796_v36 = vsel %vm2107_vm0, %v3792_v26, -inf }
0x1823   : > { %3797 = vmax.xlane.f32.xlu1 %v3796_v36  ;;  %v5896_v37 = vpop.f32.mrf.mxu1 }
0x1831   : > { %3815 = vrot.lane.b32.xlu0 %v6992_v29, %s7367_s3  ;;  %s7372_s3 = smov 72  }
0x1834   : > { %3965 = vrot.lane.b32.xlu1 %v6996_v33, %s7369_s18 }
0x1835   : > { %3915 = vrot.lane.b32.xlu0 %v6992_v29, %s7369_s18 }
0x1838   : > { %3963 = vrot.lane.b32.xlu1 %v6996_v33, %s7370_s22 }
0x1839   : > { %3913 = vrot.lane.b32.xlu0 %v6992_v29, %s7370_s22  ;;  %s7373_s22 = smov 104  }
0x183c   : > { %4087 = vrot.lane.b32.xlu1 %v6996_v33, %s7371_s6 }
0x18a4   : > { %v3795_v38 = vpop.xlane.xlu0 %3794 }
0x18a5   : > { %v3799_v43 = vsub.f32 %v3791_v27, %v3795_v38 }
0x18a7   : > { %v3801_v44 = vmul.f32 1.442695, %v3799_v43 }
0x18a8   : > { %v3816_v45 = vpop.permute.xlu0 %3815 }
0x18a9   : > { %6282 = vpow2.f32 %v3801_v44  ;;  %v3821_v46 = vsel %vm2234_vm1, %v3816_v45, 0 }
0x18aa   : > { %5898 = vmatpush3.bf16.msra.mxu0 %v3821_v46 }
0x18ab   : > { %5909 = vmatprep.subr.bf16.mxu0 %v6379_v42 }
0x18ac   : > { %v3798_v49 = vpop.xlane.xlu1 %3797  ;;  %v3916_v54 = vpop.permute.xlu0 %3915 }
0x18ad   : > { %v3800_v56 = vsub.f32 %v3792_v26, %v3798_v49  ;;  %v3921_v10 = vsel %vm2107_vm0, %v3916_v54, 0 }
0x18af   : > { %v3803_v50 = vmul.f32 1.442695, %v3800_v56 }
0x18b0   : > { %v3966_v55 = vpop.permute.xlu1 %3965  ;;  %v3914_v62 = vpop.permute.xlu0 %3913 }
0x18b1   : > { %6284 = vpow2.f32 %v3803_v50  ;;  %v3971_v3 = vsel %vm2107_vm0, %v3966_v55, 0 }
0x18b4   : > { %v3964_v0 = vpop.permute.xlu1 %3963 }
0x18b6   : > { %v7082_v51 = vpop.eup %6282 }
0x18b7   : > { %v3813_v57 = vpack.c.bf16 %v7082_v51, %v7082_v51 }
0x18b8   : > { %v4088_v63 = vpop.permute.xlu1 %4087 }
0x18b9   : > { %5900 = vmatmul.mubr.msk.bf16.vlgmr.msra.gmra.mxu0 %vm2107_vm0, %v3813_v57  ;;  %v4093_v6 = vsel %vm2234_vm1, %v4088_v63, 0 }
0x18ba   : > { %5910 = vmatpush3.bf16.xpose.msra.mxu0 %v3921_v10  ;;  %5911 = vmatprep.mubr.msk.bf16.mxu0 %vm6380_vm15, %v6379_v42 }
0x18bb   : > { %5921 = vmatprep.subr.bf16.mxu0 %v6379_v42 }
0x18be   : > { %v7091_v61 = vpop.eup %6284 }
0x18bf   : > { %v3814_v39 = vpack.c.bf16 %v7091_v61, %v7091_v61 }
0x18c1   : > { %5906 = vmatmul.mubr.msk.bf16.vlgmr.msra.gmra.mxu1 %vm2107_vm0, %v3814_v39  ;;  %5912 = vmatmul.mubr.msk.bf16.vlgmr.msra.gmra.mxu0 %vm2107_vm0, %v3914_v62 }
0x18c2   : > { %5916 = vmatpush3.bf16.xpose.msra.mxu1 %v3971_v3  ;;  %5917 = vmatprep.mubr.msk.bf16.mxu1 %vm6380_vm15, %v6379_v42 }
0x18c3   : > { %5927 = vmatprep.subr.bf16.mxu1 %v6379_v42  ;;  %5923 = vmatprep.mubr.msk.bf16.mxu0 %vm6380_vm15, %v6379_v42 }
0x18c9   : > { %5918 = vmatmul.mubr.msk.bf16.vlgmr.msra.gmra.mxu1 %vm2107_vm0, %v3964_v0 }
0x18ca   : > { %5928 = vmatpush3.bf16.msra.mxu1 %v4093_v6  ;;  %5929 = vmatprep.mubr.msk.bf16.mxu1 %vm6380_vm15, %v6379_v42 }
0x18cb   : > { %5939 = vmatprep.subr.bf16.mxu1 %v6379_v42 }
0x1979   : > { %v7108_v1 = vpop.f32.mrf.mxu0 }
0x197b   : > { %v5901_v53 = vpop.f32.mrf.mxu0 }
0x197d   : > { %v3860_v2 = vpop.f32.mrf.mxu0 }
0x197f   : > { %v5902_v4 = vpop.f32.mrf.mxu0 }
0x1981   : > { %v7110_v5 = vpop.f32.mrf.mxu1  ;;  %v3957_v7 = vpop.f32.mrf.mxu0 }
0x1982   : > { %v4013_v9 = vmul.f32 0.35355338, %v3957_v7 }
0x1983   : > { %v5907_v11 = vpop.f32.mrf.mxu1  ;;  %v5913_v12 = vpop.f32.mrf.mxu0 }
0x1984   : > { %v4015_v13 = vadd.f32 %v4013_v9, %v6738_v41 }
0x1985   : > { %v3908_v14 = vpop.f32.mrf.mxu1  ;;  %v3960_v15 = vpop.f32.mrf.mxu0 }
0x1986   : > { %v4017_v18 = vsel %vm2107_vm0, %v4015_v13, -inf }
0x1987   : > { %4018 = vmax.xlane.f32.xlu0 %v4017_v18  ;;  %v5908_v20 = vpop.f32.mrf.mxu1  ;;  %v5914_v21 = vpop.f32.mrf.mxu0 }
0x1988   : > { %v3805_v21 = vsel %vm2107_vm0, %v7082_v51, 0.0 }
0x1989   : > { %v4007_v23 = vpop.f32.mrf.mxu1 }
0x198a   : > { %v4014_v24 = vmul.f32 0.35355338, %v4007_v23 }
0x198b   : > { %v5919_v25 = vpop.f32.mrf.mxu1 }
0x198c   : > { %v4016_v34 = vadd.f32 %v4014_v24, %v6738_v41  ;;  %v3808_v24 = vsel %vm2107_vm0, %v7091_v61, 0.0 }
0x198d   : > { %v4010_v27 = vpop.f32.mrf.mxu1 }
0x198e   : > { %v4020_v28 = vsel %vm2107_vm0, %v4016_v34, -inf }
0x198f   : > { %4021 = vmax.xlane.f32.xlu1 %v4020_v28  ;;  %v5920_v30 = vpop.f32.mrf.mxu1 }
0x199d   : > { %4039 = vrot.lane.b32.xlu0 %v6992_v29, %s7371_s6  ;;  %s7374_s6 = smov 40  }
0x19a0   : > { %4189 = vrot.lane.b32.xlu1 %v6996_v33, %s7372_s3 }
0x19a1   : > { %4139 = vrot.lane.b32.xlu0 %v6992_v29, %s7372_s3  ;;  %s7375_s3 = smov 16  }
0x19a4   : > { %4187 = vrot.lane.b32.xlu1 %v6996_v33, %s7373_s22 }
0x19a5   : > { %4137 = vrot.lane.b32.xlu0 %v6992_v29, %s7373_s22  ;;  %s7376_s22 = smov 8  }
0x1a10   : > { %v4019_v47 = vpop.xlane.xlu0 %4018 }
0x1a11   : > { %v4023_v58 = vsub.f32 %v4015_v13, %v4019_v47 }
0x1a13   : > { %v4025_v31 = vmul.f32 1.442695, %v4023_v58 }
0x1a14   : > { %v4040_v32 = vpop.permute.xlu0 %4039 }
0x1a15   : > { %6286 = vpow2.f32 %v4025_v31  ;;  %v4045_v35 = vsel %vm2234_vm1, %v4040_v32, 0 }
0x1a16   : > { %5922 = vmatpush3.bf16.msra.mxu0 %v4045_v35  ;;  %v3581_v35 = vsel %vm2107_vm0, %v7034_v59, 0.0 }
0x1a17   : > { %5933 = vmatprep.subr.bf16.mxu0 %v6379_v42 }
0x1a18   : > { %v4022_v16 = vpop.xlane.xlu1 %4021  ;;  %v4140_v37 = vpop.permute.xlu0 %4139 }
0x1a19   : > { %v4024_v26 = vsub.f32 %v4016_v34, %v4022_v16  ;;  %v4145_v43 = vsel %vm2107_vm0, %v4140_v37, 0 }
0x1a1b   : > { %v4027_v19 = vmul.f32 1.442695, %v4024_v26 }
0x1a1c   : > { %v4190_v45 = vpop.permute.xlu1 %4189  ;;  %v4138_v49 = vpop.permute.xlu0 %4137 }
0x1a1d   : > { %6288 = vpow2.f32 %v4027_v19  ;;  %v4195_v56 = vsel %vm2107_vm0, %v4190_v45, 0 }
0x1a20   : > { %v4188_v50 = vpop.permute.xlu1 %4187 }
0x1a22   : > { %v6287_v36 = vpop.eup %6286 }
0x1a23   : > { %v4037_v38 = vpack.c.bf16 %v6287_v36, %v6287_v36  ;;  %v4029_v23 = vsel %vm2107_vm0, %v6287_v36, 0.0  ;;  %v3584_v36 = vsel %vm2107_vm0, %v7043_v8, 0.0 }
0x1a25   : > { %5924 = vmatmul.mubr.msk.bf16.vlgmr.msra.gmra.mxu0 %vm2107_vm0, %v4037_v38 }
0x1a26   : > { %5934 = vmatpush3.bf16.xpose.msra.mxu0 %v4145_v43  ;;  %5935 = vmatprep.mubr.msk.bf16.mxu0 %vm6380_vm15, %v6379_v42 }
0x1a27   : > { %5945 = vmatprep.subr.bf16.mxu0 %v6379_v42 }
0x1a2a   : > { %v6289_v44 = vpop.eup %6288 }
0x1a2b   : > { %v4038_v46 = vpack.c.bf16 %v6289_v44, %v6289_v44 }
0x1a2d   : > { %5930 = vmatmul.mubr.msk.bf16.vlgmr.msra.gmra.mxu1 %vm2107_vm0, %v4038_v46  ;;  %5936 = vmatmul.mubr.msk.bf16.vlgmr.msra.gmra.mxu0 %vm2107_vm0, %v4138_v49 }
0x1a2e   : > { %5940 = vmatpush3.bf16.xpose.msra.mxu1 %v4195_v56  ;;  %5941 = vmatprep.mubr.msk.bf16.mxu1 %vm6380_vm15, %v6379_v42 }
0x1a2f   : > { %5951 = vmatprep.subr.bf16.mxu1 %v6379_v42  ;;  %5947 = vmatprep.mubr.msk.bf16.mxu0 %vm6380_vm15, %v6379_v42 }
0x1a35   : > { %5942 = vmatmul.mubr.msk.bf16.vlgmr.msra.gmra.mxu1 %vm2107_vm0, %v4188_v50 }
0x1a36   : > { %5953 = vmatprep.mubr.msk.bf16.mxu1 %vm6380_vm15, %v6379_v42 }
0x1ae5   : > { %v7144_v54 = vpop.f32.mrf.mxu0 }
0x1ae7   : > { %v5925_v57 = vpop.f32.mrf.mxu0 }
0x1ae9   : > { %v4084_v10 = vpop.f32.mrf.mxu0 }
0x1aeb   : > { %v5926_v55 = vpop.f32.mrf.mxu0 }
0x1aed   : > { %v7146_v39 = vpop.f32.mrf.mxu1  ;;  %v4181_v62 = vpop.f32.mrf.mxu0 }
0x1aee   : > { %v4237_v0 = vmul.f32 0.35355338, %v4181_v62  ;;  %v6207_v62 = vld [vmem:[%s7357_s15 + $0x18] sm:$0xff]  }
0x1aef   : > { %v5931_v3 = vpop.f32.mrf.mxu1  ;;  %v5937_v63 = vpop.f32.mrf.mxu0 }
0x1af0   : > { %v4239_v6 = vadd.f32 %v4237_v0, %v6738_v41 }
0x1af1   : > { %v4132_v53 = vpop.f32.mrf.mxu1  ;;  %v4184_v2 = vpop.f32.mrf.mxu0 }
0x1af2   : > { %v4241_v4 = vsel %vm2107_vm0, %v4239_v6, -inf }
0x1af3   : > { %4242 = vmax.xlane.f32.xlu0 %v4241_v4  ;;  %v5932_v7 = vpop.f32.mrf.mxu1  ;;  %v5938_v9 = vpop.f32.mrf.mxu0 }
0x1af5   : > { %v4231_v11 = vpop.f32.mrf.mxu1 }
0x1af6   : > { %v4238_v12 = vmul.f32 0.35355338, %v4231_v11 }
0x1af7   : > { %v5943_v13 = vpop.f32.mrf.mxu1 }
0x1af8   : > { %v4240_v14 = vadd.f32 %v4238_v12, %v6738_v41  ;;  %v4032_v41 = vsel %vm2107_vm0, %v6289_v44, 0.0 }
0x1af9   : > { %v4234_v15 = vpop.f32.mrf.mxu1 }
0x1afa   : > { %v4244_v18 = vsel %vm2107_vm0, %v4240_v14, -inf }
0x1afb   : > { %4245 = vmax.xlane.f32.xlu1 %v4244_v18  ;;  %v5944_v20 = vpop.f32.mrf.mxu1 }
0x1b09   : > { %4263 = vrot.lane.b32.xlu0 %v6992_v29, %s7374_s6 }
0x1b0c   : > { %4311 = vrot.lane.b32.xlu1 %v6996_v33, %s7374_s6  ;;  %s7377_s6 = smov 24  }
0x1b28   : > { %3806 = vadd.xlane.f32.xlu0 %v3805_v21 }
0x1b2c   : > { %4030 = vadd.xlane.f32.xlu0 %v4029_v23 }
0x1b30   : > { %4033 = vadd.xlane.f32.xlu0 %v4032_v41  ;;  %3809 = vadd.xlane.f32.xlu1 %v3808_v24 }
0x1b7c   : > { %v4243_v25 = vpop.xlane.xlu0 %4242 }
0x1b7d   : > { %v4247_v34 = vsub.f32 %v4239_v6, %v4243_v25 }
0x1b7f   : > { %v4249_v29 = vmul.f32 1.442695, %v4247_v34 }
0x1b80   : > { %v4264_v27 = vpop.permute.xlu0 %4263 }
0x1b81   : > { %6290 = vpow2.f32 %v4249_v29  ;;  %v4269_v33 = vsel %vm2234_vm1, %v4264_v27, 0 }
0x1b82   : > { %5946 = vmatpush3.bf16.msra.mxu0 %v4269_v33 }
0x1b83   : > { %5957 = vmatprep.subr.bf16.mxu0 %v6379_v42 }
0x1b84   : > { %v4246_v51 = vpop.xlane.xlu1 %4245 }
0x1b85   : > { %v4248_v28 = vsub.f32 %v4240_v14, %v4246_v51 }
0x1b87   : > { %v4251_v30 = vmul.f32 1.442695, %v4248_v28 }
0x1b88   : > { %v4312_v47 = vpop.permute.xlu1 %4311 }
0x1b89   : > { %6292 = vpow2.f32 %v4251_v30  ;;  %v4317_v58 = vsel %vm2234_vm1, %v4312_v47, 0 }
0x1b8a   : > { %5952 = vmatpush3.bf16.msra.mxu1 %v4317_v58 }
0x1b8b   : > { %5965 = vmatprep.subr.bf16.mxu1 %v6379_v42 }
0x1b8e   : > { %v6291_v61 = vpop.eup %6290 }
0x1b8f   : > { %v4253_v31 = vsel %vm2107_vm0, %v6291_v61, 0.0  ;;  %v4261_v32 = vpack.c.bf16 %v6291_v61, %v6291_v61 }
0x1b90   : > { %4254 = vadd.xlane.f32.xlu1 %v4253_v31 }
0x1b91   : > { %5948 = vmatmul.mubr.msk.bf16.vlgmr.msra.gmra.mxu0 %vm2107_vm0, %v4261_v32 }
0x1b92   : > { %5961 = vmatprep.mubr.msk.bf16.mxu0 %vm6380_vm15, %v6379_v42  ;;  %5958 = vmatpush3.bf16.msra.mxu0 %v6207_v62  ;;  %v6210_v62 = vld [vmem:[%s7359_s11 + $0x10] sm:$0xff]  }
0x1b93   : > { %5959 = vmatprep.subr.bf16.mxu0 %v6379_v42 }
0x1b94   : > { %3582 = vadd.xlane.f32.xlu1 %v3581_v35  ;;  %v5388_v35 = vld [vmem:[%s7358_s10 + $0x1] ss:$0 sm:$0xff] }
0x1b96   : > { %v6293_v16 = vpop.eup %6292 }
0x1b97   : > { %v4256_v26 = vsel %vm2107_vm0, %v6293_v16, 0.0  ;;  %v4262_v19 = vpack.c.bf16 %v6293_v16, %v6293_v16 }
0x1b98   : > { %4257 = vadd.xlane.f32.xlu0 %v4256_v26 }
0x1b99   : > { %5954 = vmatmul.mubr.msk.bf16.vlgmr.msra.gmra.mxu1 %vm2107_vm0, %v4262_v19 }
0x1b9a   : > { %5969 = vmatprep.mubr.msk.bf16.mxu1 %vm6380_vm15, %v6379_v42 }
0x1b9c   : > { %3585 = vadd.xlane.f32.xlu0 %v3584_v36 }
0x1bb1   : > { %v3807_v37 = vpop.xlane.xlu0 %3806 }
0x1bb5   : > { %v4031_v38 = vpop.xlane.xlu0 %4030 }
0x1bb6   : > { %6294 = vrcp.f32 %v4031_v38 }
0x1bb7   : > { %6296 = vrcp.f32 %v3807_v37 }
0x1bb9   : > { %v4034_v59 = vpop.xlane.xlu0 %4033  ;;  %v3810_v43 = vpop.xlane.xlu1 %3809 }
0x1bba   : > { %6298 = vrcp.f32 %v4034_v59 }
0x1bbb   : > { %6300 = vrcp.f32 %v3810_v43 }
0x1bc3   : > { %v6295_v44 = vpop.eup %6294 }
0x1bc4   : > { %v6297_v45 = vpop.eup %6296  ;;  %v4135_v56 = vmul.f32 %v6295_v44, %v7144_v54 }
0x1bc5   : > { %v3911_v8 = vmul.f32 %v6297_v45, %v7108_v1 }
0x1bc7   : > { %v6299_v46 = vpop.eup %6298 }
0x1bc8   : > { %v6301_v49 = vpop.eup %6300  ;;  %v4136_v50 = vmul.f32 %v6299_v46, %v7146_v39  ;;  %v6208_v39 = vld [vmem:[%s7357_s15 + $0x10] sm:$0xff]  }
0x1bc9   : > { %v3912_v57 = vmul.f32 %v6301_v49, %v7110_v5  ;;  %5960 = vmatpush3.bf16.msra.mxu0 %v6208_v39 }
0x1bca   : > { %v6181_v10 = vpack.i.bf16 %v4136_v50, %v4135_v56  ;;  %5973 = vmatprep.subr.bf16.mxu0 %v6379_v42 }
0x1bcb   : > { %v6176_v55 = vpack.i.bf16 %v3912_v57, %v3911_v8 }
0x1bcc   : > { %6182 = vrot.lane.b32.xlu0 %v6181_v10, %s7375_s3  ;;  %s7378_s3 = sld [smem:[#allocation4_spill]] }
0x1bcd   : > { %6177 = vrot.lane.b32.xlu1 %v6176_v55, %s7376_s22  ;;  %v6209_v55 = vld [vmem:[%s7359_s11 + $0x18] sm:$0xff]   ;;  %s7379_s22 = sld [smem:[#allocation15_spill]] }
0x1bce   : > { %5966 = vmatpush3.bf16.msra.mxu1 %v6209_v55 }
0x1bcf   : > { %5967 = vmatprep.subr.bf16.mxu1 %v6379_v42 }
0x1bd2   : > { %5968 = vmatpush3.bf16.msra.mxu1 %v6210_v62 }
0x1bd3   : > { %5993 = vmatprep.subr.mxu1 %v6379_v42 }
0x1c19   : > { %v4255_v0 = vpop.xlane.xlu1 %4254 }
0x1c1a   : > { %6302 = vrcp.f32 %v4255_v0 }
0x1c1d   : > { %v3583_v14 = vpop.xlane.xlu1 %3582 }
0x1c21   : > { %v4258_v3 = vpop.xlane.xlu0 %4257 }
0x1c22   : > { %6304 = vrcp.f32 %v4258_v3 }
0x1c23   : > { %6306 = vrcp.f32 %v3583_v14 }
0x1c25   : > { %v3586_v15 = vpop.xlane.xlu0 %3585 }
0x1c26   : > { %6308 = vrcp.f32 %v3586_v15  ;;  %v6211_v15 = vld [vmem:[%s7362_s1 + $0x78] sm:$0xff]  }
0x1c27   : > { %v6303_v6 = vpop.eup %6302 }
0x1c2f   : > { %v6305_v53 = vpop.eup %6304 }
0x1c30   : > { %v6307_v20 = vpop.eup %6306 }
0x1c31   : > { %v3687_v25 = vmul.f32 %v6307_v20, %v7060_v17  ;;  %v6213_v20 = vld [vmem:[%s7362_s1 + $0x68] sm:$0xff]  }
0x1c33   : > { %v6309_v21 = vpop.eup %6308 }
0x1c34   : > { %v3688_v34 = vmul.f32 %v6309_v21, %v7062_v22  ;;  %v6214_v21 = vld [vmem:[%s7362_s1 + $0x60] sm:$0xff]  }
0x1c3e   : > { %v6183_v23 = vpop.permute.xlu0 %6182 }
0x1c3f   : > { %v6178_v18 = vpop.permute.xlu1 %6177  ;;  %v6185_v29 = vunpack.i.h.bf16 %v6183_v23  ;;  %v6184_v27 = vunpack.i.l.bf16 %v6183_v23  ;;  %v6215_v23 = vld [vmem:[%s7362_s1 + $0x58] sm:$0xff]  }
0x1c40   : > { %v6180_v41 = vunpack.i.h.bf16 %v6178_v18  ;;  %v6179_v24 = vunpack.i.l.bf16 %v6178_v18  ;;  %v6212_v18 = vld [vmem:[%s7362_s1 + $0x70] sm:$0xff]  }
0x1c42   : > { %v4386_v33 = vsel %vm2107_vm0, %v3688_v34, %v6180_v41  ;;  %v4385_v51 = vsel %vm2107_vm0, %v3687_v25, %v6179_v24  ;;  %v6216_v41 = vld [vmem:[%s7362_s1 + $0x50] sm:$0xff]   ;;  %v6217_v24 = vld [vmem:[%s7362_s1 + $0x48] sm:$0xff]   ;;  %v6218_v25 = vld [vmem:[%s7362_s1 + $0x40] sm:$0xff]  }
0x1c43   : > { %v4387_v58 = vsel %vm3026_vm3, %v4385_v51, %v6184_v27  ;;  %v4388_v61 = vsel %vm3026_vm3, %v4386_v33, %v6185_v29  ;;  %v5398_v34 = vld [vmem:[%s7363_s26 + $0x1] ss:$0 sm:$0xff] }
0x1c51   : > { %v4305_v54 = vpop.f32.mrf.mxu0 }
0x1c52   : > { %v4359_v4 = vmul.f32 %v6303_v6, %v4305_v54 }
0x1c53   : > { %v5949_v63 = vpop.f32.mrf.mxu0 }
0x1c55   : > { %v4308_v1 = vpop.f32.mrf.mxu0 }
0x1c57   : > { %v5950_v5 = vpop.f32.mrf.mxu0 }
0x1c59   : > { %v4353_v2 = vpop.f32.mrf.mxu1 }
0x1c5a   : > { %v4360_v7 = vmul.f32 %v6305_v53, %v4353_v2  ;;  %v5391_v53 = vld [vmem:[%s7360_s2 + $0x1] ss:$0 sm:$0xff] }
0x1c5b   : > { %v5955_v9 = vpop.f32.mrf.mxu1 }
0x1c5c   : > { %v6186_v11 = vpack.i.bf16 %v4360_v7, %v4359_v4  ;;  %v5392_v9 = vld [vmem:[%s7361_s0 + $0x1] ss:$0 sm:$0xff]  ;;  %s7381_s0 = sld [smem:[#allocation17_spill]] }
0x1c5d   : > { %v4356_v12 = vpop.f32.mrf.mxu1 }
0x1c5e   : > { %6187 = vrot.lane.b32.xlu1 %v6186_v11, %s7377_s6  ;;  %s7380_s6 = sld [smem:[#allocation16_spill]] }
0x1c5f   : > { %v5956_v13 = vpop.f32.mrf.mxu1 }
0x1cd0   : > { %v6188_v28 = vpop.permute.xlu1 %6187 }
0x1cd1   : > { %v6190_v30 = vunpack.i.h.bf16 %v6188_v28  ;;  %v6189_v47 = vunpack.i.l.bf16 %v6188_v28 }
0x1cd3   : > { %v4390_v31 = vsel %vm3029_vm4, %v4388_v61, %v6190_v30  ;;  %v4389_v17 = vsel %vm3029_vm4, %v4387_v58, %v6189_v47 }
0x1cd4   : > { %v4396_v32 = vpack.c.bf16 %v4390_v31, %v4389_v17 }
0x1cd6   : > { %5962 = vmatmul.mubr.msk.bf16.vlgmr.msra.gmra.mxu0 %vm1990_vm14, %v4396_v32 }
0x1cd7   : > { %5989 = vmatprep.mubr.msk.bf16.mxu0 %vm6380_vm15, %v6379_v42  ;;  %5974 = vmatpush3.bf16.msra.mxu0 %v6211_v15  ;;  %v5430_v15 = vld [vmem:[%s7379_s22] ss:$0 sm:$0xff]  ;;  %s7383_s22 = sld [smem:[#allocation19_spill]] }
0x1cd8   : > { %5975 = vmatprep.subr.bf16.mxu0 %v6379_v42 }
0x1cdb   : > { %5976 = vmatpush3.bf16.msra.mxu0 %v6212_v18 }
0x1cdc   : > { %5977 = vmatprep.subr.bf16.mxu0 %v6379_v42 }
0x1cdf   : > { %5978 = vmatpush3.bf16.msra.mxu0 %v6213_v20 }
0x1ce0   : > { %5979 = vmatprep.subr.bf16.mxu0 %v6379_v42 }
0x1ce3   : > { %5980 = vmatpush3.bf16.msra.mxu0 %v6214_v21 }
0x1ce4   : > { %5981 = vmatprep.subr.bf16.mxu0 %v6379_v42 }
0x1ce7   : > { %5982 = vmatpush3.bf16.msra.mxu0 %v6215_v23 }
0x1ce8   : > { %5983 = vmatprep.subr.bf16.mxu0 %v6379_v42 }
0x1ceb   : > { %5984 = vmatpush3.bf16.msra.mxu0 %v6216_v41  ;;  %v5431_v41 = vld [vmem:[%s7380_s6] ss:$0 sm:$0xff]  ;;  %s6395_s6 = smov 32  }
0x1cec   : > { %5985 = vmatprep.subr.bf16.mxu0 %v6379_v42 }
0x1cef   : > { %5986 = vmatpush3.bf16.msra.mxu0 %v6217_v24 }
0x1cf0   : > { %5987 = vmatprep.subr.bf16.mxu0 %v6379_v42 }
0x1cf3   : > { %5988 = vmatpush3.bf16.msra.mxu0 %v6218_v25 }
0x1cf4   : > { %6024 = vmatprep.subr.bf16.mxu0 %v6379_v42 }
0x1d96   : > { %v4446_v22 = vpop.f32.mrf.mxu0 }
0x1d97   : > { %v4453_v16 = vadd.f32 %v4446_v22, %v6969_v52 }
0x1d98   : > { %v5963_v26 = vpop.f32.mrf.mxu0 }
0x1d99   : > { %v7202_v19 = vadd.f32 %v5388_v35, %v4453_v16 }
0x1d9a   : > { %v4449_v36 = vpop.f32.mrf.mxu0 }
0x1d9b   : > { %v4454_v37 = vadd.f32 %v4449_v36, %v6974_v60  ;;  %v4469_v38 = vsel %vm1990_vm14, %v7202_v19, 0.0 }
0x1d9c   : > { %4470 = vadd.xlane.f32.xlu1 %v4469_v38  ;;  %v5964_v59 = vpop.f32.mrf.mxu0 }
0x1d9d   : > { %v7207_v43 = vadd.f32 %v5388_v35, %v4454_v37 }
0x1d9f   : > { %v4472_v44 = vsel %vm1990_vm14, %v7207_v43, 0.0 }
0x1da0   : > { %4473 = vadd.xlane.f32.xlu0 %v4472_v44  ;;  %v5429_v44 = vld [vmem:[%s7364_s23 + $0x1] ss:$0 sm:$0xff] }
0x1e25   : > { %v4471_v52 = vpop.xlane.xlu1 %4470 }
0x1e26   : > { %v4475_v45 = vmul.f32 0.03125, %v4471_v52 }
0x1e28   : > { %v4477_v46 = vsub.f32 %v7202_v19, %v4475_v45 }
0x1e29   : > { %v4474_v49 = vpop.xlane.xlu0 %4473 }
0x1e2a   : > { %v4476_v56 = vmul.f32 0.03125, %v4474_v49  ;;  %v4479_v60 = vmul.f32 %v4477_v46, %v4477_v46 }
0x1e2c   : > { %v4478_v50 = vsub.f32 %v7207_v43, %v4476_v56  ;;  %v4481_v8 = vsel %vm1990_vm14, %v4479_v60, 0.0 }
0x1e2d   : > { %4482 = vadd.xlane.f32.xlu0 %v4481_v8 }
0x1e2e   : > { %v4480_v57 = vmul.f32 %v4478_v50, %v4478_v50 }
0x1e30   : > { %v4484_v10 = vsel %vm1990_vm14, %v4480_v57, 0.0 }
0x1e31   : > { %4485 = vadd.xlane.f32.xlu1 %v4484_v10 }
0x1eb6   : > { %v4483_v0 = vpop.xlane.xlu0 %4482 }
0x1eb7   : > { %v4487_v3 = vmul.f32 0.03125, %v4483_v0 }
0x1eb9   : > { %v4489_v54 = vadd.f32 1e-05, %v4487_v3 }
0x1eba   : > { %v4486_v39 = vpop.xlane.xlu1 %4485 }
0x1ebb   : > { %6310 = vrsqrt.f32 %v4489_v54  ;;  %v4488_v63 = vmul.f32 0.03125, %v4486_v39 }
0x1ebd   : > { %v4490_v1 = vadd.f32 1e-05, %v4488_v63 }
0x1ebf   : > { %6312 = vrsqrt.f32 %v4490_v1  ;;  %v4761_v1 = vld [vmem:[%s7378_s3] sm:$0x3]  ;;  %s7382_s3 = sld [smem:[#allocation18_spill]] }
0x1ec8   : > { %v6311_v5 = vpop.eup %6310 }
0x1ec9   : > { %v4493_v6 = vmul.f32 %v6311_v5, %v4477_v46 }
0x1ecb   : > { %v4501_v7 = vmul.f32 %v5391_v53, %v4493_v6 }
0x1ecc   : > { %v6313_v2 = vpop.eup %6312 }
0x1ecd   : > { %v4494_v4 = vmul.f32 %v6313_v2, %v4478_v50  ;;  %v4509_v12 = vadd.f32 %v5392_v9, %v4501_v7 }
0x1ecf   : > { %v4502_v11 = vmul.f32 %v5391_v53, %v4494_v4 }
0x1ed1   : > { %v4510_v13 = vadd.f32 %v5392_v9, %v4502_v11  ;;  %v4760_v11 = vmul.u32 8, %v6733_v40 }
0x1ed3   : > { %v4516_v14 = vpack.c.bf16 %v4510_v13, %v4509_v12 }
0x1ed5   : > { %5970 = vmatmul.mubr.msk.bf16.vlgmr.msra.gmra.mxu1 %vm1990_vm14, %v4516_v14 }
0x1ed6   : > { %5997 = vmatprep.mubr.msk.f32.mxu1 %vm6380_vm15, %v6379_v42 }
0x1f95   : > { %v4574_v29 = vpop.f32.mrf.mxu1 }
0x1f96   : > { %v4575_v27 = vadd.f32 %v5398_v34, %v4574_v29 }
0x1f97   : > { %v5971_v33 = vpop.f32.mrf.mxu1 }
0x1f98   : > { %v5402_v51 = vmul.f32 -1.702, %v4575_v27 }
0x1f99   : > { %v4577_v28 = vpop.f32.mrf.mxu1 }
0x1f9a   : > { %v4585_v30 = vmul.f32 1.442695, %v5402_v51  ;;  %v4578_v47 = vadd.f32 %v5398_v34, %v4577_v28  ;;  %v6219_v34 = vld [vmem:[%s7381_s0 + $0x8] sm:$0xff]   ;;  %v6222_v28 = vld [vmem:[%s7382_s3] sm:$0xff]  }
0x1f9b   : > { %v5972_v58 = vpop.f32.mrf.mxu1 }
0x1f9c   : > { %6314 = vpow2.f32 %v4585_v30  ;;  %v5403_v61 = vmul.f32 -1.702, %v4578_v47  ;;  %v6223_v30 = vld [vmem:[%s6549_s4 + $0x8] sm:$0xff]  }
0x1f9e   : > { %v4587_v31 = vmul.f32 1.442695, %v5403_v61 }
0x1fa0   : > { %6316 = vpow2.f32 %v4587_v31 }
0x1fa9   : > { %v6315_v17 = vpop.eup %6314 }
0x1faa   : > { %v4589_v32 = vadd.f32 1.0, %v6315_v17 }
0x1fac   : > { %6318 = vrcp.f32 %v4589_v32  ;;  %v5437_v32 = vld [vmem:[%s7383_s22] ss:$0 sm:$0xff] }
0x1fad   : > { %v6317_v22 = vpop.eup %6316 }
0x1fae   : > { %v4590_v35 = vadd.f32 1.0, %v6317_v22 }
0x1fb0   : > { %6320 = vrcp.f32 %v4590_v35 }
0x1fb9   : > { %v6319_v16 = vpop.eup %6318 }
0x1fba   : > { %v4595_v36 = vmul.f32 %v6319_v16, %v4575_v27  ;;  %v6221_v27 = vld [vmem:[%s7382_s3 + $0x8] sm:$0xff]  }
0x1fbd   : > { %v6321_v26 = vpop.eup %6320 }
0x1fbe   : > { %v4596_v37 = vmul.f32 %v6321_v26, %v4578_v47  ;;  %v6224_v47 = vld [vmem:[%s6549_s4] sm:$0xff]  }
0x1fc0   : > { %v4614_v38 = vpack.c.bf16 %v4596_v37, %v4595_v36 }
0x1fc2   : > { %5990 = vmatmul.mubr.bf16.vlgmr.msra.gmra.mxu0 %v4614_v38 }
0x1fc3   : > { %6026 = vmatprep.mubr.msk.bf16.mxu0 %vm6380_vm15, %v6379_v42 }
0x2082   : > { %v4697_v59 = vpop.f32.mrf.mxu0 }
0x2083   : > { %v4704_v52 = vadd.f32 %v4697_v59, %v7202_v19 }
0x2084   : > { %v5991_v45 = vpop.f32.mrf.mxu0 }
0x2085   : > { %v4714_v46 = vadd.f32 %v5429_v44, %v4704_v52 }
0x2086   : > { %v4700_v49 = vpop.f32.mrf.mxu0 }
0x2087   : > { %v4705_v56 = vadd.f32 %v4700_v49, %v7207_v43  ;;  %v4718_v60 = vsel %vm1990_vm14, %v4714_v46, 0.0 }
0x2088   : > { %4719 = vadd.xlane.f32.xlu1 %v4718_v60  ;;  %v5992_v50 = vpop.f32.mrf.mxu0 }
0x2089   : > { %v4715_v8 = vadd.f32 %v5429_v44, %v4705_v56 }
0x208b   : > { %v4721_v57 = vsel %vm1990_vm14, %v4715_v8, 0.0 }
0x208c   : > { %4722 = vadd.xlane.f32.xlu0 %v4721_v57 }
0x2111   : > { %v4720_v10 = vpop.xlane.xlu1 %4719 }
0x2112   : > { %v4724_v55 = vmul.f32 0.03125, %v4720_v10 }
0x2114   : > { %v4726_v62 = vsub.f32 %v4714_v46, %v4724_v55 }
0x2115   : > { %v4723_v0 = vpop.xlane.xlu0 %4722 }
0x2116   : > { %v4725_v3 = vmul.f32 0.03125, %v4723_v0  ;;  %v4728_v19 = vmul.f32 %v4726_v62, %v4726_v62 }
0x2118   : > { %v4727_v54 = vsub.f32 %v4715_v8, %v4725_v3  ;;  %v4730_v39 = vsel %vm1990_vm14, %v4728_v19, 0.0 }
0x2119   : > { %4731 = vadd.xlane.f32.xlu1 %v4730_v39 }
0x211a   : > { %v4729_v43 = vmul.f32 %v4727_v54, %v4727_v54 }
0x211c   : > { %v4733_v63 = vsel %vm1990_vm14, %v4729_v43, 0.0 }
0x211d   : > { %4734 = vadd.xlane.f32.xlu0 %v4733_v63 }
0x2133   : > { %4763 = vperm.xlu0 %6160, %v4761_v1   ;;  %v5441_v1 = vld [vmem:[%s6554_s14] ss:$0 sm:$0xff] }
0x21a2   : > { %v4732_v5 = vpop.xlane.xlu1 %4731 }
0x21a3   : > { %v4736_v6 = vmul.f32 0.03125, %v4732_v5 }
0x21a5   : > { %v4738_v53 = vadd.f32 1e-05, %v4736_v6 }
0x21a6   : > { %v4735_v2 = vpop.xlane.xlu0 %4734 }
0x21a7   : > { %6322 = vrsqrt.f32 %v4738_v53  ;;  %v4737_v4 = vmul.f32 0.03125, %v4735_v2 }
0x21a9   : > { %v4739_v7 = vadd.f32 1e-05, %v4737_v4 }
0x21ab   : > { %6324 = vrsqrt.f32 %v4739_v7 }
0x21ae   : > { %v4764_v12 = vpop.permute.xlu0 %4763 }
0x21af   : > { %v4765_v20 = vadd.s32 %v4764_v12, %v4760_v11  ;;  %v6225_v11 = vld [vmem:[%s6559_s20] sm:$0xff]  }
0x21b0   : > { %6025 = vmatpush3.bf16.msra.mxu0 %v6225_v11 }
0x21b1   : > { %vm4766_vm5 = vcmp.eq.s32.totalorder %v6673_v48, %v4765_v20  ;;  %v6220_v48 = vld [vmem:[%s7381_s0] sm:$0xff]  }
0x21b2   : > { %v5432_v40 = vsel %vm4766_vm5, 1.0, %v6379_v42 }
0x21b4   : > { %v6323_v9 = vpop.eup %6322 }
0x21b5   : > { %v4742_v13 = vmul.f32 %v6323_v9, %v4726_v62 }
0x21b7   : > { %v4750_v23 = vmul.f32 %v5430_v15, %v4742_v13 }
0x21b8   : > { %v6325_v14 = vpop.eup %6324 }
0x21b9   : > { %v4743_v18 = vmul.f32 %v6325_v14, %v4727_v54  ;;  %v4758_v25 = vadd.f32 %v5431_v41, %v4750_v23 }
0x21bb   : > { %v4751_v21 = vmul.f32 %v5430_v15, %v4743_v18 }
0x21bd   : > { %v4759_v24 = vadd.f32 %v5431_v41, %v4751_v21 }
0x21bf   : > { %5994 = vmatpush3.msra.mxu1 %v4759_v24 }
0x21c0   : > { %5995 = vmatprep.subr.mxu1 %v6379_v42 }
0x21c1   : > { %5996 = vmatpush3.msra.mxu1 %v4758_v25 }
0x21c2   : > { %5998 = vmatmul.mubr.msk.f32.vlgmr.msra.gmra.mxu1 %vm3026_vm3, %v5432_v40  ;;  %6000 = vmatprep.subr.bf16.mxu1 %v6379_v42 }
0x21c3   : > { %6001 = vmatpush3.bf16.msra.mxu1 %v6219_v34  ;;  %6004 = vmatprep.mubr.msk.bf16.mxu1 %vm6380_vm15, %v6379_v42 }
0x21c4   : > { %6002 = vmatprep.subr.bf16.mxu1 %v6379_v42 }
0x21c7   : > { %6003 = vmatpush3.bf16.msra.mxu1 %v6220_v48 }
0x21c8   : > { %6008 = vmatprep.subr.bf16.mxu1 %v6379_v42 }
0x2282   : > { %v7265_v29 = vpop.f32.mrf.mxu1 }
0x2283   : > { %v4846_v33 = vpack.c.bf16 %v7265_v29, %v7265_v29 }
0x2284   : > { %v5999_v51 = vpop.f32.mrf.mxu1 }
0x2285   : > { %6005 = vmatmul.mubr.msk.bf16.vlgmr.msra.gmra.mxu1 %vm1990_vm14, %v4846_v33 }
0x2286   : > { %6009 = vmatpush3.bf16.msra.mxu1 %v6221_v27  ;;  %6012 = vmatprep.mubr.msk.bf16.mxu1 %vm6380_vm15, %v6379_v42 }
0x2287   : > { %6010 = vmatprep.subr.bf16.mxu1 %v6379_v42 }
0x228a   : > { %6011 = vmatpush3.bf16.msra.mxu1 %v6222_v28 }
0x228b   : > { %6016 = vmatprep.subr.bf16.mxu1 %v6379_v42 }
0x228d   : > { %6013 = vmatmul.mubr.msk.bf16.vlgmr.msra.gmra.mxu1 %vm1990_vm14, %v4846_v33 }
0x228e   : > { %6020 = vmatprep.mubr.msk.bf16.mxu1 %vm6380_vm15, %v6379_v42  ;;  %6017 = vmatpush3.bf16.msra.mxu1 %v6223_v30 }
0x228f   : > { %6018 = vmatprep.subr.bf16.mxu1 %v6379_v42 }
0x2292   : > { %6019 = vmatpush3.bf16.msra.mxu1 %v6224_v47 }
0x2345   : > { %v4896_v58 = vpop.f32.mrf.mxu1 }
0x2347   : > { %v6006_v61 = vpop.f32.mrf.mxu1 }
0x2349   : > { %v4899_v31 = vpop.f32.mrf.mxu1 }
0x234b   : > { %v6007_v17 = vpop.f32.mrf.mxu1 }
0x234d   : > { %v4966_v22 = vpop.f32.mrf.mxu1 }
0x234e   : > { %v4967_v35 = vadd.f32 %v5437_v32, %v4966_v22 }
0x234f   : > { %v6014_v16 = vpop.f32.mrf.mxu1 }
0x2350   : > { %v4973_v26 = vsel %vm4972_vm6, %v4967_v35, 0.0 }
0x2351   : > { %v4974_v36 = vrot.slane %v4973_v26, 4  ;;  %v4969_v37 = vpop.f32.mrf.mxu1 }
0x2353   : > { %v4975_v38 = vadd.f32 %v4974_v36, %v4973_v26  ;;  %v6015_v59 = vpop.f32.mrf.mxu1 }
0x2355   : > { %v4976_v44 = vrot.slane %v4975_v38, 2 }
0x2357   : > { %v4977_v52 = vadd.f32 %v4976_v44, %v4975_v38 }
0x2359   : > { %v4978_v45 = vrot.slane %v4977_v52, 1 }
0x235b   : > { %v4979_v46 = vadd.f32 %v4978_v45, %v4977_v52 }
0x235d   : > { %v4981_v49 = vmul.f32 0.5, %v4979_v46 }
0x235f   : > { %v4982_v56 = vsub.f32 %v4967_v35, %v4981_v49 }
0x2361   : > { %v4983_v60 = vmul.f32 %v4982_v56, %v4982_v56 }
0x2363   : > { %v4984_v50 = vsel %vm4972_vm6, %v4983_v60, 0.0 }
0x2364   : > { %v4985_v8 = vrot.slane %v4984_v50, 4 }
0x2366   : > { %v4986_v57 = vadd.f32 %v4985_v8, %v4984_v50 }
0x2368   : > { %v4987_v10 = vrot.slane %v4986_v57, 2 }
0x236a   : > { %v4988_v55 = vadd.f32 %v4987_v10, %v4986_v57 }
0x236c   : > { %v4989_v62 = vrot.slane %v4988_v55, 1 }
0x236e   : > { %v4990_v0 = vadd.f32 %v4989_v62, %v4988_v55 }
0x2370   : > { %v4991_v3 = vmul.f32 0.5, %v4990_v0 }
0x2372   : > { %v4992_v19 = vadd.f32 1e-05, %v4991_v3 }
0x2374   : > { %6326 = vrsqrt.f32 %v4992_v19 }
0x2381   : > { %v6327_v54 = vpop.eup %6326 }
0x2382   : > { %v4994_v39 = vmul.f32 %v6327_v54, %v4982_v56 }
0x2384   : > { %v4995_v43 = vmax.f32 %v4994_v39, 0.0 }
0x2386   : > { %v4996_v63 = vpack.c.bf16 %v4995_v43, %v4995_v43 }
0x2388   : > { %6021 = vmatmul.mubr.msk.bf16.vlgmr.msra.gmra.mxu1 %vm1990_vm14, %v4996_v63 }
0x2448   : > { %v5052_v5 = vpop.f32.mrf.mxu1 }
0x2449   : > { %v5053_v6 = vadd.f32 %v5441_v1, %v5052_v5 }
0x244a   : > { %v6022_v53 = vpop.f32.mrf.mxu1 }
0x244b   : > { %5128 = vrot.lane.b32.xlu0 %v5053_v6, %s7368_s5  ;;  %v5058_v2 = vmul.f32 %v5053_v6, %v5053_v6 }
0x244c   : > { %v5055_v4 = vpop.f32.mrf.mxu1 }
0x244d   : > { %v5060_v7 = vsel %vm5059_vm7, %v5058_v2, 0.0 }
0x244e   : > { %5061 = vadd.xlane.f32.xlu1 %v5060_v7  ;;  %v6023_v9 = vpop.f32.mrf.mxu1 }
0x245f   : > { %5124 = vrot.lane.b32.xlu1 %v4896_v58, %s6395_s6 }
0x24bd   : > { %v5129_v51 = vpop.permute.xlu0 %5128 }
0x24d7   : > { %v5062_v12 = vpop.xlane.xlu1 %5061 }
0x24d8   : > { %6328 = vrsqrt.f32 %v5062_v12  ;;  %vm5065_vm8 = vcmp.eq.f32.partialorder %v5062_v12, inf  ;;  %v5068_v15 = vand.u32 2147483648, %v5062_v12  ;;  %vm5067_vm9 = vcmp.eq.f32.partialorder %v5062_v12, 0.0 }
0x24db   : > { %v5125_v27 = vpop.permute.xlu1 %5124 }
0x24dc   : > { %v5135_v33 = vsel %vm1990_vm14, %v7265_v29, %v5125_v27 }
0x24dd   : > { %v5136_v28 = vsel %vm1899_vm11, %v5135_v33, %v5129_v51 }
0x24e5   : > { %v6329_v13 = vpop.eup %6328 }
0x24e6   : > { %v5064_v14 = vmul.f32 %v6329_v13, %v5062_v12 }
0x24e8   : > { %v5066_v18 = vsel %vm5065_vm8, %v5062_v12, %v5064_v14 }
0x24e9   : > { %v5069_v20 = vsel %vm5067_vm9, %v5068_v15, %v5066_v18 }
0x24ea   : > { %v5070_v21 = vmax.f32 %v5069_v20, 1e-12 }
0x24ec   : > { %6330 = vrcp.f32 %v5070_v21 }
0x24f9   : > { %v6331_v23 = vpop.eup %6330 }
0x24fa   : > { %v5072_v41 = vmul.f32 %v6331_v23, %v5053_v6 }
0x24fc   : > { %v5073_v24 = vpack.c.bf16 %v5072_v41, %v5072_v41 }
0x24fe   : > { %6027 = vmatmul.mubr.msk.bf16.vlgmr.msra.gmra.mxu0 %vm3026_vm3, %v5073_v24 }
0x25be   : > { %v5117_v25 = vpop.f32.mrf.mxu0 }
0x25bf   : > { %5132 = vrot.lane.b32.xlu1 %v5117_v25, %s7369_s18 }
0x25c0   : > { %v6028_v34 = vpop.f32.mrf.mxu0 }
0x25c2   : > { %v5120_v40 = vpop.f32.mrf.mxu0 }
0x25c4   : > { %v6029_v48 = vpop.f32.mrf.mxu0 }
0x2631   : > { %v5133_v30 = vpop.permute.xlu1 %5132 }
0x2632   : > { %v5138_v47 = vsel %vm5137_vm10, %v5136_v28, %v5133_v30 }
0x2633   : > { %v5140_v58 = vsel %vm5139_vm12, %v5138_v47, 0.0 }
0x2634   : > { %v5143_v61 = vcombine.low %v5140_v58, %v6379_v42 }
0x2636   : > { %5447 = vst.sshfl [vmem:[%s6579_s7] sm:$0x33 pattern:$0x76325410] %v5143_v61 }
0x2637 PF: > { %s75_s28 = sadd.s32 1, %s6338_s28  }
0x2638   : > { %p72_p6 = scmp.ge.s32.totalorder %s75_s28, 4  }
0x263a   :  { %74 = sbr.rel (!%p72_p6) target bundleno = 55 (0x37), region = 227 }

</bundles_post_ra>
